<compile_context>
chip_gen: v5e
topology: v5e:2x2
jax: 0.10.0
libtpu: 0.0.40
codegen_flags: <defaults>
</compile_context>

<pallas_src>
import jax
import jax.numpy as jnp
from jax import lax
from jax.experimental import pallas as pl
from jax.experimental.pallas import tpu as pltpu

PAD = 128  # per-gate lane padding


# ----------------------------- Pallas kernel --------------------------------
def discriminator_kernel(src_ref, kph_ref,
                         wih1_ref, whh1_ref, bin1_ref, bhn1_ref,
                         wih2_ref, whh2_ref, bin2_ref, bhn2_ref,
                         out_ref):
    T1 = src_ref.shape[0]
    T2 = kph_ref.shape[0]
    H = whh1_ref.shape[0]          # real hidden size (32)
    P = bhn1_ref.shape[1]          # padded gate width (128)

    # ---- hoisted input projections: one batched MXU call per RNN (kept as values) ----
    # xp[t] = x_t @ Wih_padded + (b_ih + [b_hr, b_hz, 0]), gate order (r, z, n),
    # each gate occupying lanes [g*P, g*P+H) of a 3*P-wide row.
    xp1 = jnp.dot(src_ref[...], wih1_ref[...],
                  preferred_element_type=jnp.float32) + bin1_ref[...]      # (T1, 3P)
    xp2 = jnp.dot(kph_ref[...], wih2_ref[...],
                  preferred_element_type=jnp.float32) + bin2_ref[...]      # (T2, 3P)

    # ---- loop-invariant hidden weights / remaining bias (values) ----
    whh1 = whh1_ref[...]           # (H, 3P), gate-padded columns
    whh2 = whh2_ref[...]
    bhn1 = bhn1_ref[...]           # (1, P)   (b_hn -- must stay inside r * (...))
    bhn2 = bhn2_ref[...]

    def gru_step(xp_t, h, whh, bhn):
        # h: (1, P) with lanes H..P-1 always zero.  One fused hidden matmul,
        # all gate slices at 128-lane (vreg) boundaries.
        gh = jnp.dot(h[:, :H], whh, preferred_element_type=jnp.float32)    # (1, 3P)
        sig = jax.nn.sigmoid(xp_t[:, :2 * P] + gh[:, :2 * P])              # one EUP pass
        r = sig[:, :P]
        z = sig[:, P:2 * P]
        n = jnp.tanh(xp_t[:, 2 * P:] + r * (gh[:, 2 * P:] + bhn))
        return (1.0 - z) * n + z * h

    h1 = jnp.zeros((1, P), jnp.float32)
    h2 = jnp.zeros((1, P), jnp.float32)
    hsum = jnp.zeros((1, P), jnp.float32)

    # ---- interleaved, fully-unrolled recurrences (static Python loop) ----
    for t in range(max(T1, T2)):
        if t < T2:                                   # RNN2: only final hidden needed
            h2 = gru_step(xp2[t:t + 1, :], h2, whh2, bhn2)
        if t < T1:                                   # RNN1: accumulate sum_t h_t
            h1 = gru_step(xp1[t:t + 1, :], h1, whh1, bhn1)
            hsum = hsum + h1

    # mean_t (h_t . keyphrase) == ((sum_t h_t) . keyphrase) / T1
    # (padding lanes are zero in both operands, so they contribute nothing)
    out_ref[...] = jnp.sum(hsum * h2, axis=1, keepdims=True) * (1.0 / T1)


# ------------------------------- wrapper -------------------------------------
def discriminator_forward(src, kph, fused):
    """src: (T1, B, E), kph: (T2, B, E), B == 1 -> (B,) cosine averages."""
    T1, B, E = src.shape
    T2 = kph.shape[0]
    assert B == 1, "torch.bmm in the original module requires batch == 1"

    vmem = pl.BlockSpec(memory_space=pltpu.MemorySpace.VMEM)
    args = (src.reshape(T1, E), kph.reshape(T2, E),
            fused["wih1"], fused["whh1"], fused["bin1"], fused["bhn1"],
            fused["wih2"], fused["whh2"], fused["bin2"], fused["bhn2"])
    out = pl.pallas_call(
        discriminator_kernel,
        out_shape=jax.ShapeDtypeStruct((1, 1), jnp.float32),
        in_specs=[vmem] * len(args),
        out_specs=vmem,
    )(*args)
    return out[:, 0]


# ------------------------- parameters (PyTorch layout) ------------------------
def init_raw_params(key, E, H):
    """PyTorch-style GRU params: weight_ih (3H,E), weight_hh (3H,H), biases (3H,)."""
    ks = jax.random.split(key, 8)
    s = 1.0 / jnp.sqrt(jnp.float32(H))

    def u(k, shape):
        return jax.random.uniform(k, shape, jnp.float32, -s, s)

    return dict(
        wih1=u(ks[0], (3 * H, E)), whh1=u(ks[1], (3 * H, H)),
        bih1=u(ks[2], (3 * H,)),   bhh1=u(ks[3], (3 * H,)),
        wih2=u(ks[4], (3 * H, E)), whh2=u(ks[5], (3 * H, H)),
        bih2=u(ks[6], (3 * H,)),   bhh2=u(ks[7], (3 * H,)),
    )


def fuse_params(raw, P=PAD):
    """Gate-fused, pre-transposed, bias-folded, 128-lane gate-padded layout."""
    def pad_cols(w, H):
        # (rows, 3H) -> (rows, 3P), gate g mapped to lanes [g*P, g*P+H)
        rows = w.shape[0]
        out = jnp.zeros((rows, 3 * P), jnp.float32)
        for g in range(3):
            out = out.at[:, g * P:g * P + H].set(w[:, g * H:(g + 1) * H])
        return out

    def pad_bias(b, H):
        out = jnp.zeros((3 * P,), jnp.float32)
        for g in range(3):
            out = out.at[g * P:g * P + H].set(b[g * H:(g + 1) * H])
        return out.reshape(1, 3 * P)

    def fuse(wih, whh, bih, bhh):
        H = whh.shape[1]
        # fold b_hr, b_hz into the input-projection bias; keep b_hn separate.
        bin_ = bih + jnp.concatenate([bhh[:2 * H], jnp.zeros((H,), jnp.float32)])
        bhn = jnp.zeros((P,), jnp.float32).at[:H].set(bhh[2 * H:]).reshape(1, P)
        return (pad_cols(jnp.transpose(wih), H),    # (E, 3P)
                pad_cols(jnp.transpose(whh), H),    # (H, 3P)
                pad_bias(bin_, H),                  # (1, 3P)
                bhn)                                # (1, P)

    w1 = fuse(raw["wih1"], raw["whh1"], raw["bih1"], raw["bhh1"])
    w2 = fuse(raw["wih2"], raw["whh2"], raw["bih2"], raw["bhh2"])
    return dict(wih1=w1[0], whh1=w1[1], bin1=w1[2], bhn1=w1[3],
                wih2=w2[0], whh2=w2[1], bin2=w2[2], bhn2=w2[3])


# --------------- pure-JAX reference (mirrors the PyTorch forward) -------------
def _gru_ref(x_seq, wih, whh, bih, bhh):
    """x_seq: (T, B, E); PyTorch GRU equations, gate order (r, z, n)."""
    H = whh.shape[1]
    B = x_seq.shape[1]
    wir, wiz, win = wih[:H], wih[H:2 * H], wih[2 * H:]
    whr, whz, whn = whh[:H], whh[H:2 * H], whh[2 * H:]
    bir, biz, binn = bih[:H], bih[H:2 * H], bih[2 * H:]
    bhr, bhz, bhn = bhh[:H], bhh[H:2 * H], bhh[2 * H:]

    def step(h, x):
        r = jax.nn.sigmoid(x @ wir.T + bir + h @ whr.T + bhr)
        z = jax.nn.sigmoid(x @ wiz.T + biz + h @ whz.T + bhz)
        n = jnp.tanh(x @ win.T + binn + r * (h @ whn.T + bhn))
        h = (1.0 - z) * n + z * h
        return h, h

    h_n, outs = lax.scan(step, jnp.zeros((B, H), jnp.float32), x_seq)
    return outs, h_n


def discriminator_ref(src, kph, p):
    abstract_d, _ = _gru_ref(src, p["wih1"], p["whh1"], p["bih1"], p["bhh1"])  # (T1,B,H)
    abstract_d = jnp.transpose(abstract_d, (1, 0, 2))                          # (B,T1,H)
    _, h2 = _gru_ref(kph, p["wih2"], p["whh2"], p["bih2"], p["bhh2"])          # (B,H)
    keyphrase_d = h2[0:1, :][:, :, None]                                       # (1,H,1)
    cosine = jnp.einsum("bth,bhj->btj", abstract_d, keyphrase_d)[:, :, 0]      # (B,T1)
    return jnp.mean(cosine, axis=1)


if __name__ == "__main__":
    key = jax.random.PRNGKey(0)
    k_src, k_kph, k_par = jax.random.split(key, 3)

    # batch = 1 because torch.bmm in the original requires batch == 1 of RNN2's h_n.
    T1, T2, B, E, H = 16, 8, 1, 32, 32

    src = jax.random.normal(k_src, (T1, B, E), jnp.float32)
    kph = jax.random.normal(k_kph, (T2, B, E), jnp.float32)

    raw = init_raw_params(k_par, E, H)
    fused = fuse_params(raw)

    out = discriminator_forward(src, kph, fused)
    jax.block_until_ready(out)

    ref = discriminator_ref(src, kph, raw)
    assert out.shape == (B,)
    assert jnp.allclose(out, ref, atol=1e-4, rtol=1e-4), (out, ref)
    print("KERNEL_OK")
</pallas_src>

<mosaic_0001>
module attributes {stable_mosaic.version = 11 : i64} {
  func.func @discriminator_kernel(%arg0: memref<16x32xf32, #tpu.memory_space<vmem>>, %arg1: memref<8x32xf32, #tpu.memory_space<vmem>>, %arg2: memref<32x384xf32, #tpu.memory_space<vmem>>, %arg3: memref<32x384xf32, #tpu.memory_space<vmem>>, %arg4: memref<1x384xf32, #tpu.memory_space<vmem>>, %arg5: memref<1x128xf32, #tpu.memory_space<vmem>>, %arg6: memref<32x384xf32, #tpu.memory_space<vmem>>, %arg7: memref<32x384xf32, #tpu.memory_space<vmem>>, %arg8: memref<1x384xf32, #tpu.memory_space<vmem>>, %arg9: memref<1x128xf32, #tpu.memory_space<vmem>>, %arg10: memref<1x1xf32, #tpu.memory_space<vmem>>) attributes {dimension_semantics = [], scalar_prefetch = 0 : i64, scratch_operands = 0 : i64, tpu.core_type = #tpu.core_type<tc>} {
    %c0 = arith.constant 0 : index
    %c0_0 = arith.constant 0 : index
    %0 = vector.load %arg0[%c0, %c0_0] : memref<16x32xf32, #tpu.memory_space<vmem>>, vector<16x32xf32>
    %c0_1 = arith.constant 0 : index
    %c0_2 = arith.constant 0 : index
    %1 = vector.load %arg2[%c0_1, %c0_2] : memref<32x384xf32, #tpu.memory_space<vmem>>, vector<32x384xf32>
    %cst = arith.constant dense<0.000000e+00> : vector<16x384xf32>
    %2 = tpu.matmul %0, %1, %cst {dimension_numbers = #tpu.dot_dimension_numbers<[1], [0], [0], [1], [0, 0, 1, 1], [], []>} : vector<16x32xf32>, vector<32x384xf32>, vector<16x384xf32> -> vector<16x384xf32>
    %c0_3 = arith.constant 0 : index
    %c0_4 = arith.constant 0 : index
    %3 = vector.load %arg4[%c0_3, %c0_4] : memref<1x384xf32, #tpu.memory_space<vmem>>, vector<1x384xf32>
    %4 = vector.broadcast %3 : vector<1x384xf32> to vector<16x384xf32>
    %5 = arith.addf %2, %4 : vector<16x384xf32>
    %c0_5 = arith.constant 0 : index
    %c0_6 = arith.constant 0 : index
    %6 = vector.load %arg1[%c0_5, %c0_6] : memref<8x32xf32, #tpu.memory_space<vmem>>, vector<8x32xf32>
    %c0_7 = arith.constant 0 : index
    %c0_8 = arith.constant 0 : index
    %7 = vector.load %arg6[%c0_7, %c0_8] : memref<32x384xf32, #tpu.memory_space<vmem>>, vector<32x384xf32>
    %cst_9 = arith.constant dense<0.000000e+00> : vector<8x384xf32>
    %8 = tpu.matmul %6, %7, %cst_9 {dimension_numbers = #tpu.dot_dimension_numbers<[1], [0], [0], [1], [0, 0, 1, 1], [], []>} : vector<8x32xf32>, vector<32x384xf32>, vector<8x384xf32> -> vector<8x384xf32>
    %c0_10 = arith.constant 0 : index
    %c0_11 = arith.constant 0 : index
    %9 = vector.load %arg8[%c0_10, %c0_11] : memref<1x384xf32, #tpu.memory_space<vmem>>, vector<1x384xf32>
    %10 = vector.broadcast %9 : vector<1x384xf32> to vector<8x384xf32>
    %11 = arith.addf %8, %10 : vector<8x384xf32>
    %c0_12 = arith.constant 0 : index
    %c0_13 = arith.constant 0 : index
    %12 = vector.load %arg3[%c0_12, %c0_13] : memref<32x384xf32, #tpu.memory_space<vmem>>, vector<32x384xf32>
    %c0_14 = arith.constant 0 : index
    %c0_15 = arith.constant 0 : index
    %13 = vector.load %arg7[%c0_14, %c0_15] : memref<32x384xf32, #tpu.memory_space<vmem>>, vector<32x384xf32>
    %c0_16 = arith.constant 0 : index
    %c0_17 = arith.constant 0 : index
    %14 = vector.load %arg5[%c0_16, %c0_17] : memref<1x128xf32, #tpu.memory_space<vmem>>, vector<1x128xf32>
    %c0_18 = arith.constant 0 : index
    %c0_19 = arith.constant 0 : index
    %15 = vector.load %arg9[%c0_18, %c0_19] : memref<1x128xf32, #tpu.memory_space<vmem>>, vector<1x128xf32>
    %cst_20 = arith.constant 0.000000e+00 : f32
    %16 = vector.broadcast %cst_20 : f32 to vector<1x128xf32>
    %cst_21 = arith.constant 0.000000e+00 : f32
    %17 = vector.broadcast %cst_21 : f32 to vector<1x128xf32>
    %cst_22 = arith.constant 0.000000e+00 : f32
    %18 = vector.broadcast %cst_22 : f32 to vector<1x128xf32>
    %19 = vector.extract_strided_slice %11 {offsets = [0, 0], sizes = [1, 384], strides = [1, 1]} : vector<8x384xf32> to vector<1x384xf32>
    %20 = vector.extract_strided_slice %17 {offsets = [0, 0], sizes = [1, 32], strides = [1, 1]} : vector<1x128xf32> to vector<1x32xf32>
    %cst_23 = arith.constant dense<0.000000e+00> : vector<1x384xf32>
    %21 = tpu.matmul %20, %13, %cst_23 {dimension_numbers = #tpu.dot_dimension_numbers<[1], [0], [0], [1], [0, 0, 1, 1], [], []>} : vector<1x32xf32>, vector<32x384xf32>, vector<1x384xf32> -> vector<1x384xf32>
    %22 = vector.extract_strided_slice %19 {offsets = [0, 0], sizes = [1, 256], strides = [1, 1]} : vector<1x384xf32> to vector<1x256xf32>
    %23 = vector.extract_strided_slice %21 {offsets = [0, 0], sizes = [1, 256], strides = [1, 1]} : vector<1x384xf32> to vector<1x256xf32>
    %24 = arith.addf %22, %23 : vector<1x256xf32>
    %25 = arith.negf %24 : vector<1x256xf32>
    %26 = math.exp %25 : vector<1x256xf32>
    %cst_24 = arith.constant 1.000000e+00 : f32
    %27 = vector.broadcast %cst_24 : f32 to vector<1x256xf32>
    %28 = arith.addf %27, %26 : vector<1x256xf32>
    %29 = arith.divf %27, %28 : vector<1x256xf32>
    %30 = vector.extract_strided_slice %29 {offsets = [0, 0], sizes = [1, 128], strides = [1, 1]} : vector<1x256xf32> to vector<1x128xf32>
    %31 = vector.extract_strided_slice %29 {offsets = [0, 128], sizes = [1, 128], strides = [1, 1]} : vector<1x256xf32> to vector<1x128xf32>
    %32 = vector.extract_strided_slice %19 {offsets = [0, 256], sizes = [1, 128], strides = [1, 1]} : vector<1x384xf32> to vector<1x128xf32>
    %33 = vector.extract_strided_slice %21 {offsets = [0, 256], sizes = [1, 128], strides = [1, 1]} : vector<1x384xf32> to vector<1x128xf32>
    %34 = arith.addf %33, %15 : vector<1x128xf32>
    %35 = arith.mulf %30, %34 : vector<1x128xf32>
    %36 = arith.addf %32, %35 : vector<1x128xf32>
    %37 = math.tanh %36 : vector<1x128xf32>
    %cst_25 = arith.constant 1.000000e+00 : f32
    %38 = vector.broadcast %cst_25 : f32 to vector<1x128xf32>
    %39 = arith.subf %38, %31 : vector<1x128xf32>
    %40 = arith.mulf %39, %37 : vector<1x128xf32>
    %41 = arith.mulf %31, %17 : vector<1x128xf32>
    %42 = arith.addf %40, %41 : vector<1x128xf32>
    %43 = vector.extract_strided_slice %5 {offsets = [0, 0], sizes = [1, 384], strides = [1, 1]} : vector<16x384xf32> to vector<1x384xf32>
    %44 = vector.extract_strided_slice %16 {offsets = [0, 0], sizes = [1, 32], strides = [1, 1]} : vector<1x128xf32> to vector<1x32xf32>
    %cst_26 = arith.constant dense<0.000000e+00> : vector<1x384xf32>
    %45 = tpu.matmul %44, %12, %cst_26 {dimension_numbers = #tpu.dot_dimension_numbers<[1], [0], [0], [1], [0, 0, 1, 1], [], []>} : vector<1x32xf32>, vector<32x384xf32>, vector<1x384xf32> -> vector<1x384xf32>
    %46 = vector.extract_strided_slice %43 {offsets = [0, 0], sizes = [1, 256], strides = [1, 1]} : vector<1x384xf32> to vector<1x256xf32>
    %47 = vector.extract_strided_slice %45 {offsets = [0, 0], sizes = [1, 256], strides = [1, 1]} : vector<1x384xf32> to vector<1x256xf32>
    %48 = arith.addf %46, %47 : vector<1x256xf32>
    %49 = arith.negf %48 : vector<1x256xf32>
    %50 = math.exp %49 : vector<1x256xf32>
    %cst_27 = arith.constant 1.000000e+00 : f32
    %51 = vector.broadcast %cst_27 : f32 to vector<1x256xf32>
    %52 = arith.addf %51, %50 : vector<1x256xf32>
    %53 = arith.divf %51, %52 : vector<1x256xf32>
    %54 = vector.extract_strided_slice %53 {offsets = [0, 0], sizes = [1, 128], strides = [1, 1]} : vector<1x256xf32> to vector<1x128xf32>
    %55 = vector.extract_strided_slice %53 {offsets = [0, 128], sizes = [1, 128], strides = [1, 1]} : vector<1x256xf32> to vector<1x128xf32>
    %56 = vector.extract_strided_slice %43 {offsets = [0, 256], sizes = [1, 128], strides = [1, 1]} : vector<1x384xf32> to vector<1x128xf32>
    %57 = vector.extract_strided_slice %45 {offsets = [0, 256], sizes = [1, 128], strides = [1, 1]} : vector<1x384xf32> to vector<1x128xf32>
    %58 = arith.addf %57, %14 : vector<1x128xf32>
    %59 = arith.mulf %54, %58 : vector<1x128xf32>
    %60 = arith.addf %56, %59 : vector<1x128xf32>
    %61 = math.tanh %60 : vector<1x128xf32>
    %cst_28 = arith.constant 1.000000e+00 : f32
    %62 = vector.broadcast %cst_28 : f32 to vector<1x128xf32>
    %63 = arith.subf %62, %55 : vector<1x128xf32>
    %64 = arith.mulf %63, %61 : vector<1x128xf32>
    %65 = arith.mulf %55, %16 : vector<1x128xf32>
    %66 = arith.addf %64, %65 : vector<1x128xf32>
    %67 = arith.addf %18, %66 : vector<1x128xf32>
    %68 = vector.extract_strided_slice %11 {offsets = [1, 0], sizes = [1, 384], strides = [1, 1]} : vector<8x384xf32> to vector<1x384xf32>
    %69 = vector.extract_strided_slice %42 {offsets = [0, 0], sizes = [1, 32], strides = [1, 1]} : vector<1x128xf32> to vector<1x32xf32>
    %cst_29 = arith.constant dense<0.000000e+00> : vector<1x384xf32>
    %70 = tpu.matmul %69, %13, %cst_29 {dimension_numbers = #tpu.dot_dimension_numbers<[1], [0], [0], [1], [0, 0, 1, 1], [], []>} : vector<1x32xf32>, vector<32x384xf32>, vector<1x384xf32> -> vector<1x384xf32>
    %71 = vector.extract_strided_slice %68 {offsets = [0, 0], sizes = [1, 256], strides = [1, 1]} : vector<1x384xf32> to vector<1x256xf32>
    %72 = vector.extract_strided_slice %70 {offsets = [0, 0], sizes = [1, 256], strides = [1, 1]} : vector<1x384xf32> to vector<1x256xf32>
    %73 = arith.addf %71, %72 : vector<1x256xf32>
    %74 = arith.negf %73 : vector<1x256xf32>
    %75 = math.exp %74 : vector<1x256xf32>
    %cst_30 = arith.constant 1.000000e+00 : f32
    %76 = vector.broadcast %cst_30 : f32 to vector<1x256xf32>
    %77 = arith.addf %76, %75 : vector<1x256xf32>
    %78 = arith.divf %76, %77 : vector<1x256xf32>
    %79 = vector.extract_strided_slice %78 {offsets = [0, 0], sizes = [1, 128], strides = [1, 1]} : vector<1x256xf32> to vector<1x128xf32>
    %80 = vector.extract_strided_slice %78 {offsets = [0, 128], sizes = [1, 128], strides = [1, 1]} : vector<1x256xf32> to vector<1x128xf32>
    %81 = vector.extract_strided_slice %68 {offsets = [0, 256], sizes = [1, 128], strides = [1, 1]} : vector<1x384xf32> to vector<1x128xf32>
    %82 = vector.extract_strided_slice %70 {offsets = [0, 256], sizes = [1, 128], strides = [1, 1]} : vector<1x384xf32> to vector<1x128xf32>
    %83 = arith.addf %82, %15 : vector<1x128xf32>
    %84 = arith.mulf %79, %83 : vector<1x128xf32>
    %85 = arith.addf %81, %84 : vector<1x128xf32>
    %86 = math.tanh %85 : vector<1x128xf32>
    %cst_31 = arith.constant 1.000000e+00 : f32
    %87 = vector.broadcast %cst_31 : f32 to vector<1x128xf32>
    %88 = arith.subf %87, %80 : vector<1x128xf32>
    %89 = arith.mulf %88, %86 : vector<1x128xf32>
    %90 = arith.mulf %80, %42 : vector<1x128xf32>
    %91 = arith.addf %89, %90 : vector<1x128xf32>
    %92 = vector.extract_strided_slice %5 {offsets = [1, 0], sizes = [1, 384], strides = [1, 1]} : vector<16x384xf32> to vector<1x384xf32>
    %93 = vector.extract_strided_slice %66 {offsets = [0, 0], sizes = [1, 32], strides = [1, 1]} : vector<1x128xf32> to vector<1x32xf32>
    %cst_32 = arith.constant dense<0.000000e+00> : vector<1x384xf32>
    %94 = tpu.matmul %93, %12, %cst_32 {dimension_numbers = #tpu.dot_dimension_numbers<[1], [0], [0], [1], [0, 0, 1, 1], [], []>} : vector<1x32xf32>, vector<32x384xf32>, vector<1x384xf32> -> vector<1x384xf32>
    %95 = vector.extract_strided_slice %92 {offsets = [0, 0], sizes = [1, 256], strides = [1, 1]} : vector<1x384xf32> to vector<1x256xf32>
    %96 = vector.extract_strided_slice %94 {offsets = [0, 0], sizes = [1, 256], strides = [1, 1]} : vector<1x384xf32> to vector<1x256xf32>
    %97 = arith.addf %95, %96 : vector<1x256xf32>
    %98 = arith.negf %97 : vector<1x256xf32>
    %99 = math.exp %98 : vector<1x256xf32>
    %cst_33 = arith.constant 1.000000e+00 : f32
    %100 = vector.broadcast %cst_33 : f32 to vector<1x256xf32>
    %101 = arith.addf %100, %99 : vector<1x256xf32>
    %102 = arith.divf %100, %101 : vector<1x256xf32>
    %103 = vector.extract_strided_slice %102 {offsets = [0, 0], sizes = [1, 128], strides = [1, 1]} : vector<1x256xf32> to vector<1x128xf32>
    %104 = vector.extract_strided_slice %102 {offsets = [0, 128], sizes = [1, 128], strides = [1, 1]} : vector<1x256xf32> to vector<1x128xf32>
    %105 = vector.extract_strided_slice %92 {offsets = [0, 256], sizes = [1, 128], strides = [1, 1]} : vector<1x384xf32> to vector<1x128xf32>
    %106 = vector.extract_strided_slice %94 {offsets = [0, 256], sizes = [1, 128], strides = [1, 1]} : vector<1x384xf32> to vector<1x128xf32>
    %107 = arith.addf %106, %14 : vector<1x128xf32>
    %108 = arith.mulf %103, %107 : vector<1x128xf32>
    %109 = arith.addf %105, %108 : vector<1x128xf32>
    %110 = math.tanh %109 : vector<1x128xf32>
    %cst_34 = arith.constant 1.000000e+00 : f32
    %111 = vector.broadcast %cst_34 : f32 to vector<1x128xf32>
    %112 = arith.subf %111, %104 : vector<1x128xf32>
    %113 = arith.mulf %112, %110 : vector<1x128xf32>
    %114 = arith.mulf %104, %66 : vector<1x128xf32>
    %115 = arith.addf %113, %114 : vector<1x128xf32>
    %116 = arith.addf %67, %115 : vector<1x128xf32>
    %117 = vector.extract_strided_slice %11 {offsets = [2, 0], sizes = [1, 384], strides = [1, 1]} : vector<8x384xf32> to vector<1x384xf32>
    %118 = vector.extract_strided_slice %91 {offsets = [0, 0], sizes = [1, 32], strides = [1, 1]} : vector<1x128xf32> to vector<1x32xf32>
    %cst_35 = arith.constant dense<0.000000e+00> : vector<1x384xf32>
    %119 = tpu.matmul %118, %13, %cst_35 {dimension_numbers = #tpu.dot_dimension_numbers<[1], [0], [0], [1], [0, 0, 1, 1], [], []>} : vector<1x32xf32>, vector<32x384xf32>, vector<1x384xf32> -> vector<1x384xf32>
    %120 = vector.extract_strided_slice %117 {offsets = [0, 0], sizes = [1, 256], strides = [1, 1]} : vector<1x384xf32> to vector<1x256xf32>
    %121 = vector.extract_strided_slice %119 {offsets = [0, 0], sizes = [1, 256], strides = [1, 1]} : vector<1x384xf32> to vector<1x256xf32>
    %122 = arith.addf %120, %121 : vector<1x256xf32>
    %123 = arith.negf %122 : vector<1x256xf32>
    %124 = math.exp %123 : vector<1x256xf32>
    %cst_36 = arith.constant 1.000000e+00 : f32
    %125 = vector.broadcast %cst_36 : f32 to vector<1x256xf32>
    %126 = arith.addf %125, %124 : vector<1x256xf32>
    %127 = arith.divf %125, %126 : vector<1x256xf32>
    %128 = vector.extract_strided_slice %127 {offsets = [0, 0], sizes = [1, 128], strides = [1, 1]} : vector<1x256xf32> to vector<1x128xf32>
    %129 = vector.extract_strided_slice %127 {offsets = [0, 128], sizes = [1, 128], strides = [1, 1]} : vector<1x256xf32> to vector<1x128xf32>
    %130 = vector.extract_strided_slice %117 {offsets = [0, 256], sizes = [1, 128], strides = [1, 1]} : vector<1x384xf32> to vector<1x128xf32>
    %131 = vector.extract_strided_slice %119 {offsets = [0, 256], sizes = [1, 128], strides = [1, 1]} : vector<1x384xf32> to vector<1x128xf32>
    %132 = arith.addf %131, %15 : vector<1x128xf32>
    %133 = arith.mulf %128, %132 : vector<1x128xf32>
    %134 = arith.addf %130, %133 : vector<1x128xf32>
    %135 = math.tanh %134 : vector<1x128xf32>
    %cst_37 = arith.constant 1.000000e+00 : f32
    %136 = vector.broadcast %cst_37 : f32 to vector<1x128xf32>
    %137 = arith.subf %136, %129 : vector<1x128xf32>
    %138 = arith.mulf %137, %135 : vector<1x128xf32>
    %139 = arith.mulf %129, %91 : vector<1x128xf32>
    %140 = arith.addf %138, %139 : vector<1x128xf32>
    %141 = vector.extract_strided_slice %5 {offsets = [2, 0], sizes = [1, 384], strides = [1, 1]} : vector<16x384xf32> to vector<1x384xf32>
    %142 = vector.extract_strided_slice %115 {offsets = [0, 0], sizes = [1, 32], strides = [1, 1]} : vector<1x128xf32> to vector<1x32xf32>
    %cst_38 = arith.constant dense<0.000000e+00> : vector<1x384xf32>
    %143 = tpu.matmul %142, %12, %cst_38 {dimension_numbers = #tpu.dot_dimension_numbers<[1], [0], [0], [1], [0, 0, 1, 1], [], []>} : vector<1x32xf32>, vector<32x384xf32>, vector<1x384xf32> -> vector<1x384xf32>
    %144 = vector.extract_strided_slice %141 {offsets = [0, 0], sizes = [1, 256], strides = [1, 1]} : vector<1x384xf32> to vector<1x256xf32>
    %145 = vector.extract_strided_slice %143 {offsets = [0, 0], sizes = [1, 256], strides = [1, 1]} : vector<1x384xf32> to vector<1x256xf32>
    %146 = arith.addf %144, %145 : vector<1x256xf32>
    %147 = arith.negf %146 : vector<1x256xf32>
    %148 = math.exp %147 : vector<1x256xf32>
    %cst_39 = arith.constant 1.000000e+00 : f32
    %149 = vector.broadcast %cst_39 : f32 to vector<1x256xf32>
    %150 = arith.addf %149, %148 : vector<1x256xf32>
    %151 = arith.divf %149, %150 : vector<1x256xf32>
    %152 = vector.extract_strided_slice %151 {offsets = [0, 0], sizes = [1, 128], strides = [1, 1]} : vector<1x256xf32> to vector<1x128xf32>
    %153 = vector.extract_strided_slice %151 {offsets = [0, 128], sizes = [1, 128], strides = [1, 1]} : vector<1x256xf32> to vector<1x128xf32>
    %154 = vector.extract_strided_slice %141 {offsets = [0, 256], sizes = [1, 128], strides = [1, 1]} : vector<1x384xf32> to vector<1x128xf32>
    %155 = vector.extract_strided_slice %143 {offsets = [0, 256], sizes = [1, 128], strides = [1, 1]} : vector<1x384xf32> to vector<1x128xf32>
    %156 = arith.addf %155, %14 : vector<1x128xf32>
    %157 = arith.mulf %152, %156 : vector<1x128xf32>
    %158 = arith.addf %154, %157 : vector<1x128xf32>
    %159 = math.tanh %158 : vector<1x128xf32>
    %cst_40 = arith.constant 1.000000e+00 : f32
    %160 = vector.broadcast %cst_40 : f32 to vector<1x128xf32>
    %161 = arith.subf %160, %153 : vector<1x128xf32>
    %162 = arith.mulf %161, %159 : vector<1x128xf32>
    %163 = arith.mulf %153, %115 : vector<1x128xf32>
    %164 = arith.addf %162, %163 : vector<1x128xf32>
    %165 = arith.addf %116, %164 : vector<1x128xf32>
    %166 = vector.extract_strided_slice %11 {offsets = [3, 0], sizes = [1, 384], strides = [1, 1]} : vector<8x384xf32> to vector<1x384xf32>
    %167 = vector.extract_strided_slice %140 {offsets = [0, 0], sizes = [1, 32], strides = [1, 1]} : vector<1x128xf32> to vector<1x32xf32>
    %cst_41 = arith.constant dense<0.000000e+00> : vector<1x384xf32>
    %168 = tpu.matmul %167, %13, %cst_41 {dimension_numbers = #tpu.dot_dimension_numbers<[1], [0], [0], [1], [0, 0, 1, 1], [], []>} : vector<1x32xf32>, vector<32x384xf32>, vector<1x384xf32> -> vector<1x384xf32>
    %169 = vector.extract_strided_slice %166 {offsets = [0, 0], sizes = [1, 256], strides = [1, 1]} : vector<1x384xf32> to vector<1x256xf32>
    %170 = vector.extract_strided_slice %168 {offsets = [0, 0], sizes = [1, 256], strides = [1, 1]} : vector<1x384xf32> to vector<1x256xf32>
    %171 = arith.addf %169, %170 : vector<1x256xf32>
    %172 = arith.negf %171 : vector<1x256xf32>
    %173 = math.exp %172 : vector<1x256xf32>
    %cst_42 = arith.constant 1.000000e+00 : f32
    %174 = vector.broadcast %cst_42 : f32 to vector<1x256xf32>
    %175 = arith.addf %174, %173 : vector<1x256xf32>
    %176 = arith.divf %174, %175 : vector<1x256xf32>
    %177 = vector.extract_strided_slice %176 {offsets = [0, 0], sizes = [1, 128], strides = [1, 1]} : vector<1x256xf32> to vector<1x128xf32>
    %178 = vector.extract_strided_slice %176 {offsets = [0, 128], sizes = [1, 128], strides = [1, 1]} : vector<1x256xf32> to vector<1x128xf32>
    %179 = vector.extract_strided_slice %166 {offsets = [0, 256], sizes = [1, 128], strides = [1, 1]} : vector<1x384xf32> to vector<1x128xf32>
    %180 = vector.extract_strided_slice %168 {offsets = [0, 256], sizes = [1, 128], strides = [1, 1]} : vector<1x384xf32> to vector<1x128xf32>
    %181 = arith.addf %180, %15 : vector<1x128xf32>
    %182 = arith.mulf %177, %181 : vector<1x128xf32>
    %183 = arith.addf %179, %182 : vector<1x128xf32>
    %184 = math.tanh %183 : vector<1x128xf32>
    %cst_43 = arith.constant 1.000000e+00 : f32
    %185 = vector.broadcast %cst_43 : f32 to vector<1x128xf32>
    %186 = arith.subf %185, %178 : vector<1x128xf32>
    %187 = arith.mulf %186, %184 : vector<1x128xf32>
    %188 = arith.mulf %178, %140 : vector<1x128xf32>
    %189 = arith.addf %187, %188 : vector<1x128xf32>
    %190 = vector.extract_strided_slice %5 {offsets = [3, 0], sizes = [1, 384], strides = [1, 1]} : vector<16x384xf32> to vector<1x384xf32>
    %191 = vector.extract_strided_slice %164 {offsets = [0, 0], sizes = [1, 32], strides = [1, 1]} : vector<1x128xf32> to vector<1x32xf32>
    %cst_44 = arith.constant dense<0.000000e+00> : vector<1x384xf32>
    %192 = tpu.matmul %191, %12, %cst_44 {dimension_numbers = #tpu.dot_dimension_numbers<[1], [0], [0], [1], [0, 0, 1, 1], [], []>} : vector<1x32xf32>, vector<32x384xf32>, vector<1x384xf32> -> vector<1x384xf32>
    %193 = vector.extract_strided_slice %190 {offsets = [0, 0], sizes = [1, 256], strides = [1, 1]} : vector<1x384xf32> to vector<1x256xf32>
    %194 = vector.extract_strided_slice %192 {offsets = [0, 0], sizes = [1, 256], strides = [1, 1]} : vector<1x384xf32> to vector<1x256xf32>
    %195 = arith.addf %193, %194 : vector<1x256xf32>
    %196 = arith.negf %195 : vector<1x256xf32>
    %197 = math.exp %196 : vector<1x256xf32>
    %cst_45 = arith.constant 1.000000e+00 : f32
    %198 = vector.broadcast %cst_45 : f32 to vector<1x256xf32>
    %199 = arith.addf %198, %197 : vector<1x256xf32>
    %200 = arith.divf %198, %199 : vector<1x256xf32>
    %201 = vector.extract_strided_slice %200 {offsets = [0, 0], sizes = [1, 128], strides = [1, 1]} : vector<1x256xf32> to vector<1x128xf32>
    %202 = vector.extract_strided_slice %200 {offsets = [0, 128], sizes = [1, 128], strides = [1, 1]} : vector<1x256xf32> to vector<1x128xf32>
    %203 = vector.extract_strided_slice %190 {offsets = [0, 256], sizes = [1, 128], strides = [1, 1]} : vector<1x384xf32> to vector<1x128xf32>
    %204 = vector.extract_strided_slice %192 {offsets = [0, 256], sizes = [1, 128], strides = [1, 1]} : vector<1x384xf32> to vector<1x128xf32>
    %205 = arith.addf %204, %14 : vector<1x128xf32>
    %206 = arith.mulf %201, %205 : vector<1x128xf32>
    %207 = arith.addf %203, %206 : vector<1x128xf32>
    %208 = math.tanh %207 : vector<1x128xf32>
    %cst_46 = arith.constant 1.000000e+00 : f32
    %209 = vector.broadcast %cst_46 : f32 to vector<1x128xf32>
    %210 = arith.subf %209, %202 : vector<1x128xf32>
    %211 = arith.mulf %210, %208 : vector<1x128xf32>
    %212 = arith.mulf %202, %164 : vector<1x128xf32>
    %213 = arith.addf %211, %212 : vector<1x128xf32>
    %214 = arith.addf %165, %213 : vector<1x128xf32>
    %215 = vector.extract_strided_slice %11 {offsets = [4, 0], sizes = [1, 384], strides = [1, 1]} : vector<8x384xf32> to vector<1x384xf32>
    %216 = vector.extract_strided_slice %189 {offsets = [0, 0], sizes = [1, 32], strides = [1, 1]} : vector<1x128xf32> to vector<1x32xf32>
    %cst_47 = arith.constant dense<0.000000e+00> : vector<1x384xf32>
    %217 = tpu.matmul %216, %13, %cst_47 {dimension_numbers = #tpu.dot_dimension_numbers<[1], [0], [0], [1], [0, 0, 1, 1], [], []>} : vector<1x32xf32>, vector<32x384xf32>, vector<1x384xf32> -> vector<1x384xf32>
    %218 = vector.extract_strided_slice %215 {offsets = [0, 0], sizes = [1, 256], strides = [1, 1]} : vector<1x384xf32> to vector<1x256xf32>
    %219 = vector.extract_strided_slice %217 {offsets = [0, 0], sizes = [1, 256], strides = [1, 1]} : vector<1x384xf32> to vector<1x256xf32>
    %220 = arith.addf %218, %219 : vector<1x256xf32>
    %221 = arith.negf %220 : vector<1x256xf32>
    %222 = math.exp %221 : vector<1x256xf32>
    %cst_48 = arith.constant 1.000000e+00 : f32
    %223 = vector.broadcast %cst_48 : f32 to vector<1x256xf32>
    %224 = arith.addf %223, %222 : vector<1x256xf32>
    %225 = arith.divf %223, %224 : vector<1x256xf32>
    %226 = vector.extract_strided_slice %225 {offsets = [0, 0], sizes = [1, 128], strides = [1, 1]} : vector<1x256xf32> to vector<1x128xf32>
    %227 = vector.extract_strided_slice %225 {offsets = [0, 128], sizes = [1, 128], strides = [1, 1]} : vector<1x256xf32> to vector<1x128xf32>
    %228 = vector.extract_strided_slice %215 {offsets = [0, 256], sizes = [1, 128], strides = [1, 1]} : vector<1x384xf32> to vector<1x128xf32>
    %229 = vector.extract_strided_slice %217 {offsets = [0, 256], sizes = [1, 128], strides = [1, 1]} : vector<1x384xf32> to vector<1x128xf32>
    %230 = arith.addf %229, %15 : vector<1x128xf32>
    %231 = arith.mulf %226, %230 : vector<1x128xf32>
    %232 = arith.addf %228, %231 : vector<1x128xf32>
    %233 = math.tanh %232 : vector<1x128xf32>
    %cst_49 = arith.constant 1.000000e+00 : f32
    %234 = vector.broadcast %cst_49 : f32 to vector<1x128xf32>
    %235 = arith.subf %234, %227 : vector<1x128xf32>
    %236 = arith.mulf %235, %233 : vector<1x128xf32>
    %237 = arith.mulf %227, %189 : vector<1x128xf32>
    %238 = arith.addf %236, %237 : vector<1x128xf32>
    %239 = vector.extract_strided_slice %5 {offsets = [4, 0], sizes = [1, 384], strides = [1, 1]} : vector<16x384xf32> to vector<1x384xf32>
    %240 = vector.extract_strided_slice %213 {offsets = [0, 0], sizes = [1, 32], strides = [1, 1]} : vector<1x128xf32> to vector<1x32xf32>
    %cst_50 = arith.constant dense<0.000000e+00> : vector<1x384xf32>
    %241 = tpu.matmul %240, %12, %cst_50 {dimension_numbers = #tpu.dot_dimension_numbers<[1], [0], [0], [1], [0, 0, 1, 1], [], []>} : vector<1x32xf32>, vector<32x384xf32>, vector<1x384xf32> -> vector<1x384xf32>
    %242 = vector.extract_strided_slice %239 {offsets = [0, 0], sizes = [1, 256], strides = [1, 1]} : vector<1x384xf32> to vector<1x256xf32>
    %243 = vector.extract_strided_slice %241 {offsets = [0, 0], sizes = [1, 256], strides = [1, 1]} : vector<1x384xf32> to vector<1x256xf32>
    %244 = arith.addf %242, %243 : vector<1x256xf32>
    %245 = arith.negf %244 : vector<1x256xf32>
    %246 = math.exp %245 : vector<1x256xf32>
    %cst_51 = arith.constant 1.000000e+00 : f32
    %247 = vector.broadcast %cst_51 : f32 to vector<1x256xf32>
    %248 = arith.addf %247, %246 : vector<1x256xf32>
    %249 = arith.divf %247, %248 : vector<1x256xf32>
    %250 = vector.extract_strided_slice %249 {offsets = [0, 0], sizes = [1, 128], strides = [1, 1]} : vector<1x256xf32> to vector<1x128xf32>
    %251 = vector.extract_strided_slice %249 {offsets = [0, 128], sizes = [1, 128], strides = [1, 1]} : vector<1x256xf32> to vector<1x128xf32>
    %252 = vector.extract_strided_slice %239 {offsets = [0, 256], sizes = [1, 128], strides = [1, 1]} : vector<1x384xf32> to vector<1x128xf32>
    %253 = vector.extract_strided_slice %241 {offsets = [0, 256], sizes = [1, 128], strides = [1, 1]} : vector<1x384xf32> to vector<1x128xf32>
    %254 = arith.addf %253, %14 : vector<1x128xf32>
    %255 = arith.mulf %250, %254 : vector<1x128xf32>
    %256 = arith.addf %252, %255 : vector<1x128xf32>
    %257 = math.tanh %256 : vector<1x128xf32>
    %cst_52 = arith.constant 1.000000e+00 : f32
    %258 = vector.broadcast %cst_52 : f32 to vector<1x128xf32>
    %259 = arith.subf %258, %251 : vector<1x128xf32>
    %260 = arith.mulf %259, %257 : vector<1x128xf32>
    %261 = arith.mulf %251, %213 : vector<1x128xf32>
    %262 = arith.addf %260, %261 : vector<1x128xf32>
    %263 = arith.addf %214, %262 : vector<1x128xf32>
    %264 = vector.extract_strided_slice %11 {offsets = [5, 0], sizes = [1, 384], strides = [1, 1]} : vector<8x384xf32> to vector<1x384xf32>
    %265 = vector.extract_strided_slice %238 {offsets = [0, 0], sizes = [1, 32], strides = [1, 1]} : vector<1x128xf32> to vector<1x32xf32>
    %cst_53 = arith.constant dense<0.000000e+00> : vector<1x384xf32>
    %266 = tpu.matmul %265, %13, %cst_53 {dimension_numbers = #tpu.dot_dimension_numbers<[1], [0], [0], [1], [0, 0, 1, 1], [], []>} : vector<1x32xf32>, vector<32x384xf32>, vector<1x384xf32> -> vector<1x384xf32>
    %267 = vector.extract_strided_slice %264 {offsets = [0, 0], sizes = [1, 256], strides = [1, 1]} : vector<1x384xf32> to vector<1x256xf32>
    %268 = vector.extract_strided_slice %266 {offsets = [0, 0], sizes = [1, 256], strides = [1, 1]} : vector<1x384xf32> to vector<1x256xf32>
    %269 = arith.addf %267, %268 : vector<1x256xf32>
    %270 = arith.negf %269 : vector<1x256xf32>
    %271 = math.exp %270 : vector<1x256xf32>
    %cst_54 = arith.constant 1.000000e+00 : f32
    %272 = vector.broadcast %cst_54 : f32 to vector<1x256xf32>
    %273 = arith.addf %272, %271 : vector<1x256xf32>
    %274 = arith.divf %272, %273 : vector<1x256xf32>
    %275 = vector.extract_strided_slice %274 {offsets = [0, 0], sizes = [1, 128], strides = [1, 1]} : vector<1x256xf32> to vector<1x128xf32>
    %276 = vector.extract_strided_slice %274 {offsets = [0, 128], sizes = [1, 128], strides = [1, 1]} : vector<1x256xf32> to vector<1x128xf32>
    %277 = vector.extract_strided_slice %264 {offsets = [0, 256], sizes = [1, 128], strides = [1, 1]} : vector<1x384xf32> to vector<1x128xf32>
    %278 = vector.extract_strided_slice %266 {offsets = [0, 256], sizes = [1, 128], strides = [1, 1]} : vector<1x384xf32> to vector<1x128xf32>
    %279 = arith.addf %278, %15 : vector<1x128xf32>
    %280 = arith.mulf %275, %279 : vector<1x128xf32>
    %281 = arith.addf %277, %280 : vector<1x128xf32>
    %282 = math.tanh %281 : vector<1x128xf32>
    %cst_55 = arith.constant 1.000000e+00 : f32
    %283 = vector.broadcast %cst_55 : f32 to vector<1x128xf32>
    %284 = arith.subf %283, %276 : vector<1x128xf32>
    %285 = arith.mulf %284, %282 : vector<1x128xf32>
    %286 = arith.mulf %276, %238 : vector<1x128xf32>
    %287 = arith.addf %285, %286 : vector<1x128xf32>
    %288 = vector.extract_strided_slice %5 {offsets = [5, 0], sizes = [1, 384], strides = [1, 1]} : vector<16x384xf32> to vector<1x384xf32>
    %289 = vector.extract_strided_slice %262 {offsets = [0, 0], sizes = [1, 32], strides = [1, 1]} : vector<1x128xf32> to vector<1x32xf32>
    %cst_56 = arith.constant dense<0.000000e+00> : vector<1x384xf32>
    %290 = tpu.matmul %289, %12, %cst_56 {dimension_numbers = #tpu.dot_dimension_numbers<[1], [0], [0], [1], [0, 0, 1, 1], [], []>} : vector<1x32xf32>, vector<32x384xf32>, vector<1x384xf32> -> vector<1x384xf32>
    %291 = vector.extract_strided_slice %288 {offsets = [0, 0], sizes = [1, 256], strides = [1, 1]} : vector<1x384xf32> to vector<1x256xf32>
    %292 = vector.extract_strided_slice %290 {offsets = [0, 0], sizes = [1, 256], strides = [1, 1]} : vector<1x384xf32> to vector<1x256xf32>
    %293 = arith.addf %291, %292 : vector<1x256xf32>
    %294 = arith.negf %293 : vector<1x256xf32>
    %295 = math.exp %294 : vector<1x256xf32>
    %cst_57 = arith.constant 1.000000e+00 : f32
    %296 = vector.broadcast %cst_57 : f32 to vector<1x256xf32>
    %297 = arith.addf %296, %295 : vector<1x256xf32>
    %298 = arith.divf %296, %297 : vector<1x256xf32>
    %299 = vector.extract_strided_slice %298 {offsets = [0, 0], sizes = [1, 128], strides = [1, 1]} : vector<1x256xf32> to vector<1x128xf32>
    %300 = vector.extract_strided_slice %298 {offsets = [0, 128], sizes = [1, 128], strides = [1, 1]} : vector<1x256xf32> to vector<1x128xf32>
    %301 = vector.extract_strided_slice %288 {offsets = [0, 256], sizes = [1, 128], strides = [1, 1]} : vector<1x384xf32> to vector<1x128xf32>
    %302 = vector.extract_strided_slice %290 {offsets = [0, 256], sizes = [1, 128], strides = [1, 1]} : vector<1x384xf32> to vector<1x128xf32>
    %303 = arith.addf %302, %14 : vector<1x128xf32>
    %304 = arith.mulf %299, %303 : vector<1x128xf32>
    %305 = arith.addf %301, %304 : vector<1x128xf32>
    %306 = math.tanh %305 : vector<1x128xf32>
    %cst_58 = arith.constant 1.000000e+00 : f32
    %307 = vector.broadcast %cst_58 : f32 to vector<1x128xf32>
    %308 = arith.subf %307, %300 : vector<1x128xf32>
    %309 = arith.mulf %308, %306 : vector<1x128xf32>
    %310 = arith.mulf %300, %262 : vector<1x128xf32>
    %311 = arith.addf %309, %310 : vector<1x128xf32>
    %312 = arith.addf %263, %311 : vector<1x128xf32>
    %313 = vector.extract_strided_slice %11 {offsets = [6, 0], sizes = [1, 384], strides = [1, 1]} : vector<8x384xf32> to vector<1x384xf32>
    %314 = vector.extract_strided_slice %287 {offsets = [0, 0], sizes = [1, 32], strides = [1, 1]} : vector<1x128xf32> to vector<1x32xf32>
    %cst_59 = arith.constant dense<0.000000e+00> : vector<1x384xf32>
    %315 = tpu.matmul %314, %13, %cst_59 {dimension_numbers = #tpu.dot_dimension_numbers<[1], [0], [0], [1], [0, 0, 1, 1], [], []>} : vector<1x32xf32>, vector<32x384xf32>, vector<1x384xf32> -> vector<1x384xf32>
    %316 = vector.extract_strided_slice %313 {offsets = [0, 0], sizes = [1, 256], strides = [1, 1]} : vector<1x384xf32> to vector<1x256xf32>
    %317 = vector.extract_strided_slice %315 {offsets = [0, 0], sizes = [1, 256], strides = [1, 1]} : vector<1x384xf32> to vector<1x256xf32>
    %318 = arith.addf %316, %317 : vector<1x256xf32>
    %319 = arith.negf %318 : vector<1x256xf32>
    %320 = math.exp %319 : vector<1x256xf32>
    %cst_60 = arith.constant 1.000000e+00 : f32
    %321 = vector.broadcast %cst_60 : f32 to vector<1x256xf32>
    %322 = arith.addf %321, %320 : vector<1x256xf32>
    %323 = arith.divf %321, %322 : vector<1x256xf32>
    %324 = vector.extract_strided_slice %323 {offsets = [0, 0], sizes = [1, 128], strides = [1, 1]} : vector<1x256xf32> to vector<1x128xf32>
    %325 = vector.extract_strided_slice %323 {offsets = [0, 128], sizes = [1, 128], strides = [1, 1]} : vector<1x256xf32> to vector<1x128xf32>
    %326 = vector.extract_strided_slice %313 {offsets = [0, 256], sizes = [1, 128], strides = [1, 1]} : vector<1x384xf32> to vector<1x128xf32>
    %327 = vector.extract_strided_slice %315 {offsets = [0, 256], sizes = [1, 128], strides = [1, 1]} : vector<1x384xf32> to vector<1x128xf32>
    %328 = arith.addf %327, %15 : vector<1x128xf32>
    %329 = arith.mulf %324, %328 : vector<1x128xf32>
    %330 = arith.addf %326, %329 : vector<1x128xf32>
    %331 = math.tanh %330 : vector<1x128xf32>
    %cst_61 = arith.constant 1.000000e+00 : f32
    %332 = vector.broadcast %cst_61 : f32 to vector<1x128xf32>
    %333 = arith.subf %332, %325 : vector<1x128xf32>
    %334 = arith.mulf %333, %331 : vector<1x128xf32>
    %335 = arith.mulf %325, %287 : vector<1x128xf32>
    %336 = arith.addf %334, %335 : vector<1x128xf32>
    %337 = vector.extract_strided_slice %5 {offsets = [6, 0], sizes = [1, 384], strides = [1, 1]} : vector<16x384xf32> to vector<1x384xf32>
    %338 = vector.extract_strided_slice %311 {offsets = [0, 0], sizes = [1, 32], strides = [1, 1]} : vector<1x128xf32> to vector<1x32xf32>
    %cst_62 = arith.constant dense<0.000000e+00> : vector<1x384xf32>
    %339 = tpu.matmul %338, %12, %cst_62 {dimension_numbers = #tpu.dot_dimension_numbers<[1], [0], [0], [1], [0, 0, 1, 1], [], []>} : vector<1x32xf32>, vector<32x384xf32>, vector<1x384xf32> -> vector<1x384xf32>
    %340 = vector.extract_strided_slice %337 {offsets = [0, 0], sizes = [1, 256], strides = [1, 1]} : vector<1x384xf32> to vector<1x256xf32>
    %341 = vector.extract_strided_slice %339 {offsets = [0, 0], sizes = [1, 256], strides = [1, 1]} : vector<1x384xf32> to vector<1x256xf32>
    %342 = arith.addf %340, %341 : vector<1x256xf32>
    %343 = arith.negf %342 : vector<1x256xf32>
    %344 = math.exp %343 : vector<1x256xf32>
    %cst_63 = arith.constant 1.000000e+00 : f32
    %345 = vector.broadcast %cst_63 : f32 to vector<1x256xf32>
    %346 = arith.addf %345, %344 : vector<1x256xf32>
    %347 = arith.divf %345, %346 : vector<1x256xf32>
    %348 = vector.extract_strided_slice %347 {offsets = [0, 0], sizes = [1, 128], strides = [1, 1]} : vector<1x256xf32> to vector<1x128xf32>
    %349 = vector.extract_strided_slice %347 {offsets = [0, 128], sizes = [1, 128], strides = [1, 1]} : vector<1x256xf32> to vector<1x128xf32>
    %350 = vector.extract_strided_slice %337 {offsets = [0, 256], sizes = [1, 128], strides = [1, 1]} : vector<1x384xf32> to vector<1x128xf32>
    %351 = vector.extract_strided_slice %339 {offsets = [0, 256], sizes = [1, 128], strides = [1, 1]} : vector<1x384xf32> to vector<1x128xf32>
    %352 = arith.addf %351, %14 : vector<1x128xf32>
    %353 = arith.mulf %348, %352 : vector<1x128xf32>
    %354 = arith.addf %350, %353 : vector<1x128xf32>
    %355 = math.tanh %354 : vector<1x128xf32>
    %cst_64 = arith.constant 1.000000e+00 : f32
    %356 = vector.broadcast %cst_64 : f32 to vector<1x128xf32>
    %357 = arith.subf %356, %349 : vector<1x128xf32>
    %358 = arith.mulf %357, %355 : vector<1x128xf32>
    %359 = arith.mulf %349, %311 : vector<1x128xf32>
    %360 = arith.addf %358, %359 : vector<1x128xf32>
    %361 = arith.addf %312, %360 : vector<1x128xf32>
    %362 = vector.extract_strided_slice %11 {offsets = [7, 0], sizes = [1, 384], strides = [1, 1]} : vector<8x384xf32> to vector<1x384xf32>
    %363 = vector.extract_strided_slice %336 {offsets = [0, 0], sizes = [1, 32], strides = [1, 1]} : vector<1x128xf32> to vector<1x32xf32>
    %cst_65 = arith.constant dense<0.000000e+00> : vector<1x384xf32>
    %364 = tpu.matmul %363, %13, %cst_65 {dimension_numbers = #tpu.dot_dimension_numbers<[1], [0], [0], [1], [0, 0, 1, 1], [], []>} : vector<1x32xf32>, vector<32x384xf32>, vector<1x384xf32> -> vector<1x384xf32>
    %365 = vector.extract_strided_slice %362 {offsets = [0, 0], sizes = [1, 256], strides = [1, 1]} : vector<1x384xf32> to vector<1x256xf32>
    %366 = vector.extract_strided_slice %364 {offsets = [0, 0], sizes = [1, 256], strides = [1, 1]} : vector<1x384xf32> to vector<1x256xf32>
    %367 = arith.addf %365, %366 : vector<1x256xf32>
    %368 = arith.negf %367 : vector<1x256xf32>
    %369 = math.exp %368 : vector<1x256xf32>
    %cst_66 = arith.constant 1.000000e+00 : f32
    %370 = vector.broadcast %cst_66 : f32 to vector<1x256xf32>
    %371 = arith.addf %370, %369 : vector<1x256xf32>
    %372 = arith.divf %370, %371 : vector<1x256xf32>
    %373 = vector.extract_strided_slice %372 {offsets = [0, 0], sizes = [1, 128], strides = [1, 1]} : vector<1x256xf32> to vector<1x128xf32>
    %374 = vector.extract_strided_slice %372 {offsets = [0, 128], sizes = [1, 128], strides = [1, 1]} : vector<1x256xf32> to vector<1x128xf32>
    %375 = vector.extract_strided_slice %362 {offsets = [0, 256], sizes = [1, 128], strides = [1, 1]} : vector<1x384xf32> to vector<1x128xf32>
    %376 = vector.extract_strided_slice %364 {offsets = [0, 256], sizes = [1, 128], strides = [1, 1]} : vector<1x384xf32> to vector<1x128xf32>
    %377 = arith.addf %376, %15 : vector<1x128xf32>
    %378 = arith.mulf %373, %377 : vector<1x128xf32>
    %379 = arith.addf %375, %378 : vector<1x128xf32>
    %380 = math.tanh %379 : vector<1x128xf32>
    %cst_67 = arith.constant 1.000000e+00 : f32
    %381 = vector.broadcast %cst_67 : f32 to vector<1x128xf32>
    %382 = arith.subf %381, %374 : vector<1x128xf32>
    %383 = arith.mulf %382, %380 : vector<1x128xf32>
    %384 = arith.mulf %374, %336 : vector<1x128xf32>
    %385 = arith.addf %383, %384 : vector<1x128xf32>
    %386 = vector.extract_strided_slice %5 {offsets = [7, 0], sizes = [1, 384], strides = [1, 1]} : vector<16x384xf32> to vector<1x384xf32>
    %387 = vector.extract_strided_slice %360 {offsets = [0, 0], sizes = [1, 32], strides = [1, 1]} : vector<1x128xf32> to vector<1x32xf32>
    %cst_68 = arith.constant dense<0.000000e+00> : vector<1x384xf32>
    %388 = tpu.matmul %387, %12, %cst_68 {dimension_numbers = #tpu.dot_dimension_numbers<[1], [0], [0], [1], [0, 0, 1, 1], [], []>} : vector<1x32xf32>, vector<32x384xf32>, vector<1x384xf32> -> vector<1x384xf32>
    %389 = vector.extract_strided_slice %386 {offsets = [0, 0], sizes = [1, 256], strides = [1, 1]} : vector<1x384xf32> to vector<1x256xf32>
    %390 = vector.extract_strided_slice %388 {offsets = [0, 0], sizes = [1, 256], strides = [1, 1]} : vector<1x384xf32> to vector<1x256xf32>
    %391 = arith.addf %389, %390 : vector<1x256xf32>
    %392 = arith.negf %391 : vector<1x256xf32>
    %393 = math.exp %392 : vector<1x256xf32>
    %cst_69 = arith.constant 1.000000e+00 : f32
    %394 = vector.broadcast %cst_69 : f32 to vector<1x256xf32>
    %395 = arith.addf %394, %393 : vector<1x256xf32>
    %396 = arith.divf %394, %395 : vector<1x256xf32>
    %397 = vector.extract_strided_slice %396 {offsets = [0, 0], sizes = [1, 128], strides = [1, 1]} : vector<1x256xf32> to vector<1x128xf32>
    %398 = vector.extract_strided_slice %396 {offsets = [0, 128], sizes = [1, 128], strides = [1, 1]} : vector<1x256xf32> to vector<1x128xf32>
    %399 = vector.extract_strided_slice %386 {offsets = [0, 256], sizes = [1, 128], strides = [1, 1]} : vector<1x384xf32> to vector<1x128xf32>
    %400 = vector.extract_strided_slice %388 {offsets = [0, 256], sizes = [1, 128], strides = [1, 1]} : vector<1x384xf32> to vector<1x128xf32>
    %401 = arith.addf %400, %14 : vector<1x128xf32>
    %402 = arith.mulf %397, %401 : vector<1x128xf32>
    %403 = arith.addf %399, %402 : vector<1x128xf32>
    %404 = math.tanh %403 : vector<1x128xf32>
    %cst_70 = arith.constant 1.000000e+00 : f32
    %405 = vector.broadcast %cst_70 : f32 to vector<1x128xf32>
    %406 = arith.subf %405, %398 : vector<1x128xf32>
    %407 = arith.mulf %406, %404 : vector<1x128xf32>
    %408 = arith.mulf %398, %360 : vector<1x128xf32>
    %409 = arith.addf %407, %408 : vector<1x128xf32>
    %410 = arith.addf %361, %409 : vector<1x128xf32>
    %411 = vector.extract_strided_slice %5 {offsets = [8, 0], sizes = [1, 384], strides = [1, 1]} : vector<16x384xf32> to vector<1x384xf32>
    %412 = vector.extract_strided_slice %409 {offsets = [0, 0], sizes = [1, 32], strides = [1, 1]} : vector<1x128xf32> to vector<1x32xf32>
    %cst_71 = arith.constant dense<0.000000e+00> : vector<1x384xf32>
    %413 = tpu.matmul %412, %12, %cst_71 {dimension_numbers = #tpu.dot_dimension_numbers<[1], [0], [0], [1], [0, 0, 1, 1], [], []>} : vector<1x32xf32>, vector<32x384xf32>, vector<1x384xf32> -> vector<1x384xf32>
    %414 = vector.extract_strided_slice %411 {offsets = [0, 0], sizes = [1, 256], strides = [1, 1]} : vector<1x384xf32> to vector<1x256xf32>
    %415 = vector.extract_strided_slice %413 {offsets = [0, 0], sizes = [1, 256], strides = [1, 1]} : vector<1x384xf32> to vector<1x256xf32>
    %416 = arith.addf %414, %415 : vector<1x256xf32>
    %417 = arith.negf %416 : vector<1x256xf32>
    %418 = math.exp %417 : vector<1x256xf32>
    %cst_72 = arith.constant 1.000000e+00 : f32
    %419 = vector.broadcast %cst_72 : f32 to vector<1x256xf32>
    %420 = arith.addf %419, %418 : vector<1x256xf32>
    %421 = arith.divf %419, %420 : vector<1x256xf32>
    %422 = vector.extract_strided_slice %421 {offsets = [0, 0], sizes = [1, 128], strides = [1, 1]} : vector<1x256xf32> to vector<1x128xf32>
    %423 = vector.extract_strided_slice %421 {offsets = [0, 128], sizes = [1, 128], strides = [1, 1]} : vector<1x256xf32> to vector<1x128xf32>
    %424 = vector.extract_strided_slice %411 {offsets = [0, 256], sizes = [1, 128], strides = [1, 1]} : vector<1x384xf32> to vector<1x128xf32>
    %425 = vector.extract_strided_slice %413 {offsets = [0, 256], sizes = [1, 128], strides = [1, 1]} : vector<1x384xf32> to vector<1x128xf32>
    %426 = arith.addf %425, %14 : vector<1x128xf32>
    %427 = arith.mulf %422, %426 : vector<1x128xf32>
    %428 = arith.addf %424, %427 : vector<1x128xf32>
    %429 = math.tanh %428 : vector<1x128xf32>
    %cst_73 = arith.constant 1.000000e+00 : f32
    %430 = vector.broadcast %cst_73 : f32 to vector<1x128xf32>
    %431 = arith.subf %430, %423 : vector<1x128xf32>
    %432 = arith.mulf %431, %429 : vector<1x128xf32>
    %433 = arith.mulf %423, %409 : vector<1x128xf32>
    %434 = arith.addf %432, %433 : vector<1x128xf32>
    %435 = arith.addf %410, %434 : vector<1x128xf32>
    %436 = vector.extract_strided_slice %5 {offsets = [9, 0], sizes = [1, 384], strides = [1, 1]} : vector<16x384xf32> to vector<1x384xf32>
    %437 = vector.extract_strided_slice %434 {offsets = [0, 0], sizes = [1, 32], strides = [1, 1]} : vector<1x128xf32> to vector<1x32xf32>
    %cst_74 = arith.constant dense<0.000000e+00> : vector<1x384xf32>
    %438 = tpu.matmul %437, %12, %cst_74 {dimension_numbers = #tpu.dot_dimension_numbers<[1], [0], [0], [1], [0, 0, 1, 1], [], []>} : vector<1x32xf32>, vector<32x384xf32>, vector<1x384xf32> -> vector<1x384xf32>
    %439 = vector.extract_strided_slice %436 {offsets = [0, 0], sizes = [1, 256], strides = [1, 1]} : vector<1x384xf32> to vector<1x256xf32>
    %440 = vector.extract_strided_slice %438 {offsets = [0, 0], sizes = [1, 256], strides = [1, 1]} : vector<1x384xf32> to vector<1x256xf32>
    %441 = arith.addf %439, %440 : vector<1x256xf32>
    %442 = arith.negf %441 : vector<1x256xf32>
    %443 = math.exp %442 : vector<1x256xf32>
    %cst_75 = arith.constant 1.000000e+00 : f32
    %444 = vector.broadcast %cst_75 : f32 to vector<1x256xf32>
    %445 = arith.addf %444, %443 : vector<1x256xf32>
    %446 = arith.divf %444, %445 : vector<1x256xf32>
    %447 = vector.extract_strided_slice %446 {offsets = [0, 0], sizes = [1, 128], strides = [1, 1]} : vector<1x256xf32> to vector<1x128xf32>
    %448 = vector.extract_strided_slice %446 {offsets = [0, 128], sizes = [1, 128], strides = [1, 1]} : vector<1x256xf32> to vector<1x128xf32>
    %449 = vector.extract_strided_slice %436 {offsets = [0, 256], sizes = [1, 128], strides = [1, 1]} : vector<1x384xf32> to vector<1x128xf32>
    %450 = vector.extract_strided_slice %438 {offsets = [0, 256], sizes = [1, 128], strides = [1, 1]} : vector<1x384xf32> to vector<1x128xf32>
    %451 = arith.addf %450, %14 : vector<1x128xf32>
    %452 = arith.mulf %447, %451 : vector<1x128xf32>
    %453 = arith.addf %449, %452 : vector<1x128xf32>
    %454 = math.tanh %453 : vector<1x128xf32>
    %cst_76 = arith.constant 1.000000e+00 : f32
    %455 = vector.broadcast %cst_76 : f32 to vector<1x128xf32>
    %456 = arith.subf %455, %448 : vector<1x128xf32>
    %457 = arith.mulf %456, %454 : vector<1x128xf32>
    %458 = arith.mulf %448, %434 : vector<1x128xf32>
    %459 = arith.addf %457, %458 : vector<1x128xf32>
    %460 = arith.addf %435, %459 : vector<1x128xf32>
    %461 = vector.extract_strided_slice %5 {offsets = [10, 0], sizes = [1, 384], strides = [1, 1]} : vector<16x384xf32> to vector<1x384xf32>
    %462 = vector.extract_strided_slice %459 {offsets = [0, 0], sizes = [1, 32], strides = [1, 1]} : vector<1x128xf32> to vector<1x32xf32>
    %cst_77 = arith.constant dense<0.000000e+00> : vector<1x384xf32>
    %463 = tpu.matmul %462, %12, %cst_77 {dimension_numbers = #tpu.dot_dimension_numbers<[1], [0], [0], [1], [0, 0, 1, 1], [], []>} : vector<1x32xf32>, vector<32x384xf32>, vector<1x384xf32> -> vector<1x384xf32>
    %464 = vector.extract_strided_slice %461 {offsets = [0, 0], sizes = [1, 256], strides = [1, 1]} : vector<1x384xf32> to vector<1x256xf32>
    %465 = vector.extract_strided_slice %463 {offsets = [0, 0], sizes = [1, 256], strides = [1, 1]} : vector<1x384xf32> to vector<1x256xf32>
    %466 = arith.addf %464, %465 : vector<1x256xf32>
    %467 = arith.negf %466 : vector<1x256xf32>
    %468 = math.exp %467 : vector<1x256xf32>
    %cst_78 = arith.constant 1.000000e+00 : f32
    %469 = vector.broadcast %cst_78 : f32 to vector<1x256xf32>
    %470 = arith.addf %469, %468 : vector<1x256xf32>
    %471 = arith.divf %469, %470 : vector<1x256xf32>
    %472 = vector.extract_strided_slice %471 {offsets = [0, 0], sizes = [1, 128], strides = [1, 1]} : vector<1x256xf32> to vector<1x128xf32>
    %473 = vector.extract_strided_slice %471 {offsets = [0, 128], sizes = [1, 128], strides = [1, 1]} : vector<1x256xf32> to vector<1x128xf32>
    %474 = vector.extract_strided_slice %461 {offsets = [0, 256], sizes = [1, 128], strides = [1, 1]} : vector<1x384xf32> to vector<1x128xf32>
    %475 = vector.extract_strided_slice %463 {offsets = [0, 256], sizes = [1, 128], strides = [1, 1]} : vector<1x384xf32> to vector<1x128xf32>
    %476 = arith.addf %475, %14 : vector<1x128xf32>
    %477 = arith.mulf %472, %476 : vector<1x128xf32>
    %478 = arith.addf %474, %477 : vector<1x128xf32>
    %479 = math.tanh %478 : vector<1x128xf32>
    %cst_79 = arith.constant 1.000000e+00 : f32
    %480 = vector.broadcast %cst_79 : f32 to vector<1x128xf32>
    %481 = arith.subf %480, %473 : vector<1x128xf32>
    %482 = arith.mulf %481, %479 : vector<1x128xf32>
    %483 = arith.mulf %473, %459 : vector<1x128xf32>
    %484 = arith.addf %482, %483 : vector<1x128xf32>
    %485 = arith.addf %460, %484 : vector<1x128xf32>
    %486 = vector.extract_strided_slice %5 {offsets = [11, 0], sizes = [1, 384], strides = [1, 1]} : vector<16x384xf32> to vector<1x384xf32>
    %487 = vector.extract_strided_slice %484 {offsets = [0, 0], sizes = [1, 32], strides = [1, 1]} : vector<1x128xf32> to vector<1x32xf32>
    %cst_80 = arith.constant dense<0.000000e+00> : vector<1x384xf32>
    %488 = tpu.matmul %487, %12, %cst_80 {dimension_numbers = #tpu.dot_dimension_numbers<[1], [0], [0], [1], [0, 0, 1, 1], [], []>} : vector<1x32xf32>, vector<32x384xf32>, vector<1x384xf32> -> vector<1x384xf32>
    %489 = vector.extract_strided_slice %486 {offsets = [0, 0], sizes = [1, 256], strides = [1, 1]} : vector<1x384xf32> to vector<1x256xf32>
    %490 = vector.extract_strided_slice %488 {offsets = [0, 0], sizes = [1, 256], strides = [1, 1]} : vector<1x384xf32> to vector<1x256xf32>
    %491 = arith.addf %489, %490 : vector<1x256xf32>
    %492 = arith.negf %491 : vector<1x256xf32>
    %493 = math.exp %492 : vector<1x256xf32>
    %cst_81 = arith.constant 1.000000e+00 : f32
    %494 = vector.broadcast %cst_81 : f32 to vector<1x256xf32>
    %495 = arith.addf %494, %493 : vector<1x256xf32>
    %496 = arith.divf %494, %495 : vector<1x256xf32>
    %497 = vector.extract_strided_slice %496 {offsets = [0, 0], sizes = [1, 128], strides = [1, 1]} : vector<1x256xf32> to vector<1x128xf32>
    %498 = vector.extract_strided_slice %496 {offsets = [0, 128], sizes = [1, 128], strides = [1, 1]} : vector<1x256xf32> to vector<1x128xf32>
    %499 = vector.extract_strided_slice %486 {offsets = [0, 256], sizes = [1, 128], strides = [1, 1]} : vector<1x384xf32> to vector<1x128xf32>
    %500 = vector.extract_strided_slice %488 {offsets = [0, 256], sizes = [1, 128], strides = [1, 1]} : vector<1x384xf32> to vector<1x128xf32>
    %501 = arith.addf %500, %14 : vector<1x128xf32>
    %502 = arith.mulf %497, %501 : vector<1x128xf32>
    %503 = arith.addf %499, %502 : vector<1x128xf32>
    %504 = math.tanh %503 : vector<1x128xf32>
    %cst_82 = arith.constant 1.000000e+00 : f32
    %505 = vector.broadcast %cst_82 : f32 to vector<1x128xf32>
    %506 = arith.subf %505, %498 : vector<1x128xf32>
    %507 = arith.mulf %506, %504 : vector<1x128xf32>
    %508 = arith.mulf %498, %484 : vector<1x128xf32>
    %509 = arith.addf %507, %508 : vector<1x128xf32>
    %510 = arith.addf %485, %509 : vector<1x128xf32>
    %511 = vector.extract_strided_slice %5 {offsets = [12, 0], sizes = [1, 384], strides = [1, 1]} : vector<16x384xf32> to vector<1x384xf32>
    %512 = vector.extract_strided_slice %509 {offsets = [0, 0], sizes = [1, 32], strides = [1, 1]} : vector<1x128xf32> to vector<1x32xf32>
    %cst_83 = arith.constant dense<0.000000e+00> : vector<1x384xf32>
    %513 = tpu.matmul %512, %12, %cst_83 {dimension_numbers = #tpu.dot_dimension_numbers<[1], [0], [0], [1], [0, 0, 1, 1], [], []>} : vector<1x32xf32>, vector<32x384xf32>, vector<1x384xf32> -> vector<1x384xf32>
    %514 = vector.extract_strided_slice %511 {offsets = [0, 0], sizes = [1, 256], strides = [1, 1]} : vector<1x384xf32> to vector<1x256xf32>
    %515 = vector.extract_strided_slice %513 {offsets = [0, 0], sizes = [1, 256], strides = [1, 1]} : vector<1x384xf32> to vector<1x256xf32>
    %516 = arith.addf %514, %515 : vector<1x256xf32>
    %517 = arith.negf %516 : vector<1x256xf32>
    %518 = math.exp %517 : vector<1x256xf32>
    %cst_84 = arith.constant 1.000000e+00 : f32
    %519 = vector.broadcast %cst_84 : f32 to vector<1x256xf32>
    %520 = arith.addf %519, %518 : vector<1x256xf32>
    %521 = arith.divf %519, %520 : vector<1x256xf32>
    %522 = vector.extract_strided_slice %521 {offsets = [0, 0], sizes = [1, 128], strides = [1, 1]} : vector<1x256xf32> to vector<1x128xf32>
    %523 = vector.extract_strided_slice %521 {offsets = [0, 128], sizes = [1, 128], strides = [1, 1]} : vector<1x256xf32> to vector<1x128xf32>
    %524 = vector.extract_strided_slice %511 {offsets = [0, 256], sizes = [1, 128], strides = [1, 1]} : vector<1x384xf32> to vector<1x128xf32>
    %525 = vector.extract_strided_slice %513 {offsets = [0, 256], sizes = [1, 128], strides = [1, 1]} : vector<1x384xf32> to vector<1x128xf32>
    %526 = arith.addf %525, %14 : vector<1x128xf32>
    %527 = arith.mulf %522, %526 : vector<1x128xf32>
    %528 = arith.addf %524, %527 : vector<1x128xf32>
    %529 = math.tanh %528 : vector<1x128xf32>
    %cst_85 = arith.constant 1.000000e+00 : f32
    %530 = vector.broadcast %cst_85 : f32 to vector<1x128xf32>
    %531 = arith.subf %530, %523 : vector<1x128xf32>
    %532 = arith.mulf %531, %529 : vector<1x128xf32>
    %533 = arith.mulf %523, %509 : vector<1x128xf32>
    %534 = arith.addf %532, %533 : vector<1x128xf32>
    %535 = arith.addf %510, %534 : vector<1x128xf32>
    %536 = vector.extract_strided_slice %5 {offsets = [13, 0], sizes = [1, 384], strides = [1, 1]} : vector<16x384xf32> to vector<1x384xf32>
    %537 = vector.extract_strided_slice %534 {offsets = [0, 0], sizes = [1, 32], strides = [1, 1]} : vector<1x128xf32> to vector<1x32xf32>
    %cst_86 = arith.constant dense<0.000000e+00> : vector<1x384xf32>
    %538 = tpu.matmul %537, %12, %cst_86 {dimension_numbers = #tpu.dot_dimension_numbers<[1], [0], [0], [1], [0, 0, 1, 1], [], []>} : vector<1x32xf32>, vector<32x384xf32>, vector<1x384xf32> -> vector<1x384xf32>
    %539 = vector.extract_strided_slice %536 {offsets = [0, 0], sizes = [1, 256], strides = [1, 1]} : vector<1x384xf32> to vector<1x256xf32>
    %540 = vector.extract_strided_slice %538 {offsets = [0, 0], sizes = [1, 256], strides = [1, 1]} : vector<1x384xf32> to vector<1x256xf32>
    %541 = arith.addf %539, %540 : vector<1x256xf32>
    %542 = arith.negf %541 : vector<1x256xf32>
    %543 = math.exp %542 : vector<1x256xf32>
    %cst_87 = arith.constant 1.000000e+00 : f32
    %544 = vector.broadcast %cst_87 : f32 to vector<1x256xf32>
    %545 = arith.addf %544, %543 : vector<1x256xf32>
    %546 = arith.divf %544, %545 : vector<1x256xf32>
    %547 = vector.extract_strided_slice %546 {offsets = [0, 0], sizes = [1, 128], strides = [1, 1]} : vector<1x256xf32> to vector<1x128xf32>
    %548 = vector.extract_strided_slice %546 {offsets = [0, 128], sizes = [1, 128], strides = [1, 1]} : vector<1x256xf32> to vector<1x128xf32>
    %549 = vector.extract_strided_slice %536 {offsets = [0, 256], sizes = [1, 128], strides = [1, 1]} : vector<1x384xf32> to vector<1x128xf32>
    %550 = vector.extract_strided_slice %538 {offsets = [0, 256], sizes = [1, 128], strides = [1, 1]} : vector<1x384xf32> to vector<1x128xf32>
    %551 = arith.addf %550, %14 : vector<1x128xf32>
    %552 = arith.mulf %547, %551 : vector<1x128xf32>
    %553 = arith.addf %549, %552 : vector<1x128xf32>
    %554 = math.tanh %553 : vector<1x128xf32>
    %cst_88 = arith.constant 1.000000e+00 : f32
    %555 = vector.broadcast %cst_88 : f32 to vector<1x128xf32>
    %556 = arith.subf %555, %548 : vector<1x128xf32>
    %557 = arith.mulf %556, %554 : vector<1x128xf32>
    %558 = arith.mulf %548, %534 : vector<1x128xf32>
    %559 = arith.addf %557, %558 : vector<1x128xf32>
    %560 = arith.addf %535, %559 : vector<1x128xf32>
    %561 = vector.extract_strided_slice %5 {offsets = [14, 0], sizes = [1, 384], strides = [1, 1]} : vector<16x384xf32> to vector<1x384xf32>
    %562 = vector.extract_strided_slice %559 {offsets = [0, 0], sizes = [1, 32], strides = [1, 1]} : vector<1x128xf32> to vector<1x32xf32>
    %cst_89 = arith.constant dense<0.000000e+00> : vector<1x384xf32>
    %563 = tpu.matmul %562, %12, %cst_89 {dimension_numbers = #tpu.dot_dimension_numbers<[1], [0], [0], [1], [0, 0, 1, 1], [], []>} : vector<1x32xf32>, vector<32x384xf32>, vector<1x384xf32> -> vector<1x384xf32>
    %564 = vector.extract_strided_slice %561 {offsets = [0, 0], sizes = [1, 256], strides = [1, 1]} : vector<1x384xf32> to vector<1x256xf32>
    %565 = vector.extract_strided_slice %563 {offsets = [0, 0], sizes = [1, 256], strides = [1, 1]} : vector<1x384xf32> to vector<1x256xf32>
    %566 = arith.addf %564, %565 : vector<1x256xf32>
    %567 = arith.negf %566 : vector<1x256xf32>
    %568 = math.exp %567 : vector<1x256xf32>
    %cst_90 = arith.constant 1.000000e+00 : f32
    %569 = vector.broadcast %cst_90 : f32 to vector<1x256xf32>
    %570 = arith.addf %569, %568 : vector<1x256xf32>
    %571 = arith.divf %569, %570 : vector<1x256xf32>
    %572 = vector.extract_strided_slice %571 {offsets = [0, 0], sizes = [1, 128], strides = [1, 1]} : vector<1x256xf32> to vector<1x128xf32>
    %573 = vector.extract_strided_slice %571 {offsets = [0, 128], sizes = [1, 128], strides = [1, 1]} : vector<1x256xf32> to vector<1x128xf32>
    %574 = vector.extract_strided_slice %561 {offsets = [0, 256], sizes = [1, 128], strides = [1, 1]} : vector<1x384xf32> to vector<1x128xf32>
    %575 = vector.extract_strided_slice %563 {offsets = [0, 256], sizes = [1, 128], strides = [1, 1]} : vector<1x384xf32> to vector<1x128xf32>
    %576 = arith.addf %575, %14 : vector<1x128xf32>
    %577 = arith.mulf %572, %576 : vector<1x128xf32>
    %578 = arith.addf %574, %577 : vector<1x128xf32>
    %579 = math.tanh %578 : vector<1x128xf32>
    %cst_91 = arith.constant 1.000000e+00 : f32
    %580 = vector.broadcast %cst_91 : f32 to vector<1x128xf32>
    %581 = arith.subf %580, %573 : vector<1x128xf32>
    %582 = arith.mulf %581, %579 : vector<1x128xf32>
    %583 = arith.mulf %573, %559 : vector<1x128xf32>
    %584 = arith.addf %582, %583 : vector<1x128xf32>
    %585 = arith.addf %560, %584 : vector<1x128xf32>
    %586 = vector.extract_strided_slice %5 {offsets = [15, 0], sizes = [1, 384], strides = [1, 1]} : vector<16x384xf32> to vector<1x384xf32>
    %587 = vector.extract_strided_slice %584 {offsets = [0, 0], sizes = [1, 32], strides = [1, 1]} : vector<1x128xf32> to vector<1x32xf32>
    %cst_92 = arith.constant dense<0.000000e+00> : vector<1x384xf32>
    %588 = tpu.matmul %587, %12, %cst_92 {dimension_numbers = #tpu.dot_dimension_numbers<[1], [0], [0], [1], [0, 0, 1, 1], [], []>} : vector<1x32xf32>, vector<32x384xf32>, vector<1x384xf32> -> vector<1x384xf32>
    %589 = vector.extract_strided_slice %586 {offsets = [0, 0], sizes = [1, 256], strides = [1, 1]} : vector<1x384xf32> to vector<1x256xf32>
    %590 = vector.extract_strided_slice %588 {offsets = [0, 0], sizes = [1, 256], strides = [1, 1]} : vector<1x384xf32> to vector<1x256xf32>
    %591 = arith.addf %589, %590 : vector<1x256xf32>
    %592 = arith.negf %591 : vector<1x256xf32>
    %593 = math.exp %592 : vector<1x256xf32>
    %cst_93 = arith.constant 1.000000e+00 : f32
    %594 = vector.broadcast %cst_93 : f32 to vector<1x256xf32>
    %595 = arith.addf %594, %593 : vector<1x256xf32>
    %596 = arith.divf %594, %595 : vector<1x256xf32>
    %597 = vector.extract_strided_slice %596 {offsets = [0, 0], sizes = [1, 128], strides = [1, 1]} : vector<1x256xf32> to vector<1x128xf32>
    %598 = vector.extract_strided_slice %596 {offsets = [0, 128], sizes = [1, 128], strides = [1, 1]} : vector<1x256xf32> to vector<1x128xf32>
    %599 = vector.extract_strided_slice %586 {offsets = [0, 256], sizes = [1, 128], strides = [1, 1]} : vector<1x384xf32> to vector<1x128xf32>
    %600 = vector.extract_strided_slice %588 {offsets = [0, 256], sizes = [1, 128], strides = [1, 1]} : vector<1x384xf32> to vector<1x128xf32>
    %601 = arith.addf %600, %14 : vector<1x128xf32>
    %602 = arith.mulf %597, %601 : vector<1x128xf32>
    %603 = arith.addf %599, %602 : vector<1x128xf32>
    %604 = math.tanh %603 : vector<1x128xf32>
    %cst_94 = arith.constant 1.000000e+00 : f32
    %605 = vector.broadcast %cst_94 : f32 to vector<1x128xf32>
    %606 = arith.subf %605, %598 : vector<1x128xf32>
    %607 = arith.mulf %606, %604 : vector<1x128xf32>
    %608 = arith.mulf %598, %584 : vector<1x128xf32>
    %609 = arith.addf %607, %608 : vector<1x128xf32>
    %610 = arith.addf %585, %609 : vector<1x128xf32>
    %611 = arith.mulf %610, %385 : vector<1x128xf32>
    %cst_95 = arith.constant dense<0.000000e+00> : vector<1xf32>
    %612 = vector.multi_reduction <add>, %611, %cst_95 [1] : vector<1x128xf32> to vector<1xf32>
    %613 = vector.shape_cast %612 : vector<1xf32> to vector<1x1xf32>
    %cst_96 = arith.constant 6.250000e-02 : f32
    %614 = vector.broadcast %cst_96 : f32 to vector<1x1xf32>
    %615 = arith.mulf %613, %614 : vector<1x1xf32>
    %c0_97 = arith.constant 0 : index
    %c0_98 = arith.constant 0 : index
    %616 = vector.load %arg10[%c0_97, %c0_98] : memref<1x1xf32, #tpu.memory_space<vmem>>, vector<1x1xf32>
    tpu.vector_store %arg10[%c0_97, %c0_98], %615 {strides = array<i32>} : memref<1x1xf32, #tpu.memory_space<vmem>>, vector<1x1xf32>,
    return
  }
}

</mosaic_0001>

<bundles_post_ra>
// kernel: tpu_custom_call.1
= control target key start
LH: loop header
LB: loop body
LE: loop exit
PB: predicated region body
PF: predicated region fallthrough
CT: control target
= control target key end

     0   :  { %15 = vsyncpa [#allocation3], 0  ;;  %s4915_s0 = inlined_call_operand.hbm [shape: f32[16,32], index: 0, kind: input, shape index: {}]   ;;  %s4916_s1 = inlined_call_operand.hbm [shape: f32[8,32], index: 1, kind: input, shape index: {}]   ;;  %s4917_s2 = inlined_call_operand.hbm [shape: f32[32,384], index: 2, kind: input, shape index: {}]   ;;  %s4918_s3 = inlined_call_operand.hbm [shape: f32[32,384], index: 3, kind: input, shape index: {}]   ;;  %s4919_s4 = inlined_call_operand.vmem [shape: f32[1,384], index: 4, kind: input, shape index: {}]   ;;  %s4920_s5 = inlined_call_operand.hbm [shape: f32[1,128], index: 5, kind: input, shape index: {}]   ;;  %s4921_s6 = inlined_call_operand.hbm [shape: f32[32,384], index: 6, kind: input, shape index: {}]   ;;  %s4922_s7 = inlined_call_operand.hbm [shape: f32[32,384], index: 7, kind: input, shape index: {}]   ;;  %s4923_s8 = inlined_call_operand.vmem [shape: f32[1,384], index: 8, kind: input, shape index: {}]   ;;  %s4924_s9 = inlined_call_operand.vmem [shape: f32[1,128], index: 9, kind: input, shape index: {}]   ;;  %s4925_s10 = inlined_call_operand.hbm [shape: f32[1,1], index: 10, kind: output, shape index: {}]  }
   0x1   :  { %16 = vsyncpa [#allocation6], 0 }
   0x2   :  { %17 = vsyncpa [#allocation9], 0 }
   0x3   :  { %18 = vsyncpa [#allocation12], 0  ;;  %s38_s15 = sshll.u32 %s4916_s1, 4  ;;  %s39_s15 = int_to_ptr.hbm [resolvable:$true] %s38_s15 }
   0x4   :  { %19 = vsyncpa [#allocation4], 0  ;;  %s3940_s16 = smov [#allocation5]   ;;  %s61_s20 = sshll.u32 %s4918_s3, 4  ;;  %s62_s20 = int_to_ptr.hbm [resolvable:$true] %s61_s20 }
   0x5   :  { %s40_s17 = sshll.u32 %s3940_s16, 4  ;;  %s3941_s21 = smov [#allocation8]   ;;  %s41_s17 = int_to_ptr.vmem [resolvable:$true] %s40_s17 }
   0x6   :  { %43 = dma.hbm_to_vmem [thread:$0]  %s39_s15, 128, %s41_s17, [#allocation6]  }
   0x7   :  { %s63_s22 = sshll.u32 %s3941_s21, 4  ;;  %s87_s25 = sshll.u32 %s4921_s6, 4  ;;  %s64_s22 = int_to_ptr.vmem [resolvable:$true] %s63_s22  ;;  %s88_s25 = int_to_ptr.hbm [resolvable:$true] %s87_s25 }
   0x8   :  { %s3942_s1 = smov 384   ;;  %s3943_s26 = smov 24  }
   0x9   :  { %69 = dma.hbm_to_vmem [thread:$0]  %s62_s20, 1536, %s64_s22, [#allocation9], %s3942_s1, %s3942_s1, %s3943_s26  }
   0xa   :  { %s24_s29 = sshll.u32 %s4915_s0, 4  ;;  %s3944_s3 = smov [#allocation11]   ;;  %s25_s29 = int_to_ptr.hbm [resolvable:$true] %s24_s29 }
   0xb   :  { %s89_s30 = sshll.u32 %s3944_s3, 4  ;;  %s3945_s6 = smov [#allocation2]   ;;  %s90_s30 = int_to_ptr.vmem [resolvable:$true] %s89_s30 }
   0xc   :  { %95 = dma.hbm_to_vmem [thread:$0]  %s88_s25, 1536, %s90_s30, [#allocation12], %s3942_s1, %s3942_s1, %s3943_s26  }
   0xd   :  { %s26_s11 = sshll.u32 %s3945_s6, 4  ;;  %s3946_s12 = smov 128   ;;  %s27_s11 = int_to_ptr.vmem [resolvable:$true] %s26_s11 }
   0xe   :  { %s3947_s13 = smov 8   ;;  %s48_s16 = sshll.u32 %s4917_s2, 4  ;;  %s49_s16 = int_to_ptr.hbm [resolvable:$true] %s48_s16 }
   0xf   :  { %32 = dma.hbm_to_vmem [thread:$0]  %s25_s29, 256, %s27_s11, [#allocation3], %s3946_s12, %s3946_s12, %s3947_s13  }
  0x10   :  { %s3948_s0 = smov [#allocation7]   ;;  %s77_s20 = sshll.u32 %s4920_s5, 4  ;;  %s78_s20 = int_to_ptr.hbm [resolvable:$true] %s77_s20 }
  0x11   :  { %s50_s17 = sshll.u32 %s3948_s0, 4  ;;  %s3949_s21 = smov [#allocation10]   ;;  %s51_s17 = int_to_ptr.vmem [resolvable:$true] %s50_s17 }
  0x12   :  { %56 = dma.hbm_to_vmem [thread:$0]  %s49_s16, 1536, %s51_s17, [#allocation6], %s3942_s1, %s3942_s1, %s3943_s26  }
  0x13   :  { %s79_s22 = sshll.u32 %s3949_s21, 4  ;;  %s100_s25 = sshll.u32 %s4922_s7, 4  ;;  %s80_s22 = int_to_ptr.vmem [resolvable:$true] %s79_s22  ;;  %s101_s25 = int_to_ptr.hbm [resolvable:$true] %s100_s25 }
  0x14   :  { %82 = dma.hbm_to_vmem [thread:$0]  %s78_s20, 16, %s80_s22, [#allocation9]  }
  0x15   :  { %s3950_s2 = smov [#allocation13]  }
  0x16   :  { %s102_s27 = sshll.u32 %s3950_s2, 4  ;;  %s103_s27 = int_to_ptr.vmem [resolvable:$true] %s102_s27 }
  0x17   :  { %108 = dma.hbm_to_vmem [thread:$0]  %s101_s25, 1536, %s103_s27, [#allocation12], %s3942_s1, %s3942_s1, %s3943_s26  }
  0x18   :  { %3930 = dma.done.wait [#allocation3], 256  }
  0x19   :  { %3931 = vsyncadd [#allocation3], 4294967040 }
  0x1a   :  { %3932 = dma.done.wait [#allocation6], 1664  }
  0x1b   :  { %3933 = vsyncadd [#allocation6], 4294965632 }
  0x1c   :  { %3934 = dma.done.wait [#allocation9], 1552  }
  0x1d   :  { %3935 = vsyncadd [#allocation9], 4294965744 }
  0x1e   :  { %3936 = dma.done.wait [#allocation12], 3072  }
  0x1f   :  { %3937 = vsyncadd [#allocation12], 4294964224  ;;  %v152_v0 = vld [vmem:[#allocation7 + $0x48] sm:$0xff]  ;;  %v153_v1 = vld [vmem:[#allocation7 + $0x50] sm:$0xff]  ;;  %vm163_vm0 = vcmask 261120   ;;  %v3951_v44 = vmov 0.0  }
  0x20   :  { %v154_v2 = vld [vmem:[#allocation7 + $0x58] sm:$0xff]  ;;  %182 = vmatpush.msra.mxu0 %v152_v0  ;;  %205 = vmatpush.msra.mxu1 %v153_v1  ;;  %v149_v3 = vld [vmem:[#allocation7 + $0x30] sm:$0xff]  ;;  %v151_v5 = vld [vmem:[#allocation7 + $0x40] sm:$0xff]  ;;  %s3310_s11 = sshll.u32 %s4925_s10, 4  ;;  %s3311_s11 = int_to_ptr.hbm [resolvable:$true] %s3310_s11 }
  0x21   :  { %v150_v4 = vld [vmem:[#allocation7 + $0x38] sm:$0xff]  ;;  %228 = vmatpush.msra.mxu2 %v154_v2  ;;  %v147_v7 = vld [vmem:[#allocation7 + $0x20] sm:$0xff]  ;;  %v148_v8 = vld [vmem:[#allocation7 + $0x28] sm:$0xff] }
  0x22   :  { %v146_v6 = vld [vmem:[#allocation7 + $0x18] sm:$0xff]  ;;  %183 = vmatpush.msra.mxu0 %v149_v3  ;;  %206 = vmatpush.msra.mxu1 %v150_v4  ;;  %v143_v9 = vld [vmem:[#allocation7] sm:$0xff]  ;;  %v144_v10 = vld [vmem:[#allocation7 + $0x8] sm:$0xff] }
  0x23   :  { %229 = vmatpush.msra.mxu2 %v151_v5  ;;  %v249_v11 = vld [vmem:[#allocation11 + $0x48] sm:$0xff]  ;;  %v251_v14 = vld [vmem:[#allocation11 + $0x58] sm:$0xff]  ;;  %v246_v15 = vld [vmem:[#allocation11 + $0x30] sm:$0xff] }
  0x24   :  { %184 = vmatpush.msra.mxu0 %v146_v6  ;;  %207 = vmatpush.msra.mxu1 %v147_v7  ;;  %v145_v12 = vld [vmem:[#allocation7 + $0x10] sm:$0xff]  ;;  %v141_v13 = vld [vmem:[#allocation2] sm:$0xff]  ;;  %v243_v18 = vld [vmem:[#allocation11 + $0x18] sm:$0xff] }
  0x25   :  { %230 = vmatpush.msra.mxu2 %v148_v8  ;;  %275 = vmatpush.msra.mxu3 %v249_v11  ;;  %v4042_v16 = vld [vmem:[#allocation13 + $0x48] sm:$0xff]  ;;  %v4044_v17 = vld [vmem:[#allocation13 + $0x50] sm:$0xff]  ;;  %v248_v19 = vld [vmem:[#allocation11 + $0x40] sm:$0xff] }
  0x26   :  { %185 = vmatpush.msra.mxu0 %v143_v9  ;;  %208 = vmatpush.msra.mxu1 %v144_v10  ;;  %v4048_v20 = vld [vmem:[#allocation13 + $0x30] sm:$0xff]  ;;  %v4050_v21 = vld [vmem:[#allocation13 + $0x38] sm:$0xff]  ;;  %v240_v22 = vld [vmem:[#allocation11] sm:$0xff] }
  0x27   :  { %231 = vmatpush.msra.mxu2 %v145_v12  ;;  %3323 = vmatmul.msk.f32.vlgmr.msra.gmra.mxu0 %vm163_vm0, %v141_v13  ;;  %v245_v23 = vld [vmem:[#allocation11 + $0x28] sm:$0xff]  ;;  %v239_v24 = vld [vmem:[#allocation5] sm:$0xff]  ;;  %v4061_v30 = vld [vmem:[#allocation13 + $0x20] sm:$0xff] }
  0x28   :  { %3325 = vmatmul.msk.f32.vlgmr.msra.gmra.mxu1 %vm163_vm0, %v141_v13  ;;  %3327 = vmatmul.msk.f32.vlgmr.msra.gmra.mxu2 %vm163_vm0, %v141_v13  ;;  %v4054_v25 = vld [vmem:[#allocation13 + $0x18] sm:$0xff]  ;;  %v250_v26 = vld [vmem:[#allocation11 + $0x50] sm:$0xff]  ;;  %v4063_v31 = vld [vmem:[#allocation13] sm:$0xff] }
  0x29   :  { %315 = vmatpush.msrb.mxu0 %v251_v14  ;;  %276 = vmatpush.msra.mxu3 %v246_v15  ;;  %v142_v27 = vld [vmem:[#allocation2 + $0x8] sm:$0xff]  ;;  %v247_v28 = vld [vmem:[#allocation11 + $0x38] sm:$0xff]  ;;  %v244_v32 = vld [vmem:[#allocation11 + $0x20] sm:$0xff] }
  0x2a   :  { %364 = vmatpush.msrb.mxu1 %v4042_v16  ;;  %384 = vmatpush.msrb.mxu2 %v4044_v17  ;;  %v242_v29 = vld [vmem:[#allocation11 + $0x10] sm:$0xff]  ;;  %v4067_v33 = vld [vmem:[#allocation8 + $0x48] sm:$0xff]  ;;  %v4082_v39 = vld [vmem:[#allocation13 + $0x58] sm:$0xff] }
  0x2b   :  { %277 = vmatpush.msra.mxu3 %v243_v18  ;;  %316 = vmatpush.msrb.mxu0 %v248_v19  ;;  %v4069_v34 = vld [vmem:[#allocation13 + $0x8] sm:$0xff]  ;;  %v4078_v38 = vld [vmem:[#allocation8 + $0x38] sm:$0xff]  ;;  %v4089_v41 = vld [vmem:[#allocation8 + $0x20] sm:$0xff] }
  0x2c   :  { %365 = vmatpush.msrb.mxu1 %v4048_v20  ;;  %385 = vmatpush.msrb.mxu2 %v4050_v21  ;;  %v4071_v35 = vld [vmem:[#allocation8 + $0x50] sm:$0xff]  ;;  %v4087_v40 = vld [vmem:[#allocation8 + $0x18] sm:$0xff]  ;;  %v4093_v42 = vld [vmem:[#allocation13 + $0x40] sm:$0xff] }
  0x2d   :  { %278 = vmatpush.msra.mxu3 %v240_v22  ;;  %317 = vmatpush.msrb.mxu0 %v245_v23  ;;  %v241_v36 = vld [vmem:[#allocation11 + $0x8] sm:$0xff]  ;;  %v4095_v43 = vld [vmem:[#allocation8 + $0x58] sm:$0xff]  ;;  %v4097_v45 = vld [vmem:[#allocation8] sm:$0xff] }
  0x2e   :  { %3329 = vmatmul.msk.f32.vlgmr.msra.gmra.mxu3 %vm163_vm0, %v239_v24  ;;  %366 = vmatpush.msrb.mxu1 %v4054_v25  ;;  %v4075_v37 = vld [vmem:[#allocation8 + $0x30] sm:$0xff]  ;;  %v4099_v46 = vld [vmem:[#allocation8 + $0x8] sm:$0xff]  ;;  %v4105_v48 = vld [vmem:[#allocation8 + $0x40] sm:$0xff] }
  0x2f   :  { %295 = vmatpush.msrb.mxu3 %v250_v26  ;;  %3324 = vmatmul.msk.f32.gmra.mxu0 %vm163_vm0, %v142_v27  ;;  %v4103_v47 = vld [vmem:[#allocation13 + $0x28] sm:$0xff]  ;;  %v4111_v49 = vld [vmem:[#allocation13 + $0x10] sm:$0xff] }
  0x30   :  { %3326 = vmatmul.msk.f32.gmra.mxu1 %vm163_vm0, %v142_v27  ;;  %3328 = vmatmul.msk.f32.gmra.mxu2 %vm163_vm0, %v142_v27  ;;  %v4113_v50 = vld [vmem:[#allocation8 + $0x28] sm:$0xff]  ;;  %v4117_v51 = vld [vmem:[#allocation8 + $0x10] sm:$0xff] }
  0x31   :  { %296 = vmatpush.msrb.mxu3 %v247_v28  ;;  %318 = vmatpush.msrb.mxu0 %v242_v29  ;;  %v4157_v54 = vld [vmem:[%s4919_s4] sm:$0x7] }
  0x32   :  { %386 = vmatpush.msrb.mxu2 %v4061_v30  ;;  %367 = vmatpush.msrb.mxu1 %v4063_v31  ;;  %v157_v55 = vperm.slane %v4157_v54, 0  ;;  %v252_v57 = vld [vmem:[%s4923_s8] sm:$0x7]  ;;  %v158_v58 = vperm.slane %v4157_v54, 1  ;;  %v4926_v1 = vperm.slane %v4157_v54, 2 }
  0x33   :  { %297 = vmatpush.msrb.mxu3 %v244_v32  ;;  %472 = vmatpush.msra.mxu0 %v4067_v33  ;;  %v254_v63 = vperm.slane %v252_v57, 0  ;;  %v255_v8 = vperm.slane %v252_v57, 1 }
  0x34   :  { %387 = vmatpush.msrb.mxu2 %v4069_v34  ;;  %492 = vmatpush.msra.mxu1 %v4071_v35 }
  0x35   :  { %298 = vmatpush.msrb.mxu3 %v241_v36  ;;  %473 = vmatpush.msra.mxu0 %v4075_v37 }
  0x36   :  { %3330 = vmatmul.msk.f32.vlgmr.msrb.gmra.mxu3 %vm163_vm0, %v239_v24  ;;  %493 = vmatpush.msra.mxu1 %v4078_v38 }
  0x37   :  { %3331 = vmatmul.msk.f32.vlgmr.msrb.gmra.mxu0 %vm163_vm0, %v239_v24  ;;  %404 = vmatpush.msra.mxu3 %v4082_v39 }
  0x38   :  { %368 = vmatmul.f32.vlgmr.msrb.gmra.mxu1 %v3951_v44  ;;  %388 = vmatmul.f32.vlgmr.msrb.gmra.mxu2 %v3951_v44 }
  0x39   :  { %474 = vmatpush.msra.mxu0 %v4087_v40  ;;  %494 = vmatpush.msra.mxu1 %v4089_v41 }
  0x3a   :  { %405 = vmatpush.msra.mxu3 %v4093_v42  ;;  %512 = vmatpush.msra.mxu2 %v4095_v43 }
  0x3b   :  { %475 = vmatpush.msra.mxu0 %v4097_v45  ;;  %495 = vmatpush.msra.mxu1 %v4099_v46 }
  0x3c   :  { %406 = vmatpush.msra.mxu3 %v4103_v47  ;;  %513 = vmatpush.msra.mxu2 %v4105_v48 }
  0x3d   :  { %604 = vmatpush.msrb.mxu0 %v4044_v17  ;;  %624 = vmatpush.msrb.mxu1 %v4082_v39 }
  0x3e   :  { %407 = vmatpush.msra.mxu3 %v4111_v49  ;;  %514 = vmatpush.msra.mxu2 %v4113_v50 }
  0x3f   :  { %476 = vmatmul.f32.vlgmr.msra.gmra.mxu0 %v3951_v44  ;;  %408 = vmatmul.f32.vlgmr.msra.gmra.mxu3 %v3951_v44 }
  0x40   :  { %496 = vmatmul.f32.vlgmr.msra.gmra.mxu1 %v3951_v44  ;;  %515 = vmatpush.msra.mxu2 %v4117_v51 }
  0x41   :  { %516 = vmatmul.f32.vlgmr.msra.gmra.mxu2 %v3951_v44  ;;  %584 = vmatpush.msrb.mxu3 %v4042_v16 }
  0x42   :  { %605 = vmatpush.msrb.mxu0 %v4050_v21  ;;  %625 = vmatpush.msrb.mxu1 %v4093_v42 }
  0x43   :  { %585 = vmatpush.msrb.mxu3 %v4048_v20  ;;  %706 = vmatpush.msrb.mxu2 %v4067_v33 }
  0x44   :  { %606 = vmatpush.msrb.mxu0 %v4061_v30  ;;  %626 = vmatpush.msrb.mxu1 %v4103_v47 }
  0x45   :  { %586 = vmatpush.msrb.mxu3 %v4054_v25  ;;  %707 = vmatpush.msrb.mxu2 %v4075_v37 }
  0x46   :  { %607 = vmatpush.msrb.mxu0 %v4069_v34  ;;  %627 = vmatpush.msrb.mxu1 %v4111_v49 }
  0x47   :  { %587 = vmatpush.msrb.mxu3 %v4063_v31  ;;  %708 = vmatpush.msrb.mxu2 %v4087_v40 }
  0x48   :  { %746 = vmatpush.msra.mxu0 %v4095_v43  ;;  %833 = vmatpush.msra.mxu1 %v4042_v16 }
  0x49   :  { %726 = vmatpush.msra.mxu3 %v4071_v35  ;;  %709 = vmatpush.msrb.mxu2 %v4097_v45 }
  0x4a   :  { %747 = vmatpush.msra.mxu0 %v4105_v48  ;;  %834 = vmatpush.msra.mxu1 %v4048_v20 }
  0x4b   :  { %727 = vmatpush.msra.mxu3 %v4078_v38  ;;  %853 = vmatpush.msra.mxu2 %v4044_v17 }
  0x4c   :  { %748 = vmatpush.msra.mxu0 %v4113_v50  ;;  %835 = vmatpush.msra.mxu1 %v4054_v25 }
  0x4d   :  { %728 = vmatpush.msra.mxu3 %v4089_v41  ;;  %854 = vmatpush.msra.mxu2 %v4050_v21 }
  0x4e   :  { %749 = vmatpush.msra.mxu0 %v4117_v51  ;;  %836 = vmatpush.msra.mxu1 %v4063_v31 }
  0x4f   :  { %729 = vmatpush.msra.mxu3 %v4099_v46  ;;  %855 = vmatpush.msra.mxu2 %v4061_v30 }
  0x51   :  { %856 = vmatpush.msra.mxu2 %v4069_v34 }
  0xa4   :  { %v187_v52 = vpop.f32.mrf.mxu0 }
  0xa5   :  { %v210_v53 = vpop.f32.mrf.mxu1  ;;  %v4180_v12 = vadd.f32 %v187_v52, %v157_v55 }
  0xa6   :  { %v4182_v14 = vadd.f32 %v210_v53, %v158_v58 }
  0xab   :  { %v4160_v56 = vpop.f32.mrf.mxu2 }
  0xac   :  { %v190_v59 = vpop.f32.mrf.mxu0 }
  0xad   :  { %v4166_v60 = vadd.f32 %v190_v59, %v157_v55  ;;  %v213_v61 = vpop.f32.mrf.mxu1 }
  0xae   :  { %v4168_v62 = vadd.f32 %v213_v61, %v158_v58  ;;  %v256_v61 = vperm.slane %v252_v57, 2 }
  0xb1   :  { %v280_v0 = vpop.f32.mrf.mxu3 }
  0xb2   :  { %v4171_v2 = vadd.f32 %v280_v0, %v254_v63  ;;  %v4193_v63 = vld [vmem:[%s4924_s9] sm:$0x1] }
  0xb3   :  { %v236_v3 = vpop.f32.mrf.mxu2 }
  0xb4   :  { %v4175_v4 = vadd.f32 %v236_v3, %v4926_v1  ;;  %v320_v5 = vpop.f32.mrf.mxu0 }
  0xb5   :  { %v369_v6 = vpop.f32.mrf.mxu1 }
  0xb6   :  { %4928 = vst [vmem:[#allocation20_spill] sm:$0xff] %v4175_v4  ;;  %v412_v7 = vadd.f32 %v369_v6, %v4171_v2 }
  0xb8   :  { %v3332_v9 = vmul.f32 -1.442695, %v412_v7 }
  0xb9   :  { %v300_v10 = vpop.f32.mrf.mxu3 }
  0xba   :  { %3459 = vpow2.f32 %v3332_v9  ;;  %v4178_v11 = vadd.f32 %v300_v10, %v255_v8 }
  0xbb   :  { %v389_v13 = vpop.f32.mrf.mxu2 }
  0xbc   :  { %v413_v15 = vadd.f32 %v389_v13, %v4178_v11  ;;  %v477_v18 = vpop.f32.mrf.mxu0  ;;  %v4195_v13 = vadd.f32 %v320_v5, %v256_v61 }
  0xbd   :  { %v520_v19 = vadd.f32 %v477_v18, %v4180_v12  ;;  %v497_v22 = vpop.f32.mrf.mxu1 }
  0xbe   :  { %v3333_v23 = vmul.f32 -1.442695, %v413_v15  ;;  %v521_v24 = vadd.f32 %v497_v22, %v4182_v14 }
  0xbf   :  { %v3334_v26 = vmul.f32 -1.442695, %v520_v19 }
  0xc0   :  { %v3460_v27 = vpop.eup %3459  ;;  %3461 = vpow2.f32 %v3333_v23  ;;  %v3335_v28 = vmul.f32 -1.442695, %v521_v24 }
  0xc1   :  { %v420_v29 = vadd.f32 1.0, %v3460_v27  ;;  %3463 = vpow2.f32 %v3334_v26 }
  0xc2   :  { %3465 = vpow2.f32 %v3335_v28  ;;  %v409_v0 = vpop.f32.mrf.mxu3 }
  0xc3   :  { %3467 = vrcp.f32 %v420_v29  ;;  %v431_v6 = vand.u32 2147483647, %v420_v29  ;;  %v433_v7 = vand.u32 2147483648, %v420_v29  ;;  %vm427_vm1 = vweird.f32 %v420_v29 }
  0xc4   :  { %v452_v57 = vadd.f32 %v409_v0, %v4193_v63 }
  0xc5   :  { %vm4198_vm3 = vcmp.eq.f32.partialorder %v431_v6, 8.507059e+37  ;;  %v434_v22 = vor.u32 1.1754944e-38, %v433_v7 }
  0xc6   :  { %v3462_v32 = vpop.eup %3461 }
  0xc7   :  { %v3464_v36 = vpop.eup %3463  ;;  %v421_v44 = vadd.f32 1.0, %v3462_v32 }
  0xc8   :  { %v3466_v52 = vpop.eup %3465  ;;  %v528_v53 = vadd.f32 1.0, %v3464_v36  ;;  %v4204_v36 = vld [vmem:[#allocation10] sm:$0x1] }
  0xc9   :  { %v3468_v55 = vpop.eup %3467  ;;  %3469 = vrcp.f32 %v421_v44  ;;  %v4187_v58 = vadd.f32 1.0, %v3466_v52  ;;  %vm442_vm4 = vweird.f32 %v421_v44  ;;  %v448_v27 = vand.u32 2147483648, %v421_v44  ;;  %v517_v52 = vpop.f32.mrf.mxu2 }
  0xca   :  { %3471 = vrcp.f32 %v528_v53  ;;  %v423_v59 = vmul.f32 %v3468_v55, %v420_v29  ;;  %vm428_vm2 = vweird.f32 %v3468_v55  ;;  %v446_v28 = vand.u32 2147483647, %v421_v44 }
  0xcb   :  { %3473 = vrcp.f32 %v4187_v58  ;;  %vm429_vm6 = vmor %vm427_vm1, %vm428_vm2  ;;  %v541_v6 = vand.u32 2147483648, %v528_v53  ;;  %vm535_vm9 = vweird.f32 %v528_v53  ;;  %vm550_vm14 = vweird.f32 %v4187_v58 }
  0xcc   :  { %v424_v3 = vsub.f32 1.0, %v423_v59  ;;  %vm447_vm10 = vcmp.eq.f32.partialorder %v446_v28, 8.507059e+37 }
  0xce   :  { %v425_v9 = vmul.f32 %v3468_v55, %v424_v3  ;;  %v539_v3 = vand.u32 2147483647, %v528_v53 }
  0xcf   :  { %v3470_v8 = vpop.eup %3469 }
  0xd0   :  { %v3472_v10 = vpop.eup %3471  ;;  %v438_v15 = vmul.f32 %v3470_v8, %v421_v44  ;;  %v426_v18 = vadd.f32 %v3468_v55, %v425_v9  ;;  %vm443_vm5 = vweird.f32 %v3470_v8  ;;  %vm540_vm12 = vcmp.eq.f32.partialorder %v539_v3, 8.507059e+37 }
  0xd1   :  { %v531_v23 = vmul.f32 %v3472_v10, %v528_v53  ;;  %v3474_v24 = vpop.eup %3473  ;;  %vm4208_vm7 = vmor %vm442_vm4, %vm443_vm5  ;;  %vm536_vm8 = vweird.f32 %v3472_v10 }
  0xd2   :  { %v439_v26 = vsub.f32 1.0, %v438_v15  ;;  %v546_v5 = vmul.f32 %v3474_v24, %v4187_v58  ;;  %v430_v32 = vsel %vm429_vm6, %v3468_v55, %v426_v18  ;;  %v449_v55 = vor.u32 1.1754944e-38, %v448_v27  ;;  %vm537_vm11 = vmor %vm535_vm9, %vm536_vm8 }
  0xd3   :  { %v532_v59 = vsub.f32 1.0, %v531_v23  ;;  %v435_v0 = vsel %vm4198_vm3, %v434_v22, %v430_v32  ;;  %v560_v18 = vadd.f32 %v517_v52, %v4204_v36  ;;  %v542_v22 = vor.u32 1.1754944e-38, %v541_v6 }
  0xd4   :  { %v440_v61 = vmul.f32 %v3470_v8, %v439_v26  ;;  %v547_v29 = vsub.f32 1.0, %v546_v5  ;;  %v453_v9 = vmul.f32 %v452_v57, %v435_v0  ;;  %vm551_vm13 = vweird.f32 %v3474_v24 }
  0xd5   :  { %v533_v44 = vmul.f32 %v3472_v10, %v532_v59  ;;  %v4933_v27 = vperm.slane %v4157_v54, 2  ;;  %v556_v59 = vand.u32 2147483648, %v4187_v58  ;;  %vm552_vm15 = vmor %vm550_vm14, %vm551_vm13 }
  0xd6   :  { %v441_v15 = vadd.f32 %v3470_v8, %v440_v61  ;;  %v548_v1 = vmul.f32 %v3474_v24, %v547_v29  ;;  %v454_v23 = vadd.f32 %v453_v9, %v4195_v13 }
  0xd7   :  { %v534_v26 = vadd.f32 %v3472_v10, %v533_v44  ;;  %v4219_v52 = vadd.f32 %v4160_v56, %v4933_v27  ;;  %v557_v3 = vor.u32 1.1754944e-38, %v556_v59 }
  0xd8   :  { %v445_v19 = vsel %vm4208_vm7, %v3470_v8, %v441_v15  ;;  %3475 = vtanh.f32 %v454_v23  ;;  %v549_v57 = vadd.f32 %v3474_v24, %v548_v1  ;;  %v554_v8 = vand.u32 2147483647, %v4187_v58 }
  0xd9   :  { %v538_v5 = vsel %vm537_vm11, %v3472_v10, %v534_v26  ;;  %v450_v53 = vsel %vm447_vm10, %v449_v55, %v445_v19 }
  0xda   :  { %v543_v32 = vsel %vm540_vm12, %v542_v22, %v538_v5  ;;  %v456_v61 = vsub.f32 1.0, %v450_v53  ;;  %v553_v1 = vsel %vm552_vm15, %v3474_v24, %v549_v57  ;;  %vm555_vm1 = vcmp.eq.f32.partialorder %v554_v8, 8.507059e+37 }
  0xdb   :  { %v561_v28 = vmul.f32 %v560_v18, %v543_v32  ;;  %v458_v56 = vmul.f32 0.0, %v450_v53  ;;  %v558_v6 = vsel %vm555_vm1, %v557_v3, %v553_v1 }
  0xdc   :  { %v564_v29 = vsub.f32 1.0, %v558_v6  ;;  %v566_v9 = vmul.f32 0.0, %v558_v6 }
  0xdd   :  { %v562_v10 = vadd.f32 %v561_v28, %v4219_v52 }
  0xde   :  { %v3476_v0 = vpop.eup %3475 }
  0xdf   :  { %3477 = vtanh.f32 %v562_v10  ;;  %v457_v54 = vmul.f32 %v3476_v0, %v456_v61 }
  0xe1   :  { %v4225_v7 = vadd.f32 %v458_v56, %v457_v54 }
  0xe3   :  { %3336 = vmatmul.msk.f32.vlgmr.msrb.gmra.mxu3 %vm163_vm0, %v4225_v7  ;;  %3337 = vmatmul.msk.f32.vlgmr.msrb.gmra.mxu0 %vm163_vm0, %v4225_v7 }
  0xe4   :  { %3338 = vmatmul.msk.f32.vlgmr.msrb.gmra.mxu1 %vm163_vm0, %v4225_v7  ;;  %873 = vmatpush.msrb.mxu3 %v4082_v39 }
  0xe5   :  { %v3478_v58 = vpop.eup %3477  ;;  %954 = vmatpush.msrb.mxu0 %v4067_v33  ;;  %974 = vmatpush.msrb.mxu1 %v4071_v35 }
  0xe6   :  { %v565_v24 = vmul.f32 %v3478_v58, %v564_v29  ;;  %874 = vmatpush.msrb.mxu3 %v4093_v42 }
  0xe7   :  { %955 = vmatpush.msrb.mxu0 %v4075_v37  ;;  %975 = vmatpush.msrb.mxu1 %v4078_v38 }
  0xe8   :  { %v4237_v44 = vadd.f32 %v566_v9, %v565_v24  ;;  %875 = vmatpush.msrb.mxu3 %v4103_v47 }
  0xe9   :  { %956 = vmatpush.msrb.mxu0 %v4087_v40  ;;  %976 = vmatpush.msrb.mxu1 %v4089_v41 }
  0xea   :  { %3341 = vmatmul.msk.f32.vlgmr.msrb.gmra.mxu2 %vm163_vm0, %v4237_v44  ;;  %876 = vmatpush.msrb.mxu3 %v4111_v49 }
  0xeb   :  { %994 = vmatpush.msrb.mxu2 %v4095_v43  ;;  %3342 = vmatmul.msk.f32.vlgmr.msra.gmra.mxu3 %vm163_vm0, %v4237_v44 }
  0xec   :  { %3343 = vmatmul.msk.f32.vlgmr.msra.gmra.mxu0 %vm163_vm0, %v4237_v44  ;;  %1081 = vmatpush.msra.mxu3 %v4042_v16 }
  0xed   :  { %995 = vmatpush.msrb.mxu2 %v4105_v48  ;;  %957 = vmatpush.msrb.mxu0 %v4097_v45 }
  0xee   :  { %977 = vmatpush.msrb.mxu1 %v4099_v46  ;;  %1082 = vmatpush.msra.mxu3 %v4048_v20 }
  0xef   :  { %996 = vmatpush.msrb.mxu2 %v4113_v50  ;;  %1101 = vmatpush.msra.mxu0 %v4044_v17 }
  0xf0   :  { %1083 = vmatpush.msra.mxu3 %v4054_v25 }
  0xf1   :  { %997 = vmatpush.msrb.mxu2 %v4117_v51  ;;  %1102 = vmatpush.msra.mxu0 %v4050_v21 }
  0xf2   :  { %1084 = vmatpush.msra.mxu3 %v4063_v31 }
  0xf3   :  { %1103 = vmatpush.msra.mxu0 %v4061_v30 }
  0xf5   :  { %1104 = vmatpush.msra.mxu0 %v4069_v34 }
 0x160   :  { %v609_v15 = vpop.f32.mrf.mxu0 }
 0x161   :  { %v635_v55 = vrot.slane %v609_v15, 7  ;;  %v629_v9 = vpop.f32.mrf.mxu1 }
 0x163   :  { %v639_v18 = vadd.f32 %v635_v55, %v4178_v11 }
 0x165   :  { %v3340_v23 = vmul.f32 -1.442695, %v639_v18 }
 0x166   :  { %v589_v26 = vpop.f32.mrf.mxu3 }
 0x167   :  { %3479 = vpow2.f32 %v3340_v23  ;;  %v634_v19 = vrot.slane %v589_v26, 7  ;;  %v678_v26 = vadd.f32 %v629_v9, %v4193_v63 }
 0x169   :  { %v638_v22 = vadd.f32 %v634_v19, %v4171_v2 }
 0x16b   :  { %v3339_v5 = vmul.f32 -1.442695, %v638_v22 }
 0x16d   :  { %v711_v57 = vpop.f32.mrf.mxu2  ;;  %v3480_v32 = vpop.eup %3479  ;;  %3481 = vpow2.f32 %v3339_v5 }
 0x16e   :  { %v756_v27 = vrot.slane %v711_v57, 7  ;;  %v4267_v59 = vadd.f32 1.0, %v3480_v32  ;;  %v731_v53 = vpop.f32.mrf.mxu3  ;;  %v751_v57 = vpop.f32.mrf.mxu0 }
 0x16f   :  { %v757_v8 = vrot.slane %v731_v53, 7 }
 0x170   :  { %v760_v28 = vadd.f32 %v756_v27, %v4180_v12  ;;  %3483 = vrcp.f32 %v4267_v59  ;;  %vm668_vm8 = vweird.f32 %v4267_v59 }
 0x171   :  { %v761_v61 = vadd.f32 %v757_v8, %v4182_v14  ;;  %v674_v8 = vand.u32 2147483648, %v4267_v59 }
 0x172   :  { %v3344_v10 = vmul.f32 -1.442695, %v760_v28 }
 0x173   :  { %v3482_v1 = vpop.eup %3481  ;;  %v3345_v0 = vmul.f32 -1.442695, %v761_v61 }
 0x174   :  { %3485 = vpow2.f32 %v3344_v10  ;;  %v646_v3 = vadd.f32 1.0, %v3482_v1  ;;  %v680_v10 = vrot.slane %v678_v26, 7  ;;  %v800_v1 = vadd.f32 %v751_v57, %v4204_v36 }
 0x175   :  { %3487 = vpow2.f32 %v3345_v0 }
 0x176   :  { %3489 = vrcp.f32 %v646_v3  ;;  %v4272_v54 = vpop.eup %3483  ;;  %v659_v19 = vand.u32 2147483648, %v646_v3  ;;  %v657_v5 = vand.u32 2147483647, %v646_v3  ;;  %vm653_vm3 = vweird.f32 %v646_v3 }
 0x177   :  { %v664_v6 = vmul.f32 %v4272_v54, %v4267_v59  ;;  %vm669_vm5 = vweird.f32 %v4272_v54 }
 0x178   :  { %v660_v61 = vor.u32 1.1754944e-38, %v659_v19  ;;  %vm658_vm6 = vcmp.eq.f32.partialorder %v657_v5, 8.507059e+37  ;;  %v672_v19 = vand.u32 2147483647, %v4267_v59  ;;  %vm4290_vm9 = vmor %vm668_vm8, %vm669_vm5  ;;  %v675_v59 = vor.u32 1.1754944e-38, %v674_v8 }
 0x179   :  { %v665_v18 = vsub.f32 1.0, %v664_v6 }
 0x17a   :  { %v3486_v56 = vpop.eup %3485  ;;  %vm673_vm13 = vcmp.eq.f32.partialorder %v672_v19, 8.507059e+37 }
 0x17b   :  { %v768_v29 = vadd.f32 1.0, %v3486_v56  ;;  %v3488_v58 = vpop.eup %3487  ;;  %v666_v27 = vmul.f32 %v4272_v54, %v665_v18 }
 0x17c   :  { %v3490_v24 = vpop.eup %3489  ;;  %v4276_v55 = vadd.f32 1.0, %v3488_v58 }
 0x17d   :  { %3491 = vrcp.f32 %v768_v29  ;;  %v649_v15 = vmul.f32 %v3490_v24, %v646_v3  ;;  %vm654_vm2 = vweird.f32 %v3490_v24  ;;  %v667_v58 = vadd.f32 %v4272_v54, %v666_v27 }
 0x17e   :  { %3493 = vrcp.f32 %v4276_v55  ;;  %vm655_vm4 = vmor %vm653_vm3, %vm654_vm2  ;;  %v779_v26 = vand.u32 2147483647, %v768_v29  ;;  %vm775_vm10 = vweird.f32 %v768_v29  ;;  %v802_v27 = vrot.slane %v800_v1, 7 }
 0x17f   :  { %v650_v23 = vsub.f32 1.0, %v649_v15  ;;  %v781_v15 = vand.u32 2147483648, %v768_v29  ;;  %vm790_vm15 = vweird.f32 %v4276_v55  ;;  %v794_v1 = vand.u32 2147483647, %v4276_v55 }
 0x180   :  { %vm780_vm12 = vcmp.eq.f32.partialorder %v779_v26, 8.507059e+37 }
 0x181   :  { %v651_v22 = vmul.f32 %v3490_v24, %v650_v23  ;;  %vm795_vm2 = vcmp.eq.f32.partialorder %v794_v1, 8.507059e+37 }
 0x183   :  { %v3492_v32 = vpop.eup %3491  ;;  %v652_v53 = vadd.f32 %v3490_v24, %v651_v22 }
 0x184   :  { %v771_v28 = vmul.f32 %v3492_v32, %v768_v29  ;;  %v3494_v0 = vpop.eup %3493  ;;  %vm776_vm7 = vweird.f32 %v3492_v32  ;;  %v796_v29 = vand.u32 2147483648, %v4276_v55 }
 0x185   :  { %v656_v56 = vsel %vm655_vm4, %v3490_v24, %v652_v53  ;;  %v786_v3 = vmul.f32 %v3494_v0, %v4276_v55  ;;  %vm777_vm11 = vmor %vm775_vm10, %vm776_vm7  ;;  %v782_v53 = vor.u32 1.1754944e-38, %v781_v15  ;;  %vm791_vm14 = vweird.f32 %v3494_v0 }
 0x186   :  { %v772_v6 = vsub.f32 1.0, %v771_v28  ;;  %v661_v9 = vsel %vm658_vm6, %v660_v61, %v656_v56  ;;  %vm792_vm1 = vmor %vm790_vm15, %vm791_vm14  ;;  %v809_v55 = vrot.slane %v4237_v44, 7 }
 0x187   :  { %v682_v18 = vmul.f32 %v680_v10, %v661_v9  ;;  %v787_v22 = vsub.f32 1.0, %v786_v3  ;;  %v671_v10 = vsel %vm4290_vm9, %v4272_v54, %v667_v58 }
 0x188   :  { %v773_v23 = vmul.f32 %v3492_v32, %v772_v6  ;;  %v676_v3 = vsel %vm673_vm13, %v675_v59, %v671_v10 }
 0x189   :  { %v683_v57 = vadd.f32 %v682_v18, %v4195_v13  ;;  %v788_v28 = vmul.f32 %v3494_v0, %v787_v22  ;;  %v685_v54 = vsub.f32 1.0, %v676_v3  ;;  %v797_v18 = vor.u32 1.1754944e-38, %v796_v29 }
 0x18a   :  { %v774_v5 = vadd.f32 %v3492_v32, %v773_v23 }
 0x18b   :  { %3495 = vtanh.f32 %v683_v57  ;;  %v789_v6 = vadd.f32 %v3494_v0, %v788_v28 }
 0x18c   :  { %v778_v61 = vsel %vm777_vm11, %v3492_v32, %v774_v5  ;;  %v687_v32 = vrot.slane %v4225_v7, 7 }
 0x18d   :  { %v783_v56 = vsel %vm780_vm12, %v782_v53, %v778_v61  ;;  %v793_v8 = vsel %vm792_vm1, %v3494_v0, %v789_v6 }
 0x18e   :  { %v804_v9 = vmul.f32 %v802_v27, %v783_v56  ;;  %v689_v26 = vmul.f32 %v687_v32, %v676_v3  ;;  %v798_v19 = vsel %vm795_vm2, %v797_v18, %v793_v8 }
 0x18f   :  { %v807_v5 = vsub.f32 1.0, %v798_v19  ;;  %v811_v0 = vmul.f32 %v809_v55, %v798_v19 }
 0x190   :  { %v805_v15 = vadd.f32 %v804_v9, %v4219_v52 }
 0x191   :  { %v3496_v58 = vpop.eup %3495 }
 0x192   :  { %3497 = vtanh.f32 %v805_v15  ;;  %v686_v23 = vmul.f32 %v3496_v58, %v685_v54 }
 0x194   :  { %v4303_v22 = vadd.f32 %v689_v26, %v686_v23 }
 0x196   :  { %v818_v24 = vrot.slane %v4303_v22, 1 }
 0x198   :  { %v3498_v57 = vpop.eup %3497  ;;  %3346 = vmatmul.msk.f32.vlgmr.msra.gmra.mxu1 %vm163_vm0, %v818_v24  ;;  %3347 = vmatmul.msk.f32.vlgmr.msra.gmra.mxu2 %vm163_vm0, %v818_v24 }
 0x199   :  { %v808_v7 = vmul.f32 %v3498_v57, %v807_v5  ;;  %3348 = vmatmul.msk.f32.vlgmr.msrb.gmra.mxu3 %vm163_vm0, %v818_v24  ;;  %1121 = vmatpush.msra.mxu1 %v4082_v39 }
 0x19a   :  { %1202 = vmatpush.msra.mxu2 %v4067_v33  ;;  %1222 = vmatpush.msrb.mxu3 %v4071_v35 }
 0x19b   :  { %v4311_v27 = vadd.f32 %v811_v0, %v808_v7  ;;  %1122 = vmatpush.msra.mxu1 %v4093_v42 }
 0x19c   :  { %1203 = vmatpush.msra.mxu2 %v4075_v37  ;;  %1223 = vmatpush.msrb.mxu3 %v4078_v38 }
 0x19d   :  { %v4317_v53 = vrot.slane %v4311_v27, 1  ;;  %1123 = vmatpush.msra.mxu1 %v4103_v47 }
 0x19e   :  { %1204 = vmatpush.msra.mxu2 %v4087_v40  ;;  %1224 = vmatpush.msrb.mxu3 %v4089_v41 }
 0x19f   :  { %3351 = vmatmul.msk.f32.vlgmr.msrb.gmra.mxu0 %vm163_vm0, %v4317_v53  ;;  %1124 = vmatpush.msra.mxu1 %v4111_v49 }
 0x1a0   :  { %1242 = vmatpush.msrb.mxu0 %v4095_v43  ;;  %3352 = vmatmul.msk.f32.vlgmr.msrb.gmra.mxu1 %vm163_vm0, %v4317_v53 }
 0x1a1   :  { %3353 = vmatmul.msk.f32.vlgmr.msrb.gmra.mxu2 %vm163_vm0, %v4317_v53  ;;  %1329 = vmatpush.msrb.mxu1 %v4042_v16 }
 0x1a2   :  { %1243 = vmatpush.msrb.mxu0 %v4105_v48  ;;  %1205 = vmatpush.msra.mxu2 %v4097_v45 }
 0x1a3   :  { %1225 = vmatpush.msrb.mxu3 %v4099_v46  ;;  %1330 = vmatpush.msrb.mxu1 %v4048_v20 }
 0x1a4   :  { %1244 = vmatpush.msrb.mxu0 %v4113_v50  ;;  %1349 = vmatpush.msrb.mxu2 %v4044_v17 }
 0x1a5   :  { %1331 = vmatpush.msrb.mxu1 %v4054_v25 }
 0x1a6   :  { %1245 = vmatpush.msrb.mxu0 %v4117_v51  ;;  %1350 = vmatpush.msrb.mxu2 %v4050_v21 }
 0x1a7   :  { %1332 = vmatpush.msrb.mxu1 %v4063_v31 }
 0x1a8   :  { %1351 = vmatpush.msrb.mxu2 %v4061_v30 }
 0x1aa   :  { %1352 = vmatpush.msrb.mxu2 %v4069_v34 }
 0x215   :  { %v838_v16 = vpop.f32.mrf.mxu1 }
 0x216   :  { %v883_v28 = vrot.slane %v838_v16, 6 }
 0x218   :  { %v887_v10 = vadd.f32 %v883_v28, %v4171_v2 }
 0x21a   :  { %v3349_v59 = vmul.f32 -1.442695, %v887_v10 }
 0x21b   :  { %v858_v17 = vpop.f32.mrf.mxu2 }
 0x21c   :  { %v959_v61 = vpop.f32.mrf.mxu0  ;;  %3499 = vpow2.f32 %v3349_v59  ;;  %v884_v20 = vrot.slane %v858_v17, 6  ;;  %v878_v23 = vpop.f32.mrf.mxu3 }
 0x21d   :  { %v1004_v56 = vrot.slane %v959_v61, 6  ;;  %v979_v6 = vpop.f32.mrf.mxu1  ;;  %v927_v55 = vadd.f32 %v878_v23, %v4193_v63 }
 0x21e   :  { %v888_v21 = vadd.f32 %v884_v20, %v4178_v11  ;;  %v1005_v30 = vrot.slane %v979_v6, 6 }
 0x21f   :  { %v1008_v25 = vadd.f32 %v1004_v56, %v4180_v12  ;;  %v929_v61 = vrot.slane %v927_v55, 6 }
 0x220   :  { %v3350_v9 = vmul.f32 -1.442695, %v888_v21  ;;  %v1009_v34 = vadd.f32 %v1005_v30, %v4182_v14 }
 0x221   :  { %v3354_v31 = vmul.f32 -1.442695, %v1008_v25 }
 0x222   :  { %v3500_v29 = vpop.eup %3499  ;;  %3501 = vpow2.f32 %v3350_v9  ;;  %v3355_v3 = vmul.f32 -1.442695, %v1009_v34 }
 0x223   :  { %v895_v1 = vadd.f32 1.0, %v3500_v29  ;;  %3503 = vpow2.f32 %v3354_v31 }
 0x224   :  { %3505 = vpow2.f32 %v3355_v3  ;;  %v999_v0 = vpop.f32.mrf.mxu2 }
 0x225   :  { %3507 = vrcp.f32 %v895_v1  ;;  %v908_v5 = vand.u32 2147483648, %v895_v1  ;;  %v906_v7 = vand.u32 2147483647, %v895_v1  ;;  %vm902_vm4 = vweird.f32 %v895_v1 }
 0x226   :  { %v1048_v56 = vadd.f32 %v999_v0, %v4204_v36 }
 0x227   :  { %v909_v17 = vor.u32 1.1754944e-38, %v908_v5  ;;  %vm907_vm6 = vcmp.eq.f32.partialorder %v906_v7, 8.507059e+37 }
 0x228   :  { %v3502_v15 = vpop.eup %3501 }
 0x229   :  { %v3504_v54 = vpop.eup %3503  ;;  %v896_v32 = vadd.f32 1.0, %v3502_v15 }
 0x22a   :  { %v3506_v8 = vpop.eup %3505  ;;  %v1016_v58 = vadd.f32 1.0, %v3504_v54 }
 0x22b   :  { %v3508_v18 = vpop.eup %3507  ;;  %3509 = vrcp.f32 %v896_v32  ;;  %v4349_v19 = vadd.f32 1.0, %v3506_v8  ;;  %v921_v25 = vand.u32 2147483647, %v896_v32  ;;  %v923_v9 = vand.u32 2147483648, %v896_v32 }
 0x22c   :  { %v898_v26 = vmul.f32 %v3508_v18, %v895_v1  ;;  %3511 = vrcp.f32 %v1016_v58  ;;  %vm903_vm3 = vweird.f32 %v3508_v18  ;;  %v1029_v1 = vand.u32 2147483648, %v1016_v58 }
 0x22d   :  { %3513 = vrcp.f32 %v4349_v19  ;;  %vm904_vm5 = vmor %vm902_vm4, %vm903_vm3  ;;  %v1027_v23 = vand.u32 2147483647, %v1016_v58  ;;  %vm917_vm9 = vweird.f32 %v896_v32  ;;  %vm1023_vm11 = vweird.f32 %v1016_v58 }
 0x22e   :  { %v899_v24 = vsub.f32 1.0, %v898_v26  ;;  %v924_v55 = vor.u32 1.1754944e-38, %v923_v9  ;;  %v1030_v7 = vor.u32 1.1754944e-38, %v1029_v1  ;;  %vm922_vm13 = vcmp.eq.f32.partialorder %v921_v25, 8.507059e+37 }
 0x22f   :  { %vm1028_vm14 = vcmp.eq.f32.partialorder %v1027_v23, 8.507059e+37  ;;  %vm1038_vm1 = vweird.f32 %v4349_v19 }
 0x230   :  { %v900_v57 = vmul.f32 %v3508_v18, %v899_v24 }
 0x231   :  { %v3510_v16 = vpop.eup %3509 }
 0x232   :  { %v3512_v28 = vpop.eup %3511  ;;  %v913_v10 = vmul.f32 %v3510_v16, %v896_v32  ;;  %v901_v59 = vadd.f32 %v3508_v18, %v900_v57  ;;  %vm918_vm7 = vweird.f32 %v3510_v16 }
 0x233   :  { %v1019_v20 = vmul.f32 %v3512_v28, %v1016_v58  ;;  %v3514_v6 = vpop.eup %3513  ;;  %vm1024_vm8 = vweird.f32 %v3512_v28  ;;  %vm919_vm10 = vmor %vm917_vm9, %vm918_vm7  ;;  %v1042_v58 = vand.u32 2147483647, %v4349_v19 }
 0x234   :  { %v914_v21 = vsub.f32 1.0, %v913_v10  ;;  %v905_v30 = vsel %vm904_vm5, %v3508_v18, %v901_v59  ;;  %v1034_v34 = vmul.f32 %v3514_v6, %v4349_v19  ;;  %vm1025_vm12 = vmor %vm1023_vm11, %vm1024_vm8  ;;  %v1050_v10 = vrot.slane %v1048_v56, 6 }
 0x235   :  { %v910_v31 = vsel %vm907_vm6, %v909_v17, %v905_v30  ;;  %v1020_v29 = vsub.f32 1.0, %v1019_v20  ;;  %vm1039_vm15 = vweird.f32 %v3514_v6  ;;  %vm1043_vm3 = vcmp.eq.f32.partialorder %v1042_v58, 8.507059e+37 }
 0x236   :  { %v915_v3 = vmul.f32 %v3510_v16, %v914_v21  ;;  %v931_v15 = vmul.f32 %v929_v61, %v910_v31  ;;  %v1035_v54 = vsub.f32 1.0, %v1034_v34  ;;  %v1044_v61 = vand.u32 2147483648, %v4349_v19  ;;  %vm1040_vm2 = vmor %vm1038_vm1, %vm1039_vm15 }
 0x237   :  { %v1021_v8 = vmul.f32 %v3512_v28, %v1020_v29  ;;  %v1057_v19 = vrot.slane %v4311_v27, 7  ;;  %v816_v27 = vadd.f32 %v4317_v53, %v4237_v44 }
 0x238   :  { %v916_v26 = vadd.f32 %v3510_v16, %v915_v3  ;;  %v932_v24 = vadd.f32 %v931_v15, %v4195_v13  ;;  %v1036_v18 = vmul.f32 %v3514_v6, %v1035_v54  ;;  %v1045_v9 = vor.u32 1.1754944e-38, %v1044_v61 }
 0x239   :  { %v1022_v5 = vadd.f32 %v3512_v28, %v1021_v8 }
 0x23a   :  { %v920_v57 = vsel %vm919_vm10, %v3510_v16, %v916_v26  ;;  %3515 = vtanh.f32 %v932_v24  ;;  %v1037_v32 = vadd.f32 %v3514_v6, %v1036_v18  ;;  %v936_v16 = vrot.slane %v4303_v22, 7 }
 0x23b   :  { %v1026_v0 = vsel %vm1025_vm12, %v3512_v28, %v1022_v5  ;;  %v925_v59 = vsel %vm922_vm13, %v924_v55, %v920_v57 }
 0x23c   :  { %v1031_v17 = vsel %vm1028_vm14, %v1030_v7, %v1026_v0  ;;  %v934_v21 = vsub.f32 1.0, %v925_v59  ;;  %v1041_v30 = vsel %vm1040_vm2, %v3514_v6, %v1037_v32  ;;  %v938_v31 = vmul.f32 %v936_v16, %v925_v59 }
 0x23d   :  { %v1052_v20 = vmul.f32 %v1050_v10, %v1031_v17  ;;  %v1046_v34 = vsel %vm1043_vm3, %v1045_v9, %v1041_v30 }
 0x23e   :  { %v1055_v15 = vsub.f32 1.0, %v1046_v34  ;;  %v1059_v6 = vmul.f32 %v1057_v19, %v1046_v34 }
 0x23f   :  { %v1053_v25 = vadd.f32 %v1052_v20, %v4219_v52 }
 0x240   :  { %v3516_v28 = vpop.eup %3515 }
 0x241   :  { %v935_v56 = vmul.f32 %v3516_v28, %v934_v21  ;;  %3517 = vtanh.f32 %v1053_v25 }
 0x243   :  { %v4361_v29 = vadd.f32 %v938_v31, %v935_v56 }
 0x245   :  { %v1066_v3 = vrot.slane %v4361_v29, 2 }
 0x247   :  { %v3518_v22 = vpop.eup %3517  ;;  %3356 = vmatmul.msk.f32.vlgmr.msra.gmra.mxu3 %vm163_vm0, %v1066_v3  ;;  %3357 = vmatmul.msk.f32.vlgmr.msra.gmra.mxu0 %vm163_vm0, %v1066_v3 }
 0x248   :  { %v1056_v1 = vmul.f32 %v3518_v22, %v1055_v15  ;;  %3358 = vmatmul.msk.f32.vlgmr.msra.gmra.mxu1 %vm163_vm0, %v1066_v3  ;;  %1369 = vmatpush.msra.mxu3 %v4082_v39  ;;  %v4402_v39 = vld [vmem:[#allocation13 + $0x38] sm:$0xff] }
 0x249   :  { %1450 = vmatpush.msra.mxu0 %v4067_v33  ;;  %1470 = vmatpush.msra.mxu1 %v4071_v35  ;;  %v4391_v35 = vld [vmem:[#allocation13 + $0x48] sm:$0xff] }
 0x24a   :  { %v4371_v54 = vadd.f32 %v1059_v6, %v1056_v1  ;;  %1370 = vmatpush.msra.mxu3 %v4093_v42  ;;  %v4412_v42 = vld [vmem:[#allocation13] sm:$0xff] }
 0x24b   :  { %1451 = vmatpush.msra.mxu0 %v4075_v37  ;;  %1471 = vmatpush.msra.mxu1 %v4078_v38  ;;  %v4395_v37 = vld [vmem:[#allocation13 + $0x50] sm:$0xff] }
 0x24c   :  { %v1062_v8 = vrot.slane %v4371_v54, 2  ;;  %1371 = vmatpush.msra.mxu3 %v4103_v47  ;;  %v4398_v38 = vld [vmem:[#allocation13 + $0x30] sm:$0xff] }
 0x24d   :  { %1452 = vmatpush.msra.mxu0 %v4087_v40  ;;  %1472 = vmatpush.msra.mxu1 %v4089_v41  ;;  %v4405_v40 = vld [vmem:[#allocation13 + $0x18] sm:$0xff]  ;;  %v4409_v41 = vld [vmem:[#allocation13 + $0x20] sm:$0xff] }
 0x24e   :  { %v4382_v33 = vadd.f32 %v1062_v8, %v816_v27  ;;  %3361 = vmatmul.msk.f32.vlgmr.msra.gmra.mxu2 %vm163_vm0, %v1062_v8  ;;  %1372 = vmatpush.msra.mxu3 %v4111_v49 }
 0x24f   :  { %3362 = vmatmul.msk.f32.vlgmr.msrb.gmra.mxu3 %vm163_vm0, %v1062_v8  ;;  %3363 = vmatmul.msk.f32.vlgmr.msrb.gmra.mxu0 %vm163_vm0, %v1062_v8 }
 0x250   :  { %1490 = vmatpush.msra.mxu2 %v4095_v43  ;;  %1453 = vmatpush.msra.mxu0 %v4097_v45  ;;  %v4415_v43 = vld [vmem:[#allocation13 + $0x8] sm:$0xff] }
 0x251   :  { %1473 = vmatpush.msra.mxu1 %v4099_v46  ;;  %1577 = vmatpush.msrb.mxu3 %v4391_v35 }
 0x252   :  { %1491 = vmatpush.msra.mxu2 %v4105_v48  ;;  %1597 = vmatpush.msrb.mxu0 %v4395_v37 }
 0x253   :  { %1578 = vmatpush.msrb.mxu3 %v4398_v38 }
 0x254   :  { %1492 = vmatpush.msra.mxu2 %v4113_v50  ;;  %1598 = vmatpush.msrb.mxu0 %v4402_v39 }
 0x255   :  { %1579 = vmatpush.msrb.mxu3 %v4405_v40 }
 0x256   :  { %1493 = vmatpush.msra.mxu2 %v4117_v51  ;;  %1599 = vmatpush.msrb.mxu0 %v4409_v41 }
 0x257   :  { %1580 = vmatpush.msrb.mxu3 %v4412_v42 }
 0x258   :  { %1600 = vmatpush.msrb.mxu0 %v4415_v43 }
 0x2c4   :  { %v1106_v45 = vpop.f32.mrf.mxu0 }
 0x2c5   :  { %v1132_v46 = vrot.slane %v1106_v45, 5  ;;  %v1126_v21 = vpop.f32.mrf.mxu1 }
 0x2c6   :  { %v1175_v9 = vadd.f32 %v1126_v21, %v4193_v63 }
 0x2c7   :  { %v1136_v47 = vadd.f32 %v1132_v46, %v4178_v11 }
 0x2c8   :  { %v1177_v27 = vrot.slane %v1175_v9, 5 }
 0x2c9   :  { %v3360_v48 = vmul.f32 -1.442695, %v1136_v47 }
 0x2ca   :  { %v1086_v49 = vpop.f32.mrf.mxu3 }
 0x2cb   :  { %3519 = vpow2.f32 %v3360_v48  ;;  %v1131_v50 = vrot.slane %v1086_v49, 5 }
 0x2cc   :  { %v1247_v6 = vpop.f32.mrf.mxu0 }
 0x2cd   :  { %v1135_v51 = vadd.f32 %v1131_v50, %v4171_v2  ;;  %v1296_v50 = vadd.f32 %v1247_v6, %v4204_v36 }
 0x2cf   :  { %v3359_v44 = vmul.f32 -1.442695, %v1135_v51 }
 0x2d1   :  { %v3520_v53 = vpop.eup %3519  ;;  %3521 = vpow2.f32 %v3359_v44  ;;  %v1207_v23 = vpop.f32.mrf.mxu2 }
 0x2d2   :  { %v4420_v26 = vadd.f32 1.0, %v3520_v53  ;;  %v1252_v24 = vrot.slane %v1207_v23, 5  ;;  %v1227_v18 = vpop.f32.mrf.mxu3 }
 0x2d3   :  { %v1253_v5 = vrot.slane %v1227_v18, 5 }
 0x2d4   :  { %3523 = vrcp.f32 %v4420_v26  ;;  %v1256_v55 = vadd.f32 %v1252_v24, %v4180_v12  ;;  %v1171_v48 = vand.u32 2147483648, %v4420_v26  ;;  %vm1165_vm9 = vweird.f32 %v4420_v26 }
 0x2d5   :  { %v1257_v57 = vadd.f32 %v1253_v5, %v4182_v14  ;;  %v1169_v44 = vand.u32 2147483647, %v4420_v26 }
 0x2d6   :  { %v3364_v0 = vmul.f32 -1.442695, %v1256_v55 }
 0x2d7   :  { %v3522_v7 = vpop.eup %3521  ;;  %v3365_v10 = vmul.f32 -1.442695, %v1257_v57  ;;  %vm1170_vm13 = vcmp.eq.f32.partialorder %v1169_v44, 8.507059e+37  ;;  %v4478_v44 = vld [vmem:[#allocation8 + $0x18] sm:$0xff] }
 0x2d8   :  { %v1143_v59 = vadd.f32 1.0, %v3522_v7  ;;  %3525 = vpow2.f32 %v3364_v0  ;;  %v1172_v7 = vor.u32 1.1754944e-38, %v1171_v48  ;;  %v4468_v48 = vld [vmem:[#allocation8 + $0x30] sm:$0xff] }
 0x2da   :  { %3527 = vrcp.f32 %v1143_v59  ;;  %v3524_v17 = vpop.eup %3523  ;;  %v1156_v31 = vand.u32 2147483648, %v1143_v59  ;;  %v1154_v3 = vand.u32 2147483647, %v1143_v59  ;;  %vm1150_vm5 = vweird.f32 %v1143_v59 }
 0x2db   :  { %3529 = vpow2.f32 %v3365_v10  ;;  %v1161_v32 = vmul.f32 %v3524_v17, %v4420_v26  ;;  %vm1166_vm8 = vweird.f32 %v3524_v17 }
 0x2dc   :  { %v1157_v1 = vor.u32 1.1754944e-38, %v1156_v31  ;;  %vm1155_vm7 = vcmp.eq.f32.partialorder %v1154_v3, 8.507059e+37  ;;  %vm4435_vm10 = vmor %vm1165_vm9, %vm1166_vm8 }
 0x2dd   :  { %v1162_v28 = vsub.f32 1.0, %v1161_v32 }
 0x2de   :  { %v3526_v61 = vpop.eup %3525 }
 0x2df   :  { %v1264_v58 = vadd.f32 1.0, %v3526_v61  ;;  %v1163_v19 = vmul.f32 %v3524_v17, %v1162_v28 }
 0x2e0   :  { %v3528_v20 = vpop.eup %3527 }
 0x2e1   :  { %v3530_v16 = vpop.eup %3529  ;;  %v1146_v25 = vmul.f32 %v3528_v20, %v1143_v59  ;;  %3531 = vrcp.f32 %v1264_v58  ;;  %vm1151_vm4 = vweird.f32 %v3528_v20  ;;  %v1164_v46 = vadd.f32 %v3524_v17, %v1163_v19 }
 0x2e2   :  { %v4426_v56 = vadd.f32 1.0, %v3530_v16  ;;  %vm1152_vm6 = vmor %vm1150_vm5, %vm1151_vm4  ;;  %v1277_v53 = vand.u32 2147483648, %v1264_v58  ;;  %v1275_v5 = vand.u32 2147483647, %v1264_v58  ;;  %vm1271_vm12 = vweird.f32 %v1264_v58 }
 0x2e3   :  { %v1147_v30 = vsub.f32 1.0, %v1146_v25  ;;  %v1168_v36 = vsel %vm4435_vm10, %v3524_v17, %v1164_v46  ;;  %v1298_v59 = vrot.slane %v1296_v50, 5  ;;  %v1184_v17 = vrot.slane %v4361_v29, 7  ;;  %v4457_v46 = vld [vmem:[#allocation8 + $0x48] sm:$0xff] }
 0x2e4   :  { %3533 = vrcp.f32 %v4426_v56  ;;  %v1278_v26 = vor.u32 1.1754944e-38, %v1277_v53  ;;  %vm1276_vm15 = vcmp.eq.f32.partialorder %v1275_v5, 8.507059e+37  ;;  %v1173_v61 = vsel %vm1170_vm13, %v1172_v7, %v1168_v36  ;;  %v4474_v50 = vld [vmem:[#allocation13 + $0x28] sm:$0xff]  ;;  %v4481_v53 = vld [vmem:[#allocation8 + $0x20] sm:$0xff] }
 0x2e5   :  { %v1148_v34 = vmul.f32 %v3528_v20, %v1147_v30  ;;  %v1292_v25 = vand.u32 2147483648, %v4426_v56  ;;  %vm1286_vm2 = vweird.f32 %v4426_v56  ;;  %v1182_v28 = vsub.f32 1.0, %v1173_v61  ;;  %v4496_v5 = vld [vmem:[#allocation8] sm:$0xff]  ;;  %v4512_v36 = vld [vmem:[#allocation8 + $0x10] sm:$0xff] }
 0x2e7   :  { %v1149_v15 = vadd.f32 %v3528_v20, %v1148_v34  ;;  %v3532_v22 = vpop.eup %3531  ;;  %v1186_v34 = vmul.f32 %v1184_v17, %v1173_v61  ;;  %v1293_v19 = vor.u32 1.1754944e-38, %v1292_v25 }
 0x2e8   :  { %v1267_v45 = vmul.f32 %v3532_v22, %v1264_v58  ;;  %vm1272_vm11 = vweird.f32 %v3532_v22  ;;  %v1290_v58 = vand.u32 2147483647, %v4426_v56 }
 0x2e9   :  { %v1153_v8 = vsel %vm1152_vm6, %v3528_v20, %v1149_v15  ;;  %vm1273_vm14 = vmor %vm1271_vm12, %vm1272_vm11 }
 0x2ea   :  { %v1158_v63 = vsel %vm1155_vm7, %v1157_v1, %v1153_v8  ;;  %v3534_v47 = vpop.eup %3533  ;;  %v1268_v51 = vsub.f32 1.0, %v1267_v45  ;;  %vm1291_vm4 = vcmp.eq.f32.partialorder %v1290_v58, 8.507059e+37  ;;  %v1305_v1 = vrot.slane %v4371_v54, 7  ;;  %v4463_v54 = vld [vmem:[#allocation13 + $0x40] sm:$0xff] }
 0x2eb   :  { %v1179_v49 = vmul.f32 %v1177_v27, %v1158_v63  ;;  %v1282_v23 = vmul.f32 %v3534_v47, %v4426_v56  ;;  %vm1287_vm1 = vweird.f32 %v3534_v47  ;;  %v4454_v27 = vld [vmem:[#allocation13 + $0x58] sm:$0xff]  ;;  %v4460_v63 = vld [vmem:[#allocation8 + $0x50] sm:$0xff] }
 0x2ec   :  { %v1269_v18 = vmul.f32 %v3532_v22, %v1268_v51  ;;  %vm1288_vm3 = vmor %vm1286_vm2, %vm1287_vm1 }
 0x2ed   :  { %v1180_v55 = vadd.f32 %v1179_v49, %v4195_v13  ;;  %v1283_v57 = vsub.f32 1.0, %v1282_v23  ;;  %v4471_v49 = vld [vmem:[#allocation8 + $0x38] sm:$0xff] }
 0x2ee   :  { %v1270_v0 = vadd.f32 %v3532_v22, %v1269_v18  ;;  %v4484_v23 = vld [vmem:[#allocation13 + $0x10] sm:$0xff] }
 0x2ef   :  { %3535 = vtanh.f32 %v1180_v55  ;;  %v1284_v10 = vmul.f32 %v3534_v47, %v1283_v57  ;;  %v4493_v18 = vld [vmem:[#allocation8 + $0x58] sm:$0xff]  ;;  %v4499_v55 = vld [vmem:[#allocation8 + $0x8] sm:$0xff] }
 0x2f0   :  { %v1274_v32 = vsel %vm1273_vm14, %v3532_v22, %v1270_v0  ;;  %v4507_v57 = vld [vmem:[#allocation8 + $0x28] sm:$0xff] }
 0x2f1   :  { %v1279_v20 = vsel %vm1276_vm15, %v1278_v26, %v1274_v32  ;;  %v1285_v16 = vadd.f32 %v3534_v47, %v1284_v10 }
 0x2f2   :  { %v1300_v21 = vmul.f32 %v1298_v59, %v1279_v20 }
 0x2f3   :  { %v1289_v3 = vsel %vm1288_vm3, %v3534_v47, %v1285_v16 }
 0x2f4   :  { %v1301_v9 = vadd.f32 %v1300_v21, %v4219_v52  ;;  %v1294_v22 = vsel %vm1291_vm4, %v1293_v19, %v1289_v3 }
 0x2f5   :  { %v3536_v30 = vpop.eup %3535  ;;  %v1303_v56 = vsub.f32 1.0, %v1294_v22  ;;  %v1307_v45 = vmul.f32 %v1305_v1, %v1294_v22 }
 0x2f6   :  { %v1183_v31 = vmul.f32 %v3536_v30, %v1182_v28  ;;  %3537 = vtanh.f32 %v1301_v9 }
 0x2f8   :  { %v4447_v15 = vadd.f32 %v1186_v34, %v1183_v31 }
 0x2fa   :  { %v1314_v29 = vrot.slane %v4447_v15, 3 }
 0x2fc   :  { %3366 = vmatmul.msk.f32.vlgmr.msrb.gmra.mxu1 %vm163_vm0, %v1314_v29  ;;  %3367 = vmatmul.msk.f32.vlgmr.msrb.gmra.mxu2 %vm163_vm0, %v1314_v29  ;;  %v3538_v6 = vpop.eup %3537 }
 0x2fd   :  { %3368 = vmatmul.msk.f32.vlgmr.msra.gmra.mxu3 %vm163_vm0, %v1314_v29  ;;  %1617 = vmatpush.msrb.mxu1 %v4454_v27  ;;  %v1304_v8 = vmul.f32 %v3538_v6, %v1303_v56 }
 0x2fe   :  { %1698 = vmatpush.msrb.mxu2 %v4457_v46  ;;  %1718 = vmatpush.msra.mxu3 %v4460_v63 }
 0x2ff   :  { %1618 = vmatpush.msrb.mxu1 %v4463_v54  ;;  %v4466_v47 = vadd.f32 %v1307_v45, %v1304_v8 }
 0x300   :  { %1699 = vmatpush.msrb.mxu2 %v4468_v48  ;;  %1719 = vmatpush.msra.mxu3 %v4471_v49 }
 0x301   :  { %1619 = vmatpush.msrb.mxu1 %v4474_v50  ;;  %v1310_v51 = vrot.slane %v4466_v47, 3 }
 0x302   :  { %1700 = vmatpush.msrb.mxu2 %v4478_v44  ;;  %1720 = vmatpush.msra.mxu3 %v4481_v53 }
 0x303   :  { %1620 = vmatpush.msrb.mxu1 %v4484_v23  ;;  %v4488_v24 = vadd.f32 %v1310_v51, %v4382_v33  ;;  %3371 = vmatmul.msk.f32.vlgmr.msra.gmra.mxu0 %vm163_vm0, %v1310_v51  ;;  %v4502_v33 = vld [vmem:[#allocation8 + $0x40] sm:$0xff] }
 0x304   :  { %3372 = vmatmul.msk.f32.vlgmr.msra.gmra.mxu1 %vm163_vm0, %v1310_v51  ;;  %3373 = vmatmul.msk.f32.vlgmr.msra.gmra.mxu2 %vm163_vm0, %v1310_v51 }
 0x305   :  { %1738 = vmatpush.msra.mxu0 %v4493_v18  ;;  %1701 = vmatpush.msrb.mxu2 %v4496_v5 }
 0x306   :  { %1721 = vmatpush.msra.mxu3 %v4499_v55  ;;  %1825 = vmatpush.msra.mxu1 %v4391_v35 }
 0x307   :  { %1739 = vmatpush.msra.mxu0 %v4502_v33  ;;  %1845 = vmatpush.msra.mxu2 %v4395_v37 }
 0x308   :  { %1826 = vmatpush.msra.mxu1 %v4398_v38 }
 0x309   :  { %1740 = vmatpush.msra.mxu0 %v4507_v57  ;;  %1846 = vmatpush.msra.mxu2 %v4402_v39 }
 0x30a   :  { %1827 = vmatpush.msra.mxu1 %v4405_v40 }
 0x30b   :  { %1741 = vmatpush.msra.mxu0 %v4512_v36  ;;  %1847 = vmatpush.msra.mxu2 %v4409_v41 }
 0x30c   :  { %1828 = vmatpush.msra.mxu1 %v4412_v42 }
 0x30d   :  { %1848 = vmatpush.msra.mxu2 %v4415_v43 }
 0x379   :  { %v1334_v7 = vpop.f32.mrf.mxu1 }
 0x37a   :  { %v1379_v0 = vrot.slane %v1334_v7, 4 }
 0x37c   :  { %v1383_v26 = vadd.f32 %v1379_v0, %v4171_v2 }
 0x37e   :  { %v3369_v10 = vmul.f32 -1.442695, %v1383_v26 }
 0x37f   :  { %v1354_v59 = vpop.f32.mrf.mxu2 }
 0x380   :  { %3539 = vpow2.f32 %v3369_v10  ;;  %v1380_v32 = vrot.slane %v1354_v59, 4  ;;  %v1455_v61 = vpop.f32.mrf.mxu0  ;;  %v1374_v8 = vpop.f32.mrf.mxu3  ;;  %v4529_v10 = vld [vmem:[%s4924_s9] sm:$0x1]  ;;  %s3952_s9 = smov [#allocation14]  }
 0x381   :  { %v1475_v20 = vpop.f32.mrf.mxu1  ;;  %v1500_v21 = vrot.slane %v1455_v61, 4  ;;  %v1423_v59 = vadd.f32 %v4529_v10, %v1374_v8  ;;  %s3308_s3 = sshll.u32 %s3952_s9, 4  ;;  %s3309_s3 = int_to_ptr.vmem [resolvable:$true] %s3308_s3 }
 0x382   :  { %v1384_v16 = vadd.f32 %v1380_v32, %v4178_v11  ;;  %v1501_v25 = vrot.slane %v1475_v20, 4 }
 0x383   :  { %v1504_v58 = vadd.f32 %v1500_v21, %v4180_v12 }
 0x384   :  { %v3370_v17 = vmul.f32 -1.442695, %v1384_v16  ;;  %v1505_v28 = vadd.f32 %v1501_v25, %v4182_v14 }
 0x385   :  { %v3374_v9 = vmul.f32 -1.442695, %v1504_v58  ;;  %v1425_v58 = vrot.slane %v1423_v59, 4 }
 0x386   :  { %v3540_v30 = vpop.eup %3539  ;;  %3541 = vpow2.f32 %v3370_v17  ;;  %v3375_v31 = vmul.f32 -1.442695, %v1505_v28 }
 0x387   :  { %v1391_v34 = vadd.f32 1.0, %v3540_v30  ;;  %3543 = vpow2.f32 %v3374_v9 }
 0x389   :  { %3545 = vrcp.f32 %v1391_v34  ;;  %v1404_v7 = vand.u32 2147483648, %v1391_v34  ;;  %v1402_v26 = vand.u32 2147483647, %v1391_v34  ;;  %vm1398_vm6 = vweird.f32 %v1391_v34 }
 0x38a   :  { %3547 = vpow2.f32 %v3375_v31 }
 0x38b   :  { %v1405_v16 = vor.u32 1.1754944e-38, %v1404_v7  ;;  %vm1403_vm8 = vcmp.eq.f32.partialorder %v1402_v26, 8.507059e+37 }
 0x38c   :  { %v3542_v3 = vpop.eup %3541 }
 0x38d   :  { %v1392_v19 = vadd.f32 1.0, %v3542_v3  ;;  %v3544_v22 = vpop.eup %3543 }
 0x38e   :  { %v1512_v6 = vadd.f32 1.0, %v3544_v22 }
 0x38f   :  { %v3546_v29 = vpop.eup %3545  ;;  %3549 = vrcp.f32 %v1392_v19  ;;  %v1419_v30 = vand.u32 2147483648, %v1392_v19  ;;  %vm1413_vm10 = vweird.f32 %v1392_v19  ;;  %v1417_v8 = vand.u32 2147483647, %v1392_v19 }
 0x390   :  { %v3548_v1 = vpop.eup %3547  ;;  %v1394_v56 = vmul.f32 %v3546_v29, %v1391_v34  ;;  %3551 = vrcp.f32 %v1512_v6  ;;  %vm1399_vm5 = vweird.f32 %v3546_v29  ;;  %v1523_v59 = vand.u32 2147483647, %v1512_v6 }
 0x391   :  { %v4523_v45 = vadd.f32 1.0, %v3548_v1  ;;  %vm1400_vm7 = vmor %vm1398_vm6, %vm1399_vm5  ;;  %vm1418_vm13 = vcmp.eq.f32.partialorder %v1417_v8, 8.507059e+37  ;;  %vm1519_vm14 = vweird.f32 %v1512_v6 }
 0x392   :  { %v1395_v51 = vsub.f32 1.0, %v1394_v56  ;;  %v1495_v56 = vpop.f32.mrf.mxu2  ;;  %vm1524_vm1 = vcmp.eq.f32.partialorder %v1523_v59, 8.507059e+37 }
 0x393   :  { %3553 = vrcp.f32 %v4523_v45  ;;  %vm1534_vm3 = vweird.f32 %v4523_v45 }
 0x394   :  { %v1396_v0 = vmul.f32 %v3546_v29, %v1395_v51 }
 0x395   :  { %v3550_v32 = vpop.eup %3549 }
 0x396   :  { %v1409_v61 = vmul.f32 %v3550_v32, %v1392_v19  ;;  %v1397_v20 = vadd.f32 %v3546_v29, %v1396_v0  ;;  %v3552_v21 = vpop.eup %3551  ;;  %vm1414_vm9 = vweird.f32 %v3550_v32 }
 0x397   :  { %v1515_v31 = vmul.f32 %v3552_v21, %v1512_v6  ;;  %vm1415_vm11 = vmor %vm1413_vm10, %vm1414_vm9  ;;  %vm1520_vm12 = vweird.f32 %v3552_v21 }
 0x398   :  { %v1410_v25 = vsub.f32 1.0, %v1409_v61  ;;  %v1401_v17 = vsel %vm1400_vm7, %v3546_v29, %v1397_v20  ;;  %v1525_v29 = vand.u32 2147483648, %v1512_v6  ;;  %v4534_v61 = vld [vmem:[#allocation10] sm:$0x1]  ;;  %vm1521_vm15 = vmor %vm1519_vm14, %vm1520_vm12  ;;  %v1538_v6 = vand.u32 2147483647, %v4523_v45 }
 0x399   :  { %v3554_v28 = vpop.eup %3553  ;;  %v1406_v9 = vsel %vm1403_vm8, %v1405_v16, %v1401_v17  ;;  %v1516_v34 = vsub.f32 1.0, %v1515_v31  ;;  %v1544_v20 = vadd.f32 %v4534_v61, %v1495_v56  ;;  %v1420_v16 = vor.u32 1.1754944e-38, %v1419_v30 }
 0x39a   :  { %v1411_v3 = vmul.f32 %v3550_v32, %v1410_v25  ;;  %v1427_v22 = vmul.f32 %v1425_v58, %v1406_v9  ;;  %v1530_v1 = vmul.f32 %v3554_v28, %v4523_v45  ;;  %v1526_v9 = vor.u32 1.1754944e-38, %v1525_v29 }
 0x39b   :  { %v1517_v26 = vmul.f32 %v3552_v21, %v1516_v34  ;;  %vm1535_vm2 = vweird.f32 %v3554_v28  ;;  %v1432_v34 = vrot.slane %v4447_v15, 7  ;;  %v1540_v30 = vand.u32 2147483648, %v4523_v45 }
 0x39c   :  { %v1412_v51 = vadd.f32 %v3550_v32, %v1411_v3  ;;  %v1428_v7 = vadd.f32 %v1427_v22, %v4195_v13  ;;  %v1531_v0 = vsub.f32 1.0, %v1530_v1  ;;  %v1546_v3 = vrot.slane %v1544_v20, 4  ;;  %vm1536_vm4 = vmor %vm1534_vm3, %vm1535_vm2 }
 0x39d   :  { %v1518_v19 = vadd.f32 %v3552_v21, %v1517_v26  ;;  %vm1539_vm5 = vcmp.eq.f32.partialorder %v1538_v6, 8.507059e+37  ;;  %v1553_v45 = vrot.slane %v4466_v47, 7 }
 0x39e   :  { %v1416_v25 = vsel %vm1415_vm11, %v3550_v32, %v1412_v51  ;;  %3555 = vtanh.f32 %v1428_v7  ;;  %v1532_v17 = vmul.f32 %v3554_v28, %v1531_v0  ;;  %v1541_v0 = vor.u32 1.1754944e-38, %v1540_v30 }
 0x39f   :  { %v1421_v58 = vsel %vm1418_vm13, %v1420_v16, %v1416_v25  ;;  %v1522_v31 = vsel %vm1521_vm15, %v3552_v21, %v1518_v19 }
 0x3a0   :  { %v1527_v22 = vsel %vm1524_vm1, %v1526_v9, %v1522_v31  ;;  %v1533_v1 = vadd.f32 %v3554_v28, %v1532_v17  ;;  %v1430_v4 = vsub.f32 1.0, %v1421_v58  ;;  %v1434_v51 = vmul.f32 %v1432_v34, %v1421_v58 }
 0x3a1   :  { %v1548_v32 = vmul.f32 %v1546_v3, %v1527_v22 }
 0x3a2   :  { %v1537_v7 = vsel %vm1536_vm4, %v3554_v28, %v1533_v1 }
 0x3a3   :  { %v1549_v21 = vadd.f32 %v1548_v32, %v4219_v52  ;;  %v1542_v15 = vsel %vm1539_vm5, %v1541_v0, %v1537_v7 }
 0x3a4   :  { %v3556_v56 = vpop.eup %3555  ;;  %v1555_v20 = vmul.f32 %v1553_v45, %v1542_v15 }
 0x3a5   :  { %v1431_v8 = vmul.f32 %v3556_v56, %v1430_v4  ;;  %3557 = vtanh.f32 %v1549_v21  ;;  %v1551_v4 = vsub.f32 1.0, %v1542_v15 }
 0x3a7   :  { %v4542_v29 = vadd.f32 %v1434_v51, %v1431_v8 }
 0x3a9   :  { %v1562_v26 = vrot.slane %v4542_v29, 4 }
 0x3ab   :  { %3376 = vmatmul.msk.f32.vlgmr.msrb.gmra.mxu3 %vm163_vm0, %v1562_v26  ;;  %3377 = vmatmul.msk.f32.vlgmr.msrb.gmra.mxu0 %vm163_vm0, %v1562_v26  ;;  %v3558_v28 = vpop.eup %3557 }
 0x3ac   :  { %3378 = vmatmul.msk.f32.vlgmr.msrb.gmra.mxu1 %vm163_vm0, %v1562_v26  ;;  %1865 = vmatpush.msrb.mxu3 %v4454_v27  ;;  %v1552_v59 = vmul.f32 %v3558_v28, %v1551_v4 }
 0x3ad   :  { %1946 = vmatpush.msrb.mxu0 %v4457_v46  ;;  %1966 = vmatpush.msrb.mxu1 %v4460_v63 }
 0x3ae   :  { %1866 = vmatpush.msrb.mxu3 %v4463_v54  ;;  %v4555_v16 = vadd.f32 %v1555_v20, %v1552_v59 }
 0x3af   :  { %1947 = vmatpush.msrb.mxu0 %v4468_v48  ;;  %1967 = vmatpush.msrb.mxu1 %v4471_v49 }
 0x3b0   :  { %1867 = vmatpush.msrb.mxu3 %v4474_v50  ;;  %v1558_v47 = vrot.slane %v4555_v16, 4 }
 0x3b1   :  { %1948 = vmatpush.msrb.mxu0 %v4478_v44  ;;  %1968 = vmatpush.msrb.mxu1 %v4481_v53 }
 0x3b2   :  { %1868 = vmatpush.msrb.mxu3 %v4484_v23  ;;  %v4565_v25 = vadd.f32 %v1558_v47, %v4488_v24  ;;  %3381 = vmatmul.msk.f32.vlgmr.msrb.gmra.mxu2 %vm163_vm0, %v1558_v47 }
 0x3b3   :  { %1949 = vmatpush.msrb.mxu0 %v4496_v5  ;;  %1969 = vmatpush.msrb.mxu1 %v4499_v55 }
 0x3b4   :  { %3382 = vmatmul.msk.f32.vlgmr.msra.gmra.mxu3 %vm163_vm0, %v1558_v47  ;;  %3383 = vmatmul.msk.f32.vlgmr.msra.gmra.mxu0 %vm163_vm0, %v1558_v47 }
 0x3b5   :  { %1986 = vmatpush.msrb.mxu2 %v4493_v18  ;;  %2073 = vmatpush.msra.mxu3 %v4391_v35 }
 0x3b6   :  { %2093 = vmatpush.msra.mxu0 %v4395_v37 }
 0x3b7   :  { %1987 = vmatpush.msrb.mxu2 %v4502_v33  ;;  %2074 = vmatpush.msra.mxu3 %v4398_v38 }
 0x3b8   :  { %2094 = vmatpush.msra.mxu0 %v4402_v39 }
 0x3b9   :  { %1988 = vmatpush.msrb.mxu2 %v4507_v57  ;;  %2075 = vmatpush.msra.mxu3 %v4405_v40 }
 0x3ba   :  { %2095 = vmatpush.msra.mxu0 %v4409_v41 }
 0x3bb   :  { %1989 = vmatpush.msrb.mxu2 %v4512_v36  ;;  %2076 = vmatpush.msra.mxu3 %v4412_v42 }
 0x3bc   :  { %2096 = vmatpush.msra.mxu0 %v4415_v43 }
 0x428   :  { %v1602_v35 = vpop.f32.mrf.mxu0 }
 0x429   :  { %v1628_v37 = vrot.slane %v1602_v35, 3  ;;  %v1622_v51 = vpop.f32.mrf.mxu1 }
 0x42a   :  { %v1671_v28 = vadd.f32 %v4529_v10, %v1622_v51 }
 0x42b   :  { %v1632_v24 = vadd.f32 %v1628_v37, %v4178_v11 }
 0x42d   :  { %v3380_v17 = vmul.f32 -1.442695, %v1632_v24 }
 0x42e   :  { %v1582_v38 = vpop.f32.mrf.mxu3 }
 0x42f   :  { %3559 = vpow2.f32 %v3380_v17  ;;  %v1627_v39 = vrot.slane %v1582_v38, 3  ;;  %v1673_v17 = vrot.slane %v1671_v28, 3 }
 0x431   :  { %v1631_v19 = vadd.f32 %v1627_v39, %v4171_v2 }
 0x433   :  { %v3379_v58 = vmul.f32 -1.442695, %v1631_v19 }
 0x435   :  { %v3560_v40 = vpop.eup %3559  ;;  %3561 = vpow2.f32 %v3379_v58  ;;  %v1703_v9 = vpop.f32.mrf.mxu2 }
 0x436   :  { %v4584_v41 = vadd.f32 1.0, %v3560_v40  ;;  %v1748_v42 = vrot.slane %v1703_v9, 3  ;;  %v1743_v9 = vpop.f32.mrf.mxu0 }
 0x437   :  { %v1723_v31 = vpop.f32.mrf.mxu3 }
 0x438   :  { %3563 = vrcp.f32 %v4584_v41  ;;  %v1749_v43 = vrot.slane %v1723_v31, 3  ;;  %v1752_v22 = vadd.f32 %v1748_v42, %v4180_v12  ;;  %v1667_v58 = vand.u32 2147483648, %v4584_v41 }
 0x439   :  { %vm1661_vm11 = vweird.f32 %v4584_v41 }
 0x43a   :  { %v1753_v1 = vadd.f32 %v1749_v43, %v4182_v14  ;;  %v3384_v30 = vmul.f32 -1.442695, %v1752_v22 }
 0x43b   :  { %v3562_v3 = vpop.eup %3561 }
 0x43c   :  { %v1639_v34 = vadd.f32 1.0, %v3562_v3  ;;  %v3385_v32 = vmul.f32 -1.442695, %v1753_v1  ;;  %v1665_v3 = vand.u32 2147483647, %v4584_v41 }
 0x43e   :  { %3565 = vrcp.f32 %v1639_v34  ;;  %v3564_v56 = vpop.eup %3563  ;;  %v1652_v59 = vand.u32 2147483648, %v1639_v34  ;;  %v1650_v47 = vand.u32 2147483647, %v1639_v34  ;;  %vm1646_vm7 = vweird.f32 %v1639_v34 }
 0x43f   :  { %3567 = vpow2.f32 %v3384_v30  ;;  %v1657_v6 = vmul.f32 %v3564_v56, %v4584_v41  ;;  %vm1662_vm10 = vweird.f32 %v3564_v56  ;;  %vm1666_vm14 = vcmp.eq.f32.partialorder %v1665_v3, 8.507059e+37 }
 0x440   :  { %3569 = vpow2.f32 %v3385_v32  ;;  %v1653_v24 = vor.u32 1.1754944e-38, %v1652_v59  ;;  %vm1651_vm9 = vcmp.eq.f32.partialorder %v1650_v47, 8.507059e+37  ;;  %vm4598_vm12 = vmor %vm1661_vm11, %vm1662_vm10  ;;  %v1680_v59 = vrot.slane %v4542_v29, 7 }
 0x441   :  { %v1658_v15 = vsub.f32 1.0, %v1657_v6  ;;  %v1668_v6 = vor.u32 1.1754944e-38, %v1667_v58 }
 0x443   :  { %v1659_v35 = vmul.f32 %v3564_v56, %v1658_v15 }
 0x444   :  { %v3566_v8 = vpop.eup %3565 }
 0x445   :  { %v3568_v21 = vpop.eup %3567  ;;  %v1642_v7 = vmul.f32 %v3566_v8, %v1639_v34  ;;  %vm1647_vm6 = vweird.f32 %v3566_v8  ;;  %v1660_v19 = vadd.f32 %v3564_v56, %v1659_v35  ;;  %v1792_v34 = vadd.f32 %v4534_v61, %v1743_v9 }
 0x446   :  { %v3570_v0 = vpop.eup %3569  ;;  %v1760_v26 = vadd.f32 1.0, %v3568_v21  ;;  %vm1648_vm8 = vmor %vm1646_vm7, %vm1647_vm6 }
 0x447   :  { %v1643_v45 = vsub.f32 1.0, %v1642_v7  ;;  %v4590_v4 = vadd.f32 1.0, %v3570_v0  ;;  %v1664_v51 = vsel %vm4598_vm12, %v3564_v56, %v1660_v19 }
 0x448   :  { %3571 = vrcp.f32 %v1760_v26  ;;  %v1771_v41 = vand.u32 2147483647, %v1760_v26  ;;  %vm1767_vm15 = vweird.f32 %v1760_v26 }
 0x449   :  { %v1644_v20 = vmul.f32 %v3566_v8, %v1643_v45  ;;  %3573 = vrcp.f32 %v4590_v4  ;;  %v1669_v45 = vsel %vm1666_vm14, %v1668_v6, %v1664_v51  ;;  %vm1782_vm4 = vweird.f32 %v4590_v4 }
 0x44a   :  { %vm1772_vm2 = vcmp.eq.f32.partialorder %v1771_v41, 8.507059e+37  ;;  %v1678_v56 = vsub.f32 1.0, %v1669_v45  ;;  %v1682_v58 = vmul.f32 %v1680_v59, %v1669_v45 }
 0x44b   :  { %v1645_v37 = vadd.f32 %v3566_v8, %v1644_v20  ;;  %v1794_v20 = vrot.slane %v1792_v34, 3 }
 0x44d   :  { %v1649_v38 = vsel %vm1648_vm8, %v3566_v8, %v1645_v37  ;;  %v1773_v8 = vand.u32 2147483648, %v1760_v26 }
 0x44e   :  { %v3572_v39 = vpop.eup %3571  ;;  %v1654_v40 = vsel %vm1651_vm9, %v1653_v24, %v1649_v38  ;;  %v1788_v38 = vand.u32 2147483648, %v4590_v4 }
 0x44f   :  { %v3574_v31 = vpop.eup %3573  ;;  %v1675_v42 = vmul.f32 %v1673_v17, %v1654_v40  ;;  %v1763_v43 = vmul.f32 %v3572_v39, %v1760_v26  ;;  %vm1768_vm13 = vweird.f32 %v3572_v39  ;;  %v1774_v28 = vor.u32 1.1754944e-38, %v1773_v8 }
 0x450   :  { %v1778_v22 = vmul.f32 %v3574_v31, %v4590_v4  ;;  %vm1769_vm1 = vmor %vm1767_vm15, %vm1768_vm13  ;;  %vm1783_vm3 = vweird.f32 %v3574_v31  ;;  %v1786_v26 = vand.u32 2147483647, %v4590_v4  ;;  %v1789_v9 = vor.u32 1.1754944e-38, %v1788_v38 }
 0x451   :  { %v1764_v30 = vsub.f32 1.0, %v1763_v43  ;;  %v1676_v32 = vadd.f32 %v1675_v42, %v4195_v13  ;;  %vm1784_vm5 = vmor %vm1782_vm4, %vm1783_vm3  ;;  %v1801_v4 = vrot.slane %v4555_v16, 7 }
 0x452   :  { %v1779_v21 = vsub.f32 1.0, %v1778_v22  ;;  %vm1787_vm6 = vcmp.eq.f32.partialorder %v1786_v26, 8.507059e+37 }
 0x453   :  { %v1765_v7 = vmul.f32 %v3572_v39, %v1764_v30  ;;  %3575 = vtanh.f32 %v1676_v32 }
 0x454   :  { %v1780_v0 = vmul.f32 %v3574_v31, %v1779_v21 }
 0x455   :  { %v1766_v15 = vadd.f32 %v3572_v39, %v1765_v7 }
 0x456   :  { %v1781_v37 = vadd.f32 %v3574_v31, %v1780_v0 }
 0x457   :  { %v1770_v47 = vsel %vm1769_vm1, %v3572_v39, %v1766_v15 }
 0x458   :  { %v1775_v35 = vsel %vm1772_vm2, %v1774_v28, %v1770_v47  ;;  %v1785_v39 = vsel %vm1784_vm5, %v3574_v31, %v1781_v37 }
 0x459   :  { %v3576_v24 = vpop.eup %3575  ;;  %v1796_v17 = vmul.f32 %v1794_v20, %v1775_v35  ;;  %v1790_v43 = vsel %vm1787_vm6, %v1789_v9, %v1785_v39 }
 0x45a   :  { %v1679_v19 = vmul.f32 %v3576_v24, %v1678_v56  ;;  %v1799_v3 = vsub.f32 1.0, %v1790_v43  ;;  %v1803_v1 = vmul.f32 %v1801_v4, %v1790_v43 }
 0x45b   :  { %v1797_v29 = vadd.f32 %v1796_v17, %v4219_v52 }
 0x45c   :  { %v4611_v40 = vadd.f32 %v1682_v58, %v1679_v19 }
 0x45d   :  { %3577 = vtanh.f32 %v1797_v29 }
 0x45e   :  { %v1810_v42 = vrot.slane %v4611_v40, 5 }
 0x460   :  { %3386 = vmatmul.msk.f32.vlgmr.msra.gmra.mxu1 %vm163_vm0, %v1810_v42  ;;  %3387 = vmatmul.msk.f32.vlgmr.msra.gmra.mxu2 %vm163_vm0, %v1810_v42 }
 0x461   :  { %3388 = vmatmul.msk.f32.vlgmr.msrb.gmra.mxu3 %vm163_vm0, %v1810_v42  ;;  %2113 = vmatpush.msra.mxu1 %v4454_v27 }
 0x462   :  { %2194 = vmatpush.msra.mxu2 %v4457_v46  ;;  %2214 = vmatpush.msrb.mxu3 %v4460_v63 }
 0x463   :  { %v3578_v31 = vpop.eup %3577  ;;  %2114 = vmatpush.msra.mxu1 %v4463_v54 }
 0x464   :  { %v1800_v22 = vmul.f32 %v3578_v31, %v1799_v3  ;;  %2195 = vmatpush.msra.mxu2 %v4468_v48  ;;  %2215 = vmatpush.msrb.mxu3 %v4471_v49 }
 0x465   :  { %2115 = vmatpush.msra.mxu1 %v4474_v50 }
 0x466   :  { %v4625_v34 = vadd.f32 %v1803_v1, %v1800_v22  ;;  %2196 = vmatpush.msra.mxu2 %v4478_v44  ;;  %2216 = vmatpush.msrb.mxu3 %v4481_v53 }
 0x467   :  { %2116 = vmatpush.msra.mxu1 %v4484_v23 }
 0x468   :  { %v1806_v27 = vrot.slane %v4625_v34, 5  ;;  %2197 = vmatpush.msra.mxu2 %v4496_v5  ;;  %2217 = vmatpush.msrb.mxu3 %v4499_v55 }
 0x46a   :  { %v4634_v54 = vadd.f32 %v1806_v27, %v4565_v25  ;;  %3391 = vmatmul.msk.f32.vlgmr.msrb.gmra.mxu0 %vm163_vm0, %v1806_v27  ;;  %3392 = vmatmul.msk.f32.vlgmr.msrb.gmra.mxu1 %vm163_vm0, %v1806_v27 }
 0x46b   :  { %3393 = vmatmul.msk.f32.vlgmr.msrb.gmra.mxu2 %vm163_vm0, %v1806_v27  ;;  %2234 = vmatpush.msrb.mxu0 %v4493_v18 }
 0x46c   :  { %2319 = vmatpush.msrb.mxu1 %v4457_v46  ;;  %2339 = vmatpush.msrb.mxu2 %v4460_v63 }
 0x46d   :  { %2235 = vmatpush.msrb.mxu0 %v4502_v33 }
 0x46e   :  { %2320 = vmatpush.msrb.mxu1 %v4468_v48  ;;  %2340 = vmatpush.msrb.mxu2 %v4471_v49 }
 0x46f   :  { %2236 = vmatpush.msrb.mxu0 %v4507_v57 }
 0x470   :  { %2321 = vmatpush.msrb.mxu1 %v4478_v44  ;;  %2341 = vmatpush.msrb.mxu2 %v4481_v53 }
 0x471   :  { %2237 = vmatpush.msrb.mxu0 %v4512_v36 }
 0x472   :  { %2322 = vmatpush.msrb.mxu1 %v4496_v5  ;;  %2342 = vmatpush.msrb.mxu2 %v4499_v55 }
 0x4dd   :  { %v1830_v50 = vpop.f32.mrf.mxu1 }
 0x4de   :  { %v1875_v23 = vrot.slane %v1830_v50, 2 }
 0x4e0   :  { %v1879_v16 = vadd.f32 %v1875_v23, %v4171_v2 }
 0x4e2   :  { %v3389_v25 = vmul.f32 -1.442695, %v1879_v16 }
 0x4e3   :  { %v1850_v30 = vpop.f32.mrf.mxu2 }
 0x4e4   :  { %3579 = vpow2.f32 %v3389_v25  ;;  %v1876_v32 = vrot.slane %v1850_v30, 2  ;;  %v1870_v24 = vpop.f32.mrf.mxu3 }
 0x4e5   :  { %v1919_v39 = vadd.f32 %v4529_v10, %v1870_v24 }
 0x4e6   :  { %v1880_v6 = vadd.f32 %v1876_v32, %v4178_v11 }
 0x4e7   :  { %v1951_v8 = vpop.f32.mrf.mxu0  ;;  %v1971_v21 = vpop.f32.mrf.mxu1  ;;  %v1921_v27 = vrot.slane %v1919_v39, 2 }
 0x4e8   :  { %v3390_v51 = vmul.f32 -1.442695, %v1880_v6  ;;  %v1996_v7 = vrot.slane %v1951_v8, 2  ;;  %v1997_v41 = vrot.slane %v1971_v21, 2 }
 0x4ea   :  { %v3580_v0 = vpop.eup %3579  ;;  %3581 = vpow2.f32 %v3390_v51  ;;  %v2000_v15 = vadd.f32 %v1996_v7, %v4180_v12  ;;  %v2001_v45 = vadd.f32 %v1997_v41, %v4182_v14 }
 0x4eb   :  { %v1887_v28 = vadd.f32 1.0, %v3580_v0 }
 0x4ec   :  { %v3394_v59 = vmul.f32 -1.442695, %v2000_v15  ;;  %v3395_v20 = vmul.f32 -1.442695, %v2001_v45 }
 0x4ed   :  { %3583 = vrcp.f32 %v1887_v28  ;;  %v1900_v29 = vand.u32 2147483648, %v1887_v28  ;;  %v1898_v42 = vand.u32 2147483647, %v1887_v28  ;;  %vm1894_vm8 = vweird.f32 %v1887_v28 }
 0x4ee   :  { %3585 = vpow2.f32 %v3394_v59  ;;  %v1991_v50 = vpop.f32.mrf.mxu2 }
 0x4ef   :  { %3587 = vpow2.f32 %v3395_v20  ;;  %v1901_v31 = vor.u32 1.1754944e-38, %v1900_v29  ;;  %vm1899_vm10 = vcmp.eq.f32.partialorder %v1898_v42, 8.507059e+37  ;;  %v2040_v7 = vadd.f32 %v4534_v61, %v1991_v50 }
 0x4f0   :  { %v3582_v47 = vpop.eup %3581 }
 0x4f1   :  { %v1888_v35 = vadd.f32 1.0, %v3582_v47  ;;  %v2042_v29 = vrot.slane %v2040_v7, 2 }
 0x4f3   :  { %v3584_v37 = vpop.eup %3583  ;;  %3589 = vrcp.f32 %v1888_v35  ;;  %v1915_v16 = vand.u32 2147483648, %v1888_v35  ;;  %v1913_v21 = vand.u32 2147483647, %v1888_v35  ;;  %vm1909_vm12 = vweird.f32 %v1888_v35 }
 0x4f4   :  { %v3586_v56 = vpop.eup %3585  ;;  %v1890_v17 = vmul.f32 %v3584_v37, %v1887_v28  ;;  %vm1895_vm7 = vweird.f32 %v3584_v37 }
 0x4f5   :  { %v3588_v38 = vpop.eup %3587  ;;  %v2008_v26 = vadd.f32 1.0, %v3586_v56  ;;  %vm1896_vm9 = vmor %vm1894_vm8, %vm1895_vm7  ;;  %v1916_v45 = vor.u32 1.1754944e-38, %v1915_v16  ;;  %vm1914_vm15 = vcmp.eq.f32.partialorder %v1913_v21, 8.507059e+37 }
 0x4f6   :  { %v1891_v19 = vsub.f32 1.0, %v1890_v17  ;;  %v4655_v58 = vadd.f32 1.0, %v3588_v38  ;;  %v1928_v38 = vrot.slane %v4611_v40, 7 }
 0x4f7   :  { %3591 = vrcp.f32 %v2008_v26  ;;  %v2019_v59 = vand.u32 2147483647, %v2008_v26  ;;  %v2021_v20 = vand.u32 2147483648, %v2008_v26  ;;  %vm2015_vm1 = vweird.f32 %v2008_v26 }
 0x4f8   :  { %v1892_v9 = vmul.f32 %v3584_v37, %v1891_v19  ;;  %3593 = vrcp.f32 %v4655_v58  ;;  %vm2030_vm5 = vweird.f32 %v4655_v58 }
 0x4f9   :  { %v3590_v43 = vpop.eup %3589  ;;  %vm2020_vm3 = vcmp.eq.f32.partialorder %v2019_v59, 8.507059e+37 }
 0x4fa   :  { %v1905_v4 = vmul.f32 %v3590_v43, %v1888_v35  ;;  %v1893_v3 = vadd.f32 %v3584_v37, %v1892_v9  ;;  %vm1910_vm11 = vweird.f32 %v3590_v43  ;;  %v2022_v35 = vor.u32 1.1754944e-38, %v2021_v20 }
 0x4fb   :  { %vm1911_vm13 = vmor %vm1909_vm12, %vm1910_vm11 }
 0x4fc   :  { %v1906_v22 = vsub.f32 1.0, %v1905_v4  ;;  %v1897_v1 = vsel %vm1896_vm9, %v3584_v37, %v1893_v3  ;;  %v2036_v4 = vand.u32 2147483648, %v4655_v58 }
 0x4fd   :  { %v3592_v23 = vpop.eup %3591  ;;  %v1902_v25 = vsel %vm1899_vm10, %v1901_v31, %v1897_v1 }
 0x4fe   :  { %v3594_v30 = vpop.eup %3593  ;;  %v1907_v32 = vmul.f32 %v3590_v43, %v1906_v22  ;;  %v1923_v6 = vmul.f32 %v1921_v27, %v1902_v25  ;;  %v2011_v8 = vmul.f32 %v3592_v23, %v2008_v26  ;;  %vm2016_vm14 = vweird.f32 %v3592_v23 }
 0x4ff   :  { %v2026_v51 = vmul.f32 %v3594_v30, %v4655_v58  ;;  %vm2017_vm2 = vmor %vm2015_vm1, %vm2016_vm14  ;;  %vm2031_vm4 = vweird.f32 %v3594_v30  ;;  %v2034_v26 = vand.u32 2147483647, %v4655_v58  ;;  %v2037_v50 = vor.u32 1.1754944e-38, %v2036_v4 }
 0x500   :  { %v1908_v41 = vadd.f32 %v3590_v43, %v1907_v32  ;;  %v1924_v0 = vadd.f32 %v1923_v6, %v4195_v13  ;;  %v2012_v15 = vsub.f32 1.0, %v2011_v8  ;;  %vm2032_vm6 = vmor %vm2030_vm5, %vm2031_vm4  ;;  %v2049_v58 = vrot.slane %v4625_v34, 7 }
 0x501   :  { %v2027_v28 = vsub.f32 1.0, %v2026_v51  ;;  %vm2035_vm7 = vcmp.eq.f32.partialorder %v2034_v26, 8.507059e+37 }
 0x502   :  { %v1912_v47 = vsel %vm1911_vm13, %v3590_v43, %v1908_v41  ;;  %3595 = vtanh.f32 %v1924_v0  ;;  %v2013_v37 = vmul.f32 %v3592_v23, %v2012_v15 }
 0x503   :  { %v2028_v56 = vmul.f32 %v3594_v30, %v2027_v28  ;;  %v1917_v24 = vsel %vm1914_vm15, %v1916_v45, %v1912_v47 }
 0x504   :  { %v2014_v17 = vadd.f32 %v3592_v23, %v2013_v37  ;;  %v1926_v39 = vsub.f32 1.0, %v1917_v24  ;;  %v1930_v22 = vmul.f32 %v1928_v38, %v1917_v24 }
 0x505   :  { %v2029_v42 = vadd.f32 %v3594_v30, %v2028_v56 }
 0x506   :  { %v2018_v19 = vsel %vm2017_vm2, %v3592_v23, %v2014_v17 }
 0x507   :  { %v2023_v9 = vsel %vm2020_vm3, %v2022_v35, %v2018_v19  ;;  %v2033_v1 = vsel %vm2032_vm6, %v3594_v30, %v2029_v42 }
 0x508   :  { %v3596_v43 = vpop.eup %3595  ;;  %v2044_v3 = vmul.f32 %v2042_v29, %v2023_v9  ;;  %v2038_v16 = vsel %vm2035_vm7, %v2037_v50, %v2033_v1 }
 0x509   :  { %v1927_v31 = vmul.f32 %v3596_v43, %v1926_v39  ;;  %v2047_v25 = vsub.f32 1.0, %v2038_v16  ;;  %v2051_v6 = vmul.f32 %v2049_v58, %v2038_v16 }
 0x50a   :  { %v2045_v40 = vadd.f32 %v2044_v3, %v4219_v52 }
 0x50b   :  { %v4667_v27 = vadd.f32 %v1930_v22, %v1927_v31 }
 0x50c   :  { %3597 = vtanh.f32 %v2045_v40 }
 0x50d   :  { %v2058_v23 = vrot.slane %v4667_v27, 6  ;;  %v2176_v19 = vrot.slane %v4667_v27, 7 }
 0x50f   :  { %3396 = vmatmul.msk.f32.vlgmr.msra.gmra.mxu3 %vm163_vm0, %v2058_v23  ;;  %3397 = vmatmul.msk.f32.vlgmr.msra.gmra.mxu0 %vm163_vm0, %v2058_v23 }
 0x510   :  { %3398 = vmatmul.msk.f32.vlgmr.msra.gmra.mxu1 %vm163_vm0, %v2058_v23  ;;  %2359 = vmatpush.msra.mxu3 %v4493_v18 }
 0x511   :  { %2431 = vmatpush.msra.mxu0 %v4457_v46  ;;  %2451 = vmatpush.msra.mxu1 %v4460_v63 }
 0x512   :  { %v3598_v30 = vpop.eup %3597  ;;  %2360 = vmatpush.msra.mxu3 %v4502_v33 }
 0x513   :  { %v2048_v32 = vmul.f32 %v3598_v30, %v2047_v25  ;;  %2432 = vmatpush.msra.mxu0 %v4468_v48  ;;  %2452 = vmatpush.msra.mxu1 %v4471_v49 }
 0x514   :  { %2361 = vmatpush.msra.mxu3 %v4507_v57 }
 0x515   :  { %v4681_v8 = vadd.f32 %v2051_v6, %v2048_v32  ;;  %2433 = vmatpush.msra.mxu0 %v4478_v44  ;;  %2453 = vmatpush.msra.mxu1 %v4481_v53 }
 0x516   :  { %2362 = vmatpush.msra.mxu3 %v4512_v36 }
 0x517   :  { %v2054_v34 = vrot.slane %v4681_v8, 6  ;;  %2434 = vmatpush.msra.mxu0 %v4496_v5  ;;  %2454 = vmatpush.msra.mxu1 %v4499_v55 }
 0x519   :  { %v4690_v21 = vadd.f32 %v2054_v34, %v4634_v54  ;;  %3401 = vmatmul.msk.f32.vlgmr.msra.gmra.mxu2 %vm163_vm0, %v2054_v34  ;;  %3402 = vmatmul.msk.f32.vlgmr.msrb.gmra.mxu3 %vm163_vm0, %v2054_v34 }
 0x51a   :  { %3403 = vmatmul.msk.f32.vlgmr.msrb.gmra.mxu0 %vm163_vm0, %v2054_v34  ;;  %2471 = vmatpush.msra.mxu2 %v4493_v18 }
 0x51b   :  { %2556 = vmatpush.msrb.mxu3 %v4457_v46  ;;  %2576 = vmatpush.msrb.mxu0 %v4460_v63 }
 0x51c   :  { %2472 = vmatpush.msra.mxu2 %v4502_v33 }
 0x51d   :  { %2557 = vmatpush.msrb.mxu3 %v4468_v48  ;;  %2577 = vmatpush.msrb.mxu0 %v4471_v49 }
 0x51e   :  { %2473 = vmatpush.msra.mxu2 %v4507_v57 }
 0x51f   :  { %2558 = vmatpush.msrb.mxu3 %v4478_v44  ;;  %2578 = vmatpush.msrb.mxu0 %v4481_v53 }
 0x520   :  { %2474 = vmatpush.msra.mxu2 %v4512_v36 }
 0x521   :  { %2559 = vmatpush.msrb.mxu3 %v4496_v5  ;;  %2579 = vmatpush.msrb.mxu0 %v4499_v55 }
 0x58c   :  { %v2098_v46 = vpop.f32.mrf.mxu0 }
 0x58d   :  { %v2124_v63 = vrot.slane %v2098_v46, 1  ;;  %v2118_v37 = vpop.f32.mrf.mxu1 }
 0x58e   :  { %v2167_v29 = vadd.f32 %v4529_v10, %v2118_v37 }
 0x58f   :  { %v2128_v18 = vadd.f32 %v2124_v63, %v4178_v11 }
 0x590   :  { %v2169_v27 = vrot.slane %v2167_v29, 1  ;;  %v4751_v29 = vld [vmem:[#allocation8 + $0x20] sm:$0xff] }
 0x591   :  { %v3400_v33 = vmul.f32 -1.442695, %v2128_v18 }
 0x592   :  { %v2078_v48 = vpop.f32.mrf.mxu3 }
 0x593   :  { %3599 = vpow2.f32 %v3400_v33  ;;  %v2123_v49 = vrot.slane %v2078_v48, 1 }
 0x595   :  { %v2127_v57 = vadd.f32 %v2123_v49, %v4171_v2 }
 0x597   :  { %v3399_v54 = vmul.f32 -1.442695, %v2127_v57  ;;  %v2239_v58 = vpop.f32.mrf.mxu0 }
 0x598   :  { %v2288_v46 = vadd.f32 %v4534_v61, %v2239_v58 }
 0x599   :  { %v3600_v44 = vpop.eup %3599  ;;  %3601 = vpow2.f32 %v3399_v54 }
 0x59a   :  { %v2136_v53 = vadd.f32 1.0, %v3600_v44  ;;  %v2290_v44 = vrot.slane %v2288_v46, 1 }
 0x59c   :  { %3603 = vrcp.f32 %v2136_v53  ;;  %v2199_v36 = vpop.f32.mrf.mxu2  ;;  %v2219_v51 = vpop.f32.mrf.mxu3  ;;  %v2161_v56 = vand.u32 2147483647, %v2136_v53  ;;  %v2163_v24 = vand.u32 2147483648, %v2136_v53  ;;  %vm2157_vm9 = vweird.f32 %v2136_v53 }
 0x59d   :  { %v2244_v5 = vrot.slane %v2199_v36, 1  ;;  %v2245_v7 = vrot.slane %v2219_v51, 1 }
 0x59e   :  { %vm2162_vm11 = vcmp.eq.f32.partialorder %v2161_v56, 8.507059e+37  ;;  %v2164_v4 = vor.u32 1.1754944e-38, %v2163_v24 }
 0x59f   :  { %v3602_v55 = vpop.eup %3601  ;;  %v2248_v41 = vadd.f32 %v2244_v5, %v4180_v12  ;;  %v2249_v11 = vadd.f32 %v2245_v7, %v4182_v14 }
 0x5a0   :  { %v2135_v0 = vadd.f32 1.0, %v3602_v55 }
 0x5a1   :  { %v3404_v15 = vmul.f32 -1.442695, %v2248_v41  ;;  %v3405_v45 = vmul.f32 -1.442695, %v2249_v11 }
 0x5a2   :  { %v3604_v28 = vpop.eup %3603  ;;  %3605 = vrcp.f32 %v2135_v0  ;;  %v2148_v43 = vand.u32 2147483648, %v2135_v0  ;;  %v2146_v31 = vand.u32 2147483647, %v2135_v0  ;;  %vm2142_vm13 = vweird.f32 %v2135_v0 }
 0x5a3   :  { %v2153_v2 = vmul.f32 %v3604_v28, %v2136_v53  ;;  %3607 = vpow2.f32 %v3404_v15  ;;  %vm2158_vm8 = vweird.f32 %v3604_v28 }
 0x5a4   :  { %3609 = vpow2.f32 %v3405_v45  ;;  %vm2159_vm10 = vmor %vm2157_vm9, %vm2158_vm8  ;;  %v2149_v1 = vor.u32 1.1754944e-38, %v2148_v43  ;;  %vm2147_vm15 = vcmp.eq.f32.partialorder %v2146_v31, 8.507059e+37 }
 0x5a5   :  { %v2154_v59 = vsub.f32 1.0, %v2153_v2  ;;  %v2297_v2 = vrot.slane %v4681_v8, 7  ;;  %v4730_v8 = vld [vmem:[#allocation8 + $0x48] sm:$0xff] }
 0x5a7   :  { %v2155_v20 = vmul.f32 %v3604_v28, %v2154_v59 }
 0x5a8   :  { %v3606_v47 = vpop.eup %3605 }
 0x5a9   :  { %v3608_v17 = vpop.eup %3607  ;;  %v2138_v35 = vmul.f32 %v3606_v47, %v2135_v0  ;;  %v2156_v12 = vadd.f32 %v3604_v28, %v2155_v20  ;;  %vm2143_vm12 = vweird.f32 %v3606_v47 }
 0x5aa   :  { %v3610_v14 = vpop.eup %3609  ;;  %v2256_v38 = vadd.f32 1.0, %v3608_v17  ;;  %vm2144_vm14 = vmor %vm2142_vm13, %vm2143_vm12  ;;  %v4733_v17 = vld [vmem:[#allocation8 + $0x50] sm:$0xff] }
 0x5ab   :  { %v2139_v39 = vsub.f32 1.0, %v2138_v35  ;;  %v2257_v9 = vadd.f32 1.0, %v3610_v14  ;;  %v2160_v42 = vsel %vm2159_vm10, %v3604_v28, %v2156_v12  ;;  %v4736_v35 = vld [vmem:[#allocation8 + $0x40] sm:$0xff]  ;;  %v4739_v12 = vld [vmem:[#allocation8 + $0x30] sm:$0xff]  ;;  %v4742_v14 = vld [vmem:[#allocation8 + $0x38] sm:$0xff] }
 0x5ac   :  { %3611 = vrcp.f32 %v2256_v38  ;;  %v2165_v26 = vsel %vm2162_vm11, %v2164_v4, %v2160_v42  ;;  %v2269_v63 = vand.u32 2147483648, %v2256_v38  ;;  %v2267_v48 = vand.u32 2147483647, %v2256_v38  ;;  %v4760_v42 = vld [vmem:[#allocation8 + $0x8] sm:$0xff] }
 0x5ad   :  { %v2140_v3 = vmul.f32 %v3606_v47, %v2139_v39  ;;  %3613 = vrcp.f32 %v2257_v9  ;;  %v2178_v40 = vmul.f32 %v2176_v19, %v2165_v26  ;;  %vm2263_vm2 = vweird.f32 %v2256_v38  ;;  %v4748_v19 = vld [vmem:[#allocation8 + $0x18] sm:$0xff]  ;;  %v4754_v39 = vld [vmem:[#allocation8 + $0x10] sm:$0xff] }
 0x5ae   :  { %v2270_v54 = vor.u32 1.1754944e-38, %v2269_v63  ;;  %vm2268_vm4 = vcmp.eq.f32.partialorder %v2267_v48, 8.507059e+37  ;;  %v2284_v7 = vand.u32 2147483648, %v2257_v9  ;;  %vm2278_vm6 = vweird.f32 %v2257_v9  ;;  %v4765_v48 = vld [vmem:[#allocation10] sm:$0x1] }
 0x5af   :  { %v2141_v22 = vadd.f32 %v3606_v47, %v2140_v3  ;;  %v2282_v55 = vand.u32 2147483647, %v2257_v9 }
 0x5b0   :  { %v2285_v45 = vor.u32 1.1754944e-38, %v2284_v7 }
 0x5b1   :  { %v2145_v10 = vsel %vm2144_vm14, %v3606_v47, %v2141_v22  ;;  %vm2283_vm8 = vcmp.eq.f32.partialorder %v2282_v55, 8.507059e+37 }
 0x5b2   :  { %v3612_v50 = vpop.eup %3611  ;;  %v2150_v23 = vsel %vm2147_vm15, %v2149_v1, %v2145_v10 }
 0x5b3   :  { %v3614_v16 = vpop.eup %3613  ;;  %v2259_v25 = vmul.f32 %v3612_v50, %v2256_v38  ;;  %v2171_v30 = vmul.f32 %v2169_v27, %v2150_v23  ;;  %vm2264_vm1 = vweird.f32 %v3612_v50  ;;  %v4745_v38 = vld [vmem:[#allocation8 + $0x28] sm:$0xff] }
 0x5b4   :  { %v2274_v32 = vmul.f32 %v3614_v16, %v2257_v9  ;;  %vm2265_vm3 = vmor %vm2263_vm2, %vm2264_vm1  ;;  %vm2279_vm5 = vweird.f32 %v3614_v16  ;;  %v4757_v9 = vld [vmem:[#allocation8] sm:$0xff] }
 0x5b5   :  { %v2260_v6 = vsub.f32 1.0, %v2259_v25  ;;  %v2172_v34 = vadd.f32 %v2171_v30, %v4195_v13  ;;  %v2174_v13 = vsub.f32 1.0, %v2165_v26  ;;  %vm2280_vm7 = vmor %vm2278_vm6, %vm2279_vm5 }
 0x5b6   :  { %v2275_v18 = vsub.f32 1.0, %v2274_v32 }
 0x5b7   :  { %v2261_v33 = vmul.f32 %v3612_v50, %v2260_v6  ;;  %3615 = vtanh.f32 %v2172_v34 }
 0x5b8   :  { %v2276_v49 = vmul.f32 %v3614_v16, %v2275_v18 }
 0x5b9   :  { %v2262_v57 = vadd.f32 %v3612_v50, %v2261_v33 }
 0x5ba   :  { %v2277_v51 = vadd.f32 %v3614_v16, %v2276_v49 }
 0x5bb   :  { %v2266_v53 = vsel %vm2265_vm3, %v3612_v50, %v2262_v57 }
 0x5bc   :  { %v2271_v36 = vsel %vm2268_vm4, %v2270_v54, %v2266_v53  ;;  %v2281_v0 = vsel %vm2280_vm7, %v3614_v16, %v2277_v51 }
 0x5bd   :  { %v3616_v5 = vpop.eup %3615  ;;  %v2292_v61 = vmul.f32 %v2290_v44, %v2271_v36  ;;  %v2286_v28 = vsel %vm2283_vm8, %v2285_v45, %v2281_v0 }
 0x5be   :  { %v2175_v41 = vmul.f32 %v3616_v5, %v2174_v13  ;;  %v2295_v59 = vsub.f32 1.0, %v2286_v28  ;;  %v2299_v37 = vmul.f32 %v2297_v2, %v2286_v28  ;;  %v4940_v13 = vld [vmem:[#allocation20_spill] sm:$0xff] }
 0x5bf   :  { %v2293_v11 = vadd.f32 %v2292_v61, %v4219_v52  ;;  %v4727_v52 = vld [vmem:[#allocation8 + $0x58] sm:$0xff] }
 0x5c0   :  { %v4716_v15 = vadd.f32 %v2178_v40, %v2175_v41 }
 0x5c1   :  { %3617 = vtanh.f32 %v2293_v11 }
 0x5c7   :  { %v3618_v20 = vpop.eup %3617 }
 0x5c8   :  { %v2296_v47 = vmul.f32 %v3618_v20, %v2295_v59 }
 0x5ca   :  { %v2300_v56 = vadd.f32 %v2299_v37, %v2296_v47 }
 0x5cc   :  { %v4719_v24 = vrot.slane %v2300_v56, 7 }
 0x5ce   :  { %3406 = vmatmul.msk.f32.vlgmr.msrb.gmra.mxu1 %vm163_vm0, %v4719_v24  ;;  %3407 = vmatmul.msk.f32.vlgmr.msrb.gmra.mxu2 %vm163_vm0, %v4719_v24  ;;  %v2304_v2 = vadd.f32 %v4719_v24, %v4690_v21 }
 0x5cf   :  { %3408 = vmatmul.msk.f32.vlgmr.msra.gmra.mxu3 %vm163_vm0, %v4719_v24  ;;  %2596 = vmatpush.msrb.mxu1 %v4727_v52 }
 0x5d0   :  { %2681 = vmatpush.msrb.mxu2 %v4730_v8  ;;  %2701 = vmatpush.msra.mxu3 %v4733_v17 }
 0x5d1   :  { %2597 = vmatpush.msrb.mxu1 %v4736_v35 }
 0x5d2   :  { %2682 = vmatpush.msrb.mxu2 %v4739_v12  ;;  %2702 = vmatpush.msra.mxu3 %v4742_v14 }
 0x5d3   :  { %2598 = vmatpush.msrb.mxu1 %v4745_v38 }
 0x5d4   :  { %2683 = vmatpush.msrb.mxu2 %v4748_v19  ;;  %2703 = vmatpush.msra.mxu3 %v4751_v29 }
 0x5d5   :  { %2599 = vmatpush.msrb.mxu1 %v4754_v39 }
 0x5d6   :  { %2684 = vmatpush.msrb.mxu2 %v4757_v9  ;;  %2704 = vmatpush.msra.mxu3 %v4760_v42 }
 0x64b   :  { %v2324_v43 = vpop.f32.mrf.mxu1 }
 0x64c   :  { %v2367_v4 = vadd.f32 %v2324_v43, %v4166_v60 }
 0x64e   :  { %v3409_v3 = vmul.f32 -1.442695, %v2367_v4 }
 0x650   :  { %3619 = vpow2.f32 %v3409_v3 }
 0x651   :  { %v2344_v31 = vpop.f32.mrf.mxu2 }
 0x652   :  { %v2368_v26 = vadd.f32 %v2344_v31, %v4168_v62  ;;  %v2364_v6 = vpop.f32.mrf.mxu3 }
 0x653   :  { %v2407_v49 = vadd.f32 %v4765_v48, %v2364_v6 }
 0x654   :  { %v3410_v22 = vmul.f32 -1.442695, %v2368_v26 }
 0x656   :  { %v3620_v40 = vpop.eup %3619  ;;  %3621 = vpow2.f32 %v3410_v22 }
 0x657   :  { %v2375_v1 = vadd.f32 1.0, %v3620_v40 }
 0x659   :  { %3623 = vrcp.f32 %v2375_v1  ;;  %v2388_v58 = vand.u32 2147483648, %v2375_v1  ;;  %v2386_v30 = vand.u32 2147483647, %v2375_v1  ;;  %vm2382_vm10 = vweird.f32 %v2375_v1 }
 0x65b   :  { %v2389_v63 = vor.u32 1.1754944e-38, %v2388_v58  ;;  %vm2387_vm12 = vcmp.eq.f32.partialorder %v2386_v30, 8.507059e+37 }
 0x65c   :  { %v3622_v27 = vpop.eup %3621 }
 0x65d   :  { %v2376_v10 = vadd.f32 1.0, %v3622_v27 }
 0x65f   :  { %v3624_v50 = vpop.eup %3623  ;;  %3625 = vrcp.f32 %v2376_v10  ;;  %v2403_v44 = vand.u32 2147483648, %v2376_v10  ;;  %v2401_v36 = vand.u32 2147483647, %v2376_v10  ;;  %vm2397_vm14 = vweird.f32 %v2376_v10 }
 0x660   :  { %v2378_v23 = vmul.f32 %v3624_v50, %v2375_v1  ;;  %vm2383_vm9 = vweird.f32 %v3624_v50 }
 0x661   :  { %vm2384_vm11 = vmor %vm2382_vm10, %vm2383_vm9  ;;  %v2404_v61 = vor.u32 1.1754944e-38, %v2403_v44  ;;  %vm2402_vm1 = vcmp.eq.f32.partialorder %v2401_v36, 8.507059e+37 }
 0x662   :  { %v2379_v16 = vsub.f32 1.0, %v2378_v23 }
 0x664   :  { %v2380_v25 = vmul.f32 %v3624_v50, %v2379_v16 }
 0x665   :  { %v3626_v32 = vpop.eup %3625 }
 0x666   :  { %v2393_v34 = vmul.f32 %v3626_v32, %v2376_v10  ;;  %v2381_v46 = vadd.f32 %v3624_v50, %v2380_v25  ;;  %vm2398_vm13 = vweird.f32 %v3626_v32 }
 0x667   :  { %vm2399_vm15 = vmor %vm2397_vm14, %vm2398_vm13 }
 0x668   :  { %v2394_v18 = vsub.f32 1.0, %v2393_v34  ;;  %v2385_v33 = vsel %vm2384_vm11, %v3624_v50, %v2381_v46 }
 0x669   :  { %v2390_v57 = vsel %vm2387_vm12, %v2389_v63, %v2385_v33 }
 0x66a   :  { %v2395_v54 = vmul.f32 %v3626_v32, %v2394_v18  ;;  %v2408_v53 = vmul.f32 %v2407_v49, %v2390_v57 }
 0x66c   :  { %v2396_v51 = vadd.f32 %v3626_v32, %v2395_v54  ;;  %v2409_v5 = vadd.f32 %v2408_v53, %v4940_v13 }
 0x66e   :  { %v2400_v7 = vsel %vm2399_vm15, %v3626_v32, %v2396_v51  ;;  %3627 = vtanh.f32 %v2409_v5 }
 0x66f   :  { %v2405_v55 = vsel %vm2402_vm1, %v2404_v61, %v2400_v7 }
 0x670   :  { %v2411_v41 = vsub.f32 1.0, %v2405_v55  ;;  %v2413_v45 = vmul.f32 %v2405_v55, %v4719_v24 }
 0x674   :  { %v3628_v11 = vpop.eup %3627 }
 0x675   :  { %v2412_v0 = vmul.f32 %v3628_v11, %v2411_v41 }
 0x677   :  { %v4770_v28 = vadd.f32 %v2413_v45, %v2412_v0 }
 0x679   :  { %3411 = vmatmul.msk.f32.vlgmr.msra.gmra.mxu0 %vm163_vm0, %v4770_v28  ;;  %3412 = vmatmul.msk.f32.vlgmr.msra.gmra.mxu1 %vm163_vm0, %v4770_v28  ;;  %v4779_v59 = vadd.f32 %v4770_v28, %v2304_v2  ;;  %v2534_v7 = vrot.slane %v4770_v28, 7 }
 0x67a   :  { %3413 = vmatmul.msk.f32.vlgmr.msra.gmra.mxu2 %vm163_vm0, %v4770_v28  ;;  %2721 = vmatpush.msra.mxu0 %v4727_v52 }
 0x67b   :  { %2806 = vmatpush.msra.mxu1 %v4730_v8  ;;  %2826 = vmatpush.msra.mxu2 %v4733_v17 }
 0x67c   :  { %2722 = vmatpush.msra.mxu0 %v4736_v35 }
 0x67d   :  { %2807 = vmatpush.msra.mxu1 %v4739_v12  ;;  %2827 = vmatpush.msra.mxu2 %v4742_v14 }
 0x67e   :  { %2723 = vmatpush.msra.mxu0 %v4745_v38 }
 0x67f   :  { %2808 = vmatpush.msra.mxu1 %v4748_v19  ;;  %2828 = vmatpush.msra.mxu2 %v4751_v29 }
 0x680   :  { %2724 = vmatpush.msra.mxu0 %v4754_v39 }
 0x681   :  { %2809 = vmatpush.msra.mxu1 %v4757_v9  ;;  %2829 = vmatpush.msra.mxu2 %v4760_v42 }
 0x6f6   :  { %v2436_v21 = vpop.f32.mrf.mxu0  ;;  %v2456_v20 = vpop.f32.mrf.mxu1 }
 0x6f7   :  { %v2481_v47 = vrot.slane %v2436_v21, 7  ;;  %v2482_v37 = vrot.slane %v2456_v20, 7 }
 0x6f9   :  { %v2485_v56 = vadd.f32 %v2481_v47, %v4166_v60  ;;  %v2486_v24 = vadd.f32 %v2482_v37, %v4168_v62 }
 0x6fb   :  { %v3414_v43 = vmul.f32 -1.442695, %v2485_v56  ;;  %v3415_v4 = vmul.f32 -1.442695, %v2486_v24 }
 0x6fd   :  { %3629 = vpow2.f32 %v3414_v43  ;;  %v2476_v50 = vpop.f32.mrf.mxu2 }
 0x6fe   :  { %3631 = vpow2.f32 %v3415_v4  ;;  %v2525_v32 = vadd.f32 %v4765_v48, %v2476_v50 }
 0x700   :  { %v2527_v18 = vrot.slane %v2525_v32, 7 }
 0x703   :  { %v3630_v3 = vpop.eup %3629 }
 0x704   :  { %v3632_v31 = vpop.eup %3631  ;;  %v2493_v26 = vadd.f32 1.0, %v3630_v3 }
 0x705   :  { %v2494_v22 = vadd.f32 1.0, %v3632_v31 }
 0x706   :  { %3633 = vrcp.f32 %v2493_v26  ;;  %v2506_v58 = vand.u32 2147483648, %v2493_v26  ;;  %v2504_v30 = vand.u32 2147483647, %v2493_v26  ;;  %vm2500_vm3 = vweird.f32 %v2493_v26 }
 0x707   :  { %3635 = vrcp.f32 %v2494_v22  ;;  %v2521_v57 = vand.u32 2147483648, %v2494_v22  ;;  %vm2515_vm7 = vweird.f32 %v2494_v22  ;;  %v2519_v44 = vand.u32 2147483647, %v2494_v22 }
 0x708   :  { %v2507_v46 = vor.u32 1.1754944e-38, %v2506_v58  ;;  %vm2505_vm5 = vcmp.eq.f32.partialorder %v2504_v30, 8.507059e+37 }
 0x709   :  { %v2522_v51 = vor.u32 1.1754944e-38, %v2521_v57  ;;  %vm2520_vm9 = vcmp.eq.f32.partialorder %v2519_v44, 8.507059e+37 }
 0x70c   :  { %v3634_v40 = vpop.eup %3633 }
 0x70d   :  { %v3636_v1 = vpop.eup %3635  ;;  %v2496_v27 = vmul.f32 %v3634_v40, %v2493_v26  ;;  %vm2501_vm2 = vweird.f32 %v3634_v40 }
 0x70e   :  { %v2511_v10 = vmul.f32 %v3636_v1, %v2494_v22  ;;  %vm2502_vm4 = vmor %vm2500_vm3, %vm2501_vm2  ;;  %vm2516_vm6 = vweird.f32 %v3636_v1 }
 0x70f   :  { %v2497_v23 = vsub.f32 1.0, %v2496_v27  ;;  %vm2517_vm8 = vmor %vm2515_vm7, %vm2516_vm6 }
 0x710   :  { %v2512_v16 = vsub.f32 1.0, %v2511_v10 }
 0x711   :  { %v2498_v25 = vmul.f32 %v3634_v40, %v2497_v23 }
 0x712   :  { %v2513_v6 = vmul.f32 %v3636_v1, %v2512_v16 }
 0x713   :  { %v2499_v34 = vadd.f32 %v3634_v40, %v2498_v25 }
 0x714   :  { %v2514_v49 = vadd.f32 %v3636_v1, %v2513_v6 }
 0x715   :  { %v2503_v63 = vsel %vm2502_vm4, %v3634_v40, %v2499_v34 }
 0x716   :  { %v2508_v33 = vsel %vm2505_vm5, %v2507_v46, %v2503_v63  ;;  %v2518_v36 = vsel %vm2517_vm8, %v3636_v1, %v2514_v49 }
 0x717   :  { %v2529_v54 = vmul.f32 %v2527_v18, %v2508_v33  ;;  %v2523_v5 = vsel %vm2520_vm9, %v2522_v51, %v2518_v36 }
 0x718   :  { %v2532_v61 = vsub.f32 1.0, %v2523_v5  ;;  %v2536_v11 = vmul.f32 %v2534_v7, %v2523_v5 }
 0x719   :  { %v2530_v53 = vadd.f32 %v2529_v54, %v4940_v13 }
 0x71b   :  { %3637 = vtanh.f32 %v2530_v53 }
 0x721   :  { %v3638_v55 = vpop.eup %3637 }
 0x722   :  { %v2533_v41 = vmul.f32 %v3638_v55, %v2532_v61 }
 0x724   :  { %v4800_v0 = vadd.f32 %v2536_v11, %v2533_v41 }
 0x726   :  { %v2539_v45 = vrot.slane %v4800_v0, 1  ;;  %v2659_v51 = vrot.slane %v4800_v0, 7 }
 0x728   :  { %3416 = vmatmul.msk.f32.vlgmr.msrb.gmra.mxu3 %vm163_vm0, %v2539_v45  ;;  %3417 = vmatmul.msk.f32.vlgmr.msrb.gmra.mxu0 %vm163_vm0, %v2539_v45  ;;  %v4806_v2 = vadd.f32 %v2539_v45, %v4779_v59 }
 0x729   :  { %3418 = vmatmul.msk.f32.vlgmr.msrb.gmra.mxu1 %vm163_vm0, %v2539_v45  ;;  %2846 = vmatpush.msrb.mxu3 %v4727_v52 }
 0x72a   :  { %2931 = vmatpush.msrb.mxu0 %v4730_v8  ;;  %2951 = vmatpush.msrb.mxu1 %v4733_v17 }
 0x72b   :  { %2847 = vmatpush.msrb.mxu3 %v4736_v35 }
 0x72c   :  { %2932 = vmatpush.msrb.mxu0 %v4739_v12  ;;  %2952 = vmatpush.msrb.mxu1 %v4742_v14 }
 0x72d   :  { %2848 = vmatpush.msrb.mxu3 %v4745_v38 }
 0x72e   :  { %2933 = vmatpush.msrb.mxu0 %v4748_v19  ;;  %2953 = vmatpush.msrb.mxu1 %v4751_v29 }
 0x72f   :  { %2849 = vmatpush.msrb.mxu3 %v4754_v39 }
 0x730   :  { %2934 = vmatpush.msrb.mxu0 %v4757_v9  ;;  %2954 = vmatpush.msrb.mxu1 %v4760_v42 }
 0x7a5   :  { %v2581_v28 = vpop.f32.mrf.mxu0 }
 0x7a6   :  { %v2607_v59 = vrot.slane %v2581_v28, 6  ;;  %v2601_v10 = vpop.f32.mrf.mxu1 }
 0x7a7   :  { %v2650_v16 = vadd.f32 %v4765_v48, %v2601_v10 }
 0x7a8   :  { %v2611_v21 = vadd.f32 %v2607_v59, %v4168_v62 }
 0x7a9   :  { %v2652_v34 = vrot.slane %v2650_v16, 6 }
 0x7aa   :  { %v3420_v20 = vmul.f32 -1.442695, %v2611_v21 }
 0x7ab   :  { %v2561_v47 = vpop.f32.mrf.mxu3 }
 0x7ac   :  { %3639 = vpow2.f32 %v3420_v20  ;;  %v2606_v37 = vrot.slane %v2561_v47, 6 }
 0x7ae   :  { %v2610_v56 = vadd.f32 %v2606_v37, %v4166_v60 }
 0x7b0   :  { %v3419_v24 = vmul.f32 -1.442695, %v2610_v56 }
 0x7b2   :  { %v3640_v43 = vpop.eup %3639  ;;  %3641 = vpow2.f32 %v3419_v24 }
 0x7b3   :  { %v2619_v4 = vadd.f32 1.0, %v3640_v43 }
 0x7b5   :  { %3643 = vrcp.f32 %v2619_v4  ;;  %v2646_v33 = vand.u32 2147483648, %v2619_v4  ;;  %vm2640_vm15 = vweird.f32 %v2619_v4  ;;  %v2644_v57 = vand.u32 2147483647, %v2619_v4 }
 0x7b7   :  { %v2647_v53 = vor.u32 1.1754944e-38, %v2646_v33  ;;  %vm2645_vm2 = vcmp.eq.f32.partialorder %v2644_v57, 8.507059e+37 }
 0x7b8   :  { %v3642_v3 = vpop.eup %3641 }
 0x7b9   :  { %v2618_v31 = vadd.f32 1.0, %v3642_v3 }
 0x7bb   :  { %3645 = vrcp.f32 %v2618_v31  ;;  %v3644_v26 = vpop.eup %3643  ;;  %v2631_v23 = vand.u32 2147483648, %v2618_v31  ;;  %v2629_v25 = vand.u32 2147483647, %v2618_v31  ;;  %vm2625_vm11 = vweird.f32 %v2618_v31 }
 0x7bc   :  { %v2636_v22 = vmul.f32 %v3644_v26, %v2619_v4  ;;  %vm2641_vm14 = vweird.f32 %v3644_v26 }
 0x7bd   :  { %v2632_v6 = vor.u32 1.1754944e-38, %v2631_v23  ;;  %vm2630_vm13 = vcmp.eq.f32.partialorder %v2629_v25, 8.507059e+37  ;;  %vm2642_vm1 = vmor %vm2640_vm15, %vm2641_vm14 }
 0x7be   :  { %v2637_v27 = vsub.f32 1.0, %v2636_v22 }
 0x7c0   :  { %v2638_v30 = vmul.f32 %v3644_v26, %v2637_v27 }
 0x7c1   :  { %v3646_v40 = vpop.eup %3645 }
 0x7c2   :  { %v2621_v1 = vmul.f32 %v3646_v40, %v2618_v31  ;;  %vm2626_vm10 = vweird.f32 %v3646_v40  ;;  %v2639_v63 = vadd.f32 %v3644_v26, %v2638_v30 }
 0x7c3   :  { %vm2627_vm12 = vmor %vm2625_vm11, %vm2626_vm10 }
 0x7c4   :  { %v2622_v50 = vsub.f32 1.0, %v2621_v1  ;;  %v2643_v44 = vsel %vm2642_vm1, %v3644_v26, %v2639_v63 }
 0x7c5   :  { %v2648_v36 = vsel %vm2645_vm2, %v2647_v53, %v2643_v44 }
 0x7c6   :  { %v2623_v58 = vmul.f32 %v3646_v40, %v2622_v50  ;;  %v2657_v5 = vsub.f32 1.0, %v2648_v36  ;;  %v2661_v55 = vmul.f32 %v2659_v51, %v2648_v36 }
 0x7c8   :  { %v2624_v32 = vadd.f32 %v3646_v40, %v2623_v58 }
 0x7ca   :  { %v2628_v46 = vsel %vm2627_vm12, %v3646_v40, %v2624_v32 }
 0x7cb   :  { %v2633_v18 = vsel %vm2630_vm13, %v2632_v6, %v2628_v46 }
 0x7cc   :  { %v2654_v49 = vmul.f32 %v2652_v34, %v2633_v18 }
 0x7ce   :  { %v2655_v54 = vadd.f32 %v2654_v49, %v4940_v13 }
 0x7d0   :  { %3647 = vtanh.f32 %v2655_v54 }
 0x7d6   :  { %v3648_v61 = vpop.eup %3647 }
 0x7d7   :  { %v2658_v7 = vmul.f32 %v3648_v61, %v2657_v5 }
 0x7d9   :  { %v4826_v41 = vadd.f32 %v2661_v55, %v2658_v7 }
 0x7db   :  { %v2664_v11 = vrot.slane %v4826_v41, 2  ;;  %v2784_v53 = vrot.slane %v4826_v41, 7 }
 0x7dd   :  { %3421 = vmatmul.msk.f32.vlgmr.msrb.gmra.mxu2 %vm163_vm0, %v2664_v11  ;;  %3422 = vmatmul.msk.f32.vlgmr.msra.gmra.mxu3 %vm163_vm0, %v2664_v11  ;;  %v4832_v45 = vadd.f32 %v2664_v11, %v4806_v2 }
 0x7de   :  { %3423 = vmatmul.msk.f32.vlgmr.msra.gmra.mxu0 %vm163_vm0, %v2664_v11  ;;  %2971 = vmatpush.msrb.mxu2 %v4727_v52 }
 0x7df   :  { %3056 = vmatpush.msra.mxu3 %v4730_v8  ;;  %3076 = vmatpush.msra.mxu0 %v4733_v17 }
 0x7e0   :  { %2972 = vmatpush.msrb.mxu2 %v4736_v35 }
 0x7e1   :  { %3057 = vmatpush.msra.mxu3 %v4739_v12  ;;  %3077 = vmatpush.msra.mxu0 %v4742_v14 }
 0x7e2   :  { %2973 = vmatpush.msrb.mxu2 %v4745_v38 }
 0x7e3   :  { %3058 = vmatpush.msra.mxu3 %v4748_v19  ;;  %3078 = vmatpush.msra.mxu0 %v4751_v29 }
 0x7e4   :  { %2974 = vmatpush.msrb.mxu2 %v4754_v39 }
 0x7e5   :  { %3059 = vmatpush.msra.mxu3 %v4757_v9  ;;  %3079 = vmatpush.msra.mxu0 %v4760_v42 }
 0x85b   :  { %v2726_v22 = vpop.f32.mrf.mxu0 }
 0x85c   :  { %v2775_v50 = vadd.f32 %v4765_v48, %v2726_v22 }
 0x85e   :  { %v2777_v32 = vrot.slane %v2775_v50, 5 }
 0x860   :  { %v2686_v0 = vpop.f32.mrf.mxu2  ;;  %v2706_v2 = vpop.f32.mrf.mxu3 }
 0x861   :  { %v2731_v28 = vrot.slane %v2686_v0, 5  ;;  %v2732_v59 = vrot.slane %v2706_v2, 5 }
 0x863   :  { %v2735_v21 = vadd.f32 %v2731_v28, %v4166_v60  ;;  %v2736_v20 = vadd.f32 %v2732_v59, %v4168_v62 }
 0x865   :  { %v3424_v47 = vmul.f32 -1.442695, %v2735_v21  ;;  %v3425_v37 = vmul.f32 -1.442695, %v2736_v20 }
 0x867   :  { %3649 = vpow2.f32 %v3424_v47 }
 0x868   :  { %3651 = vpow2.f32 %v3425_v37 }
 0x86d   :  { %v3650_v56 = vpop.eup %3649 }
 0x86e   :  { %v3652_v24 = vpop.eup %3651  ;;  %v2743_v43 = vadd.f32 1.0, %v3650_v56 }
 0x86f   :  { %v2744_v4 = vadd.f32 1.0, %v3652_v24 }
 0x870   :  { %3653 = vrcp.f32 %v2743_v43  ;;  %v2756_v27 = vand.u32 2147483648, %v2743_v43  ;;  %v2754_v16 = vand.u32 2147483647, %v2743_v43  ;;  %vm2750_vm4 = vweird.f32 %v2743_v43 }
 0x871   :  { %3655 = vrcp.f32 %v2744_v4  ;;  %v2771_v18 = vand.u32 2147483648, %v2744_v4  ;;  %vm2765_vm8 = vweird.f32 %v2744_v4  ;;  %v2769_v33 = vand.u32 2147483647, %v2744_v4 }
 0x872   :  { %v2757_v30 = vor.u32 1.1754944e-38, %v2756_v27  ;;  %vm2755_vm6 = vcmp.eq.f32.partialorder %v2754_v16, 8.507059e+37 }
 0x873   :  { %v2772_v54 = vor.u32 1.1754944e-38, %v2771_v18  ;;  %vm2770_vm10 = vcmp.eq.f32.partialorder %v2769_v33, 8.507059e+37 }
 0x876   :  { %v3654_v3 = vpop.eup %3653 }
 0x877   :  { %v3656_v31 = vpop.eup %3655  ;;  %v2746_v26 = vmul.f32 %v3654_v3, %v2743_v43  ;;  %vm2751_vm3 = vweird.f32 %v3654_v3 }
 0x878   :  { %v2761_v40 = vmul.f32 %v3656_v31, %v2744_v4  ;;  %vm2752_vm5 = vmor %vm2750_vm4, %vm2751_vm3  ;;  %vm2766_vm7 = vweird.f32 %v3656_v31 }
 0x879   :  { %v2747_v1 = vsub.f32 1.0, %v2746_v26  ;;  %vm2767_vm9 = vmor %vm2765_vm8, %vm2766_vm7 }
 0x87a   :  { %v2762_v10 = vsub.f32 1.0, %v2761_v40 }
 0x87b   :  { %v2748_v23 = vmul.f32 %v3654_v3, %v2747_v1 }
 0x87c   :  { %v2763_v58 = vmul.f32 %v3656_v31, %v2762_v10 }
 0x87d   :  { %v2749_v25 = vadd.f32 %v3654_v3, %v2748_v23 }
 0x87e   :  { %v2764_v46 = vadd.f32 %v3656_v31, %v2763_v58 }
 0x87f   :  { %v2753_v6 = vsel %vm2752_vm5, %v3654_v3, %v2749_v25 }
 0x880   :  { %v2758_v34 = vsel %vm2755_vm6, %v2757_v30, %v2753_v6  ;;  %v2768_v57 = vsel %vm2767_vm9, %v3656_v31, %v2764_v46 }
 0x881   :  { %v2779_v63 = vmul.f32 %v2777_v32, %v2758_v34  ;;  %v2773_v44 = vsel %vm2770_vm10, %v2772_v54, %v2768_v57 }
 0x882   :  { %v2782_v36 = vsub.f32 1.0, %v2773_v44  ;;  %v2786_v61 = vmul.f32 %v2784_v53, %v2773_v44 }
 0x883   :  { %v2780_v49 = vadd.f32 %v2779_v63, %v4940_v13 }
 0x885   :  { %3657 = vtanh.f32 %v2780_v49 }
 0x88b   :  { %v3658_v51 = vpop.eup %3657 }
 0x88c   :  { %v2783_v5 = vmul.f32 %v3658_v51, %v2782_v36 }
 0x88e   :  { %v4852_v7 = vadd.f32 %v2786_v61, %v2783_v5 }
 0x890   :  { %v2789_v55 = vrot.slane %v4852_v7, 3  ;;  %v2909_v6 = vrot.slane %v4852_v7, 7 }
 0x892   :  { %3426 = vmatmul.msk.f32.vlgmr.msra.gmra.mxu1 %vm163_vm0, %v2789_v55  ;;  %3427 = vmatmul.msk.f32.vlgmr.msra.gmra.mxu2 %vm163_vm0, %v2789_v55  ;;  %v4858_v11 = vadd.f32 %v2789_v55, %v4832_v45 }
 0x893   :  { %3428 = vmatmul.msk.f32.vlgmr.msrb.gmra.mxu3 %vm163_vm0, %v2789_v55  ;;  %3096 = vmatpush.msra.mxu1 %v4727_v52 }
 0x894   :  { %3181 = vmatpush.msra.mxu2 %v4730_v8  ;;  %3201 = vmatpush.msrb.mxu3 %v4733_v17 }
 0x895   :  { %3097 = vmatpush.msra.mxu1 %v4736_v35 }
 0x896   :  { %3182 = vmatpush.msra.mxu2 %v4739_v12  ;;  %3202 = vmatpush.msrb.mxu3 %v4742_v14 }
 0x897   :  { %3098 = vmatpush.msra.mxu1 %v4745_v38 }
 0x898   :  { %3183 = vmatpush.msra.mxu2 %v4748_v19  ;;  %3203 = vmatpush.msrb.mxu3 %v4751_v29 }
 0x899   :  { %3099 = vmatpush.msra.mxu1 %v4754_v39 }
 0x89a   :  { %3184 = vmatpush.msra.mxu2 %v4757_v9  ;;  %3204 = vmatpush.msrb.mxu3 %v4760_v42 }
 0x90f   :  { %v2811_v8 = vpop.f32.mrf.mxu1 }
 0x910   :  { %v2856_v17 = vrot.slane %v2811_v8, 4 }
 0x912   :  { %v2860_v41 = vadd.f32 %v2856_v17, %v4166_v60 }
 0x914   :  { %v3429_v45 = vmul.f32 -1.442695, %v2860_v41 }
 0x915   :  { %v2831_v12 = vpop.f32.mrf.mxu2 }
 0x916   :  { %3659 = vpow2.f32 %v3429_v45  ;;  %v2857_v14 = vrot.slane %v2831_v12, 4  ;;  %v2851_v21 = vpop.f32.mrf.mxu3 }
 0x917   :  { %v2900_v24 = vadd.f32 %v4765_v48, %v2851_v21 }
 0x918   :  { %v2861_v0 = vadd.f32 %v2857_v14, %v4168_v62 }
 0x919   :  { %v2902_v40 = vrot.slane %v2900_v24, 4 }
 0x91a   :  { %v3430_v2 = vmul.f32 -1.442695, %v2861_v0 }
 0x91c   :  { %v3660_v19 = vpop.eup %3659  ;;  %3661 = vpow2.f32 %v3430_v2 }
 0x91d   :  { %v2868_v29 = vadd.f32 1.0, %v3660_v19 }
 0x91f   :  { %3663 = vrcp.f32 %v2868_v29  ;;  %v2881_v47 = vand.u32 2147483648, %v2868_v29  ;;  %v2879_v56 = vand.u32 2147483647, %v2868_v29  ;;  %vm2875_vm12 = vweird.f32 %v2868_v29 }
 0x921   :  { %v2882_v31 = vor.u32 1.1754944e-38, %v2881_v47  ;;  %vm2880_vm14 = vcmp.eq.f32.partialorder %v2879_v56, 8.507059e+37 }
 0x922   :  { %v3662_v28 = vpop.eup %3661 }
 0x923   :  { %v2869_v59 = vadd.f32 1.0, %v3662_v28 }
 0x925   :  { %v3664_v9 = vpop.eup %3663  ;;  %3665 = vrcp.f32 %v2869_v59  ;;  %v2896_v10 = vand.u32 2147483648, %v2869_v59  ;;  %v2894_v23 = vand.u32 2147483647, %v2869_v59  ;;  %vm2890_vm1 = vweird.f32 %v2869_v59 }
 0x926   :  { %v2871_v42 = vmul.f32 %v3664_v9, %v2868_v29  ;;  %vm2876_vm11 = vweird.f32 %v3664_v9 }
 0x927   :  { %vm2877_vm13 = vmor %vm2875_vm12, %vm2876_vm11  ;;  %v2897_v25 = vor.u32 1.1754944e-38, %v2896_v10  ;;  %vm2895_vm3 = vcmp.eq.f32.partialorder %v2894_v23, 8.507059e+37 }
 0x928   :  { %v2872_v20 = vsub.f32 1.0, %v2871_v42 }
 0x92a   :  { %v2873_v37 = vmul.f32 %v3664_v9, %v2872_v20 }
 0x92b   :  { %v3666_v43 = vpop.eup %3665 }
 0x92c   :  { %v2886_v4 = vmul.f32 %v3666_v43, %v2869_v59  ;;  %v2874_v3 = vadd.f32 %v3664_v9, %v2873_v37  ;;  %vm2891_vm15 = vweird.f32 %v3666_v43 }
 0x92d   :  { %vm2892_vm2 = vmor %vm2890_vm1, %vm2891_vm15 }
 0x92e   :  { %v2887_v26 = vsub.f32 1.0, %v2886_v4  ;;  %v2878_v22 = vsel %vm2877_vm13, %v3664_v9, %v2874_v3 }
 0x92f   :  { %v2883_v1 = vsel %vm2880_vm14, %v2882_v31, %v2878_v22 }
 0x930   :  { %v2888_v27 = vmul.f32 %v3666_v43, %v2887_v26  ;;  %v2904_v50 = vmul.f32 %v2902_v40, %v2883_v1 }
 0x932   :  { %v2889_v16 = vadd.f32 %v3666_v43, %v2888_v27  ;;  %v2905_v58 = vadd.f32 %v2904_v50, %v4940_v13 }
 0x934   :  { %v2893_v30 = vsel %vm2892_vm2, %v3666_v43, %v2889_v16  ;;  %3667 = vtanh.f32 %v2905_v58 }
 0x935   :  { %v2898_v32 = vsel %vm2895_vm3, %v2897_v25, %v2893_v30 }
 0x936   :  { %v2907_v34 = vsub.f32 1.0, %v2898_v32  ;;  %v2911_v18 = vmul.f32 %v2909_v6, %v2898_v32 }
 0x93a   :  { %v3668_v46 = vpop.eup %3667 }
 0x93b   :  { %v2908_v63 = vmul.f32 %v3668_v46, %v2907_v34 }
 0x93d   :  { %v4878_v33 = vadd.f32 %v2911_v18, %v2908_v63 }
 0x93f   :  { %v2914_v49 = vrot.slane %v4878_v33, 4  ;;  %v3034_v31 = vrot.slane %v4878_v33, 7 }
 0x941   :  { %3431 = vmatmul.msk.f32.vlgmr.msrb.gmra.mxu0 %vm163_vm0, %v2914_v49  ;;  %3432 = vmatmul.msk.f32.vlgmr.msrb.gmra.mxu1 %vm163_vm0, %v2914_v49  ;;  %v4884_v57 = vadd.f32 %v2914_v49, %v4858_v11 }
 0x942   :  { %3433 = vmatmul.msk.f32.vlgmr.msrb.gmra.mxu2 %vm163_vm0, %v2914_v49  ;;  %3221 = vmatpush.msrb.mxu0 %v4727_v52 }
 0x944   :  { %3222 = vmatpush.msrb.mxu0 %v4736_v35 }
 0x946   :  { %3223 = vmatpush.msrb.mxu0 %v4745_v38 }
 0x948   :  { %3224 = vmatpush.msrb.mxu0 %v4754_v39 }
 0x9be   :  { %v2936_v54 = vpop.f32.mrf.mxu0  ;;  %v2956_v44 = vpop.f32.mrf.mxu1 }
 0x9bf   :  { %v2981_v53 = vrot.slane %v2936_v54, 3  ;;  %v2982_v36 = vrot.slane %v2956_v44, 3 }
 0x9c1   :  { %v2985_v51 = vadd.f32 %v2981_v53, %v4166_v60  ;;  %v2986_v5 = vadd.f32 %v2982_v36, %v4168_v62 }
 0x9c3   :  { %v3434_v61 = vmul.f32 -1.442695, %v2985_v51  ;;  %v3435_v7 = vmul.f32 -1.442695, %v2986_v5 }
 0x9c5   :  { %3669 = vpow2.f32 %v3434_v61  ;;  %v2976_v41 = vpop.f32.mrf.mxu2 }
 0x9c6   :  { %3671 = vpow2.f32 %v3435_v7  ;;  %v3025_v19 = vadd.f32 %v4765_v48, %v2976_v41 }
 0x9c8   :  { %v3027_v42 = vrot.slane %v3025_v19, 3 }
 0x9cb   :  { %v3670_v55 = vpop.eup %3669 }
 0x9cc   :  { %v3672_v52 = vpop.eup %3671  ;;  %v2993_v11 = vadd.f32 1.0, %v3670_v55 }
 0x9cd   :  { %v2994_v35 = vadd.f32 1.0, %v3672_v52 }
 0x9ce   :  { %3673 = vrcp.f32 %v2993_v11  ;;  %v3006_v14 = vand.u32 2147483648, %v2993_v11  ;;  %v3004_v2 = vand.u32 2147483647, %v2993_v11  ;;  %vm3000_vm5 = vweird.f32 %v2993_v11 }
 0x9cf   :  { %3675 = vrcp.f32 %v2994_v35  ;;  %v3021_v47 = vand.u32 2147483648, %v2994_v35  ;;  %vm3015_vm9 = vweird.f32 %v2994_v35  ;;  %v3019_v56 = vand.u32 2147483647, %v2994_v35 }
 0x9d0   :  { %v3007_v59 = vor.u32 1.1754944e-38, %v3006_v14  ;;  %vm3005_vm7 = vcmp.eq.f32.partialorder %v3004_v2, 8.507059e+37 }
 0x9d1   :  { %v3022_v4 = vor.u32 1.1754944e-38, %v3021_v47  ;;  %vm3020_vm11 = vcmp.eq.f32.partialorder %v3019_v56, 8.507059e+37 }
 0x9d4   :  { %v3674_v38 = vpop.eup %3673 }
 0x9d5   :  { %v3676_v39 = vpop.eup %3675  ;;  %v2996_v8 = vmul.f32 %v3674_v38, %v2993_v11  ;;  %vm3001_vm4 = vweird.f32 %v3674_v38 }
 0x9d6   :  { %v3011_v17 = vmul.f32 %v3676_v39, %v2994_v35  ;;  %vm3002_vm6 = vmor %vm3000_vm5, %vm3001_vm4  ;;  %vm3016_vm8 = vweird.f32 %v3676_v39 }
 0x9d7   :  { %v2997_v45 = vsub.f32 1.0, %v2996_v8  ;;  %vm3017_vm10 = vmor %vm3015_vm9, %vm3016_vm8 }
 0x9d8   :  { %v3012_v12 = vsub.f32 1.0, %v3011_v17 }
 0x9d9   :  { %v2998_v0 = vmul.f32 %v3674_v38, %v2997_v45 }
 0x9da   :  { %v3013_v29 = vmul.f32 %v3676_v39, %v3012_v12 }
 0x9db   :  { %v2999_v28 = vadd.f32 %v3674_v38, %v2998_v0 }
 0x9dc   :  { %v3014_v20 = vadd.f32 %v3676_v39, %v3013_v29 }
 0x9dd   :  { %v3003_v9 = vsel %vm3002_vm6, %v3674_v38, %v2999_v28 }
 0x9de   :  { %v3008_v21 = vsel %vm3005_vm7, %v3007_v59, %v3003_v9  ;;  %v3018_v43 = vsel %vm3017_vm10, %v3676_v39, %v3014_v20 }
 0x9df   :  { %v3029_v37 = vmul.f32 %v3027_v42, %v3008_v21  ;;  %v3023_v3 = vsel %vm3020_vm11, %v3022_v4, %v3018_v43 }
 0x9e0   :  { %v3032_v26 = vsub.f32 1.0, %v3023_v3  ;;  %v3036_v1 = vmul.f32 %v3034_v31, %v3023_v3 }
 0x9e1   :  { %v3030_v24 = vadd.f32 %v3029_v37, %v4940_v13 }
 0x9e3   :  { %3677 = vtanh.f32 %v3030_v24 }
 0x9e9   :  { %v3678_v22 = vpop.eup %3677 }
 0x9ea   :  { %v3033_v40 = vmul.f32 %v3678_v22, %v3032_v26 }
 0x9ec   :  { %v3037_v27 = vadd.f32 %v3036_v1, %v3033_v40 }
 0x9ee   :  { %v3039_v10 = vrot.slane %v3037_v27, 5  ;;  %v3159_v29 = vrot.slane %v3037_v27, 7 }
 0x9f0   :  { %3436 = vmatmul.msk.f32.vlgmr.msra.gmra.mxu3 %vm163_vm0, %v3039_v10  ;;  %3437 = vmatmul.msk.f32.vlgmr.msra.gmra.mxu0 %vm163_vm0, %v3039_v10  ;;  %v3041_v50 = vadd.f32 %v3039_v10, %v4884_v57 }
 0x9f1   :  { %3438 = vmatmul.msk.f32.vlgmr.msra.gmra.mxu1 %vm163_vm0, %v3039_v10 }
 0xa6d   :  { %v3081_v23 = vpop.f32.mrf.mxu0 }
 0xa6e   :  { %v3107_v16 = vrot.slane %v3081_v23, 2  ;;  %v3101_v36 = vpop.f32.mrf.mxu1 }
 0xa6f   :  { %v3150_v61 = vadd.f32 %v4765_v48, %v3101_v36 }
 0xa70   :  { %v3111_v58 = vadd.f32 %v3107_v16, %v4168_v62 }
 0xa71   :  { %v3152_v38 = vrot.slane %v3150_v61, 2 }
 0xa72   :  { %v3440_v25 = vmul.f32 -1.442695, %v3111_v58 }
 0xa73   :  { %v3061_v30 = vpop.f32.mrf.mxu3 }
 0xa74   :  { %3679 = vpow2.f32 %v3440_v25  ;;  %v3106_v32 = vrot.slane %v3061_v30, 2 }
 0xa76   :  { %v3110_v6 = vadd.f32 %v3106_v32, %v4166_v60 }
 0xa78   :  { %v3439_v34 = vmul.f32 -1.442695, %v3110_v6 }
 0xa7a   :  { %v3680_v46 = vpop.eup %3679  ;;  %3681 = vpow2.f32 %v3439_v34 }
 0xa7b   :  { %v3119_v63 = vadd.f32 1.0, %v3680_v46 }
 0xa7d   :  { %3683 = vrcp.f32 %v3119_v63  ;;  %v3146_v41 = vand.u32 2147483648, %v3119_v63  ;;  %vm3140_vm2 = vweird.f32 %v3119_v63  ;;  %v3144_v12 = vand.u32 2147483647, %v3119_v63 }
 0xa7f   :  { %v3147_v2 = vor.u32 1.1754944e-38, %v3146_v41  ;;  %vm3145_vm4 = vcmp.eq.f32.partialorder %v3144_v12, 8.507059e+37 }
 0xa80   :  { %v3682_v18 = vpop.eup %3681 }
 0xa81   :  { %v3118_v33 = vadd.f32 1.0, %v3682_v18 }
 0xa83   :  { %3685 = vrcp.f32 %v3118_v33  ;;  %v3684_v49 = vpop.eup %3683  ;;  %v3131_v5 = vand.u32 2147483648, %v3118_v33  ;;  %v3129_v55 = vand.u32 2147483647, %v3118_v33  ;;  %vm3125_vm13 = vweird.f32 %v3118_v33 }
 0xa84   :  { %v3136_v57 = vmul.f32 %v3684_v49, %v3119_v63  ;;  %vm3141_vm1 = vweird.f32 %v3684_v49 }
 0xa85   :  { %v3132_v35 = vor.u32 1.1754944e-38, %v3131_v5  ;;  %vm3130_vm15 = vcmp.eq.f32.partialorder %v3129_v55, 8.507059e+37  ;;  %vm3142_vm3 = vmor %vm3140_vm2, %vm3141_vm1 }
 0xa86   :  { %v3137_v53 = vsub.f32 1.0, %v3136_v57 }
 0xa88   :  { %v3138_v52 = vmul.f32 %v3684_v49, %v3137_v53 }
 0xa89   :  { %v3686_v54 = vpop.eup %3685 }
 0xa8a   :  { %v3121_v44 = vmul.f32 %v3686_v54, %v3118_v33  ;;  %vm3126_vm12 = vweird.f32 %v3686_v54  ;;  %v3139_v8 = vadd.f32 %v3684_v49, %v3138_v52 }
 0xa8b   :  { %vm3127_vm14 = vmor %vm3125_vm13, %vm3126_vm12  ;;  %vm3296_vm12 = vcmask 1040384   ;;  %vm3301_vm13 = vcmask 0  }
 0xa8c   :  { %v3122_v51 = vsub.f32 1.0, %v3121_v44  ;;  %v3143_v0 = vsel %vm3142_vm3, %v3684_v49, %v3139_v8  ;;  %v3293_v8 = vrot.slane %v4716_v15, 7 }
 0xa8d   :  { %v3148_v19 = vsel %vm3145_vm4, %v3147_v2, %v3143_v0 }
 0xa8e   :  { %v3123_v7 = vmul.f32 %v3686_v54, %v3122_v51  ;;  %v3157_v28 = vsub.f32 1.0, %v3148_v19  ;;  %v3161_v42 = vmul.f32 %v3159_v29, %v3148_v19 }
 0xa90   :  { %v3124_v11 = vadd.f32 %v3686_v54, %v3123_v7 }
 0xa92   :  { %v3128_v39 = vsel %vm3127_vm14, %v3686_v54, %v3124_v11 }
 0xa93   :  { %v3133_v17 = vsel %vm3130_vm15, %v3132_v35, %v3128_v39 }
 0xa94   :  { %v3154_v45 = vmul.f32 %v3152_v38, %v3133_v17 }
 0xa96   :  { %v3155_v14 = vadd.f32 %v3154_v45, %v4940_v13 }
 0xa98   :  { %3687 = vtanh.f32 %v3155_v14 }
 0xa9e   :  { %v3688_v59 = vpop.eup %3687 }
 0xa9f   :  { %v3158_v9 = vmul.f32 %v3688_v59, %v3157_v28 }
 0xaa1   :  { %v3162_v21 = vadd.f32 %v3161_v42, %v3158_v9 }
 0xaa3   :  { %v3164_v20 = vrot.slane %v3162_v21, 6  ;;  %v3284_v7 = vrot.slane %v3162_v21, 7 }
 0xaa5   :  { %3441 = vmatmul.msk.f32.vlgmr.msra.gmra.mxu2 %vm163_vm0, %v3164_v20  ;;  %3442 = vmatmul.msk.f32.vlgmr.msrb.gmra.mxu3 %vm163_vm0, %v3164_v20  ;;  %v3166_v47 = vadd.f32 %v3164_v20, %v3041_v50 }
 0xaa6   :  { %3443 = vmatmul.msk.f32.vlgmr.msrb.gmra.mxu0 %vm163_vm0, %v3164_v20 }
 0xb23   :  { %v3226_v16 = vpop.f32.mrf.mxu0 }
 0xb28   :  { %v3186_v37 = vpop.f32.mrf.mxu2  ;;  %v3206_v56 = vpop.f32.mrf.mxu3 }
 0xb29   :  { %v3231_v24 = vrot.slane %v3186_v37, 1  ;;  %v3232_v43 = vrot.slane %v3206_v56, 1 }
 0xb2b   :  { %v3235_v4 = vadd.f32 %v3231_v24, %v4166_v60  ;;  %v3236_v3 = vadd.f32 %v3232_v43, %v4168_v62  ;;  %v3275_v62 = vadd.f32 %v4765_v48, %v3226_v16 }
 0xb2d   :  { %v3444_v31 = vmul.f32 -1.442695, %v3235_v4  ;;  %v3445_v26 = vmul.f32 -1.442695, %v3236_v3  ;;  %v3277_v18 = vrot.slane %v3275_v62, 1 }
 0xb2f   :  { %3689 = vpow2.f32 %v3444_v31 }
 0xb30   :  { %3691 = vpow2.f32 %v3445_v26 }
 0xb35   :  { %v3690_v22 = vpop.eup %3689 }
 0xb36   :  { %v3692_v40 = vpop.eup %3691  ;;  %v3243_v1 = vadd.f32 1.0, %v3690_v22 }
 0xb37   :  { %v3244_v27 = vadd.f32 1.0, %v3692_v40 }
 0xb38   :  { %3693 = vrcp.f32 %v3243_v1  ;;  %v3256_v30 = vand.u32 2147483648, %v3243_v1  ;;  %v3254_v6 = vand.u32 2147483647, %v3243_v1  ;;  %vm3250_vm5 = vweird.f32 %v3243_v1 }
 0xb39   :  { %3695 = vrcp.f32 %v3244_v27  ;;  %v3271_v54 = vand.u32 2147483648, %v3244_v27  ;;  %vm3265_vm9 = vweird.f32 %v3244_v27  ;;  %v3269_v53 = vand.u32 2147483647, %v3244_v27 }
 0xb3a   :  { %v3257_v63 = vor.u32 1.1754944e-38, %v3256_v30  ;;  %vm3255_vm7 = vcmp.eq.f32.partialorder %v3254_v6, 8.507059e+37 }
 0xb3b   :  { %v3272_v51 = vor.u32 1.1754944e-38, %v3271_v54  ;;  %vm3270_vm11 = vcmp.eq.f32.partialorder %v3269_v53, 8.507059e+37 }
 0xb3e   :  { %v3694_v10 = vpop.eup %3693 }
 0xb3f   :  { %v3696_v50 = vpop.eup %3695  ;;  %v3246_v23 = vmul.f32 %v3694_v10, %v3243_v1  ;;  %vm3251_vm0 = vweird.f32 %v3694_v10 }
 0xb40   :  { %v3261_v58 = vmul.f32 %v3696_v50, %v3244_v27  ;;  %vm3252_vm6 = vmor %vm3250_vm5, %vm3251_vm0  ;;  %vm3266_vm8 = vweird.f32 %v3696_v50 }
 0xb41   :  { %v3247_v25 = vsub.f32 1.0, %v3246_v23  ;;  %vm3267_vm10 = vmor %vm3265_vm9, %vm3266_vm8 }
 0xb42   :  { %v3262_v60 = vsub.f32 1.0, %v3261_v58 }
 0xb43   :  { %v3248_v32 = vmul.f32 %v3694_v10, %v3247_v25 }
 0xb44   :  { %v3263_v34 = vmul.f32 %v3696_v50, %v3262_v60 }
 0xb45   :  { %v3249_v46 = vadd.f32 %v3694_v10, %v3248_v32 }
 0xb46   :  { %v3264_v57 = vadd.f32 %v3696_v50, %v3263_v34 }
 0xb47   :  { %v3253_v33 = vsel %vm3252_vm6, %v3694_v10, %v3249_v46 }
 0xb48   :  { %v3258_v49 = vsel %vm3255_vm7, %v3257_v63, %v3253_v33  ;;  %v3268_v36 = vsel %vm3267_vm10, %v3696_v50, %v3264_v57 }
 0xb49   :  { %v3279_v44 = vmul.f32 %v3277_v18, %v3258_v49  ;;  %v3273_v5 = vsel %vm3270_vm11, %v3272_v51, %v3268_v36 }
 0xb4a   :  { %v3282_v61 = vsub.f32 1.0, %v3273_v5  ;;  %v3286_v11 = vmul.f32 %v3284_v7, %v3273_v5 }
 0xb4b   :  { %v3280_v48 = vadd.f32 %v3279_v44, %v4940_v13 }
 0xb4d   :  { %3697 = vtanh.f32 %v3280_v48 }
 0xb53   :  { %v3698_v55 = vpop.eup %3697 }
 0xb54   :  { %v3283_v52 = vmul.f32 %v3698_v55, %v3282_v61 }
 0xb56   :  { %v3287_v35 = vadd.f32 %v3286_v11, %v3283_v52 }
 0xb58   :  { %v3289_v38 = vrot.slane %v3287_v35, 7 }
 0xb5a   :  { %v3291_v39 = vadd.f32 %v3289_v38, %v3166_v47 }
 0xb5c   :  { %v3295_v17 = vmul.f32 %v3293_v8, %v3291_v39 }
 0xb5e   :  { %v3297_v41 = vsel %vm3296_vm12, %v3295_v17, 0.0 }
 0xb5f   :  { %3298 = vadd.xlane.f32.xlu0 %v3297_v41 }
 0xbd2   :  { %v3299_v13 = vpop.xlane.xlu0 %3298 }
 0xbd3   :  { %v3300_v45 = vmul.f32 0.0625, %v3299_v13 }
 0xbd5   :  { %3302 = vst.msk [vmem:[#allocation14] sm:$0x1] %vm3301_vm13, %v3300_v45 }
 0xbd6   :  { %3313 = dma.vmem_to_hbm [thread:$0]  %s3309_s3, 16, %s3311_s11, [#allocation4]  }
 0xbd7   :  { %3938 = dma.done.wait [#allocation4], 16  }
 0xbd8   :  { %3939 = vsyncadd [#allocation4], 4294967280 }
 0xbd9   :  { %3318 = vsyncpa [#allocation3], 1 }
 0xbda   :  { %3319 = vsyncpa [#allocation6], 1 }
 0xbdb   :  { %3320 = vsyncpa [#allocation9], 1 }
 0xbdc   :  { %3321 = vsyncpa [#allocation12], 1 }
 0xbdd   :  { %3322 = vsyncpa [#allocation4], 1 }

</bundles_post_ra>
